<compile_context>
chip_gen: v6e
topology: v6e:2x2x1
jax: 0.10.0
libtpu: 0.0.40
codegen_flags: <defaults>
</compile_context>

<pallas_src>
import numpy as np
import jax
import jax.numpy as jnp
from jax import lax
from jax.experimental import pallas as pl
from jax.experimental.pallas import tpu as pltpu

SQRT_HALF = 0.7071067811865476


def _erf_poly(z):
    """erf via Abramowitz & Stegun 7.1.26 (|abs err| < 1.5e-7). VPU/EUP ops only."""
    a = jnp.abs(z)
    t = 1.0 / (1.0 + 0.3275911 * a)
    poly = t * (0.254829592 + t * (-0.284496736 + t * (1.421413741
               + t * (-1.453152027 + t * 1.061405429))))
    e = 1.0 - poly * jnp.exp(-a * a)
    return jnp.where(z >= 0.0, e, -e)


def _gelu_exact(x):
    # torch.nn.functional.gelu default (approximate='none'): 0.5*x*(1+erf(x/sqrt(2)))
    return 0.5 * x * (1.0 + _erf_poly(x * SQRT_HALF))


# ----------------------------------------------------------------------------
# Kernel: one block_k-wide tile of the hidden dim: fc0-tile + GELU + fc1-tile.
# ----------------------------------------------------------------------------
def _head_kernel(feat_ref, rb_ref, w0a_ref, w1_ref, b1_ref, out_ref):
    """
    feat_ref : (Bp, F)       bf16, resident across the grid
    rb_ref   : (Bp, TK)      f32, precomputed ebv@W0b + b0 tile
    w0a_ref  : (F, TK)       bf16 fc0 weight tile (pre-tiled, contiguous in HBM)
    w1_ref   : (TK, NPAD)    bf16 fc1 weight tile (rows matching this hidden tile)
    b1_ref   : (1, NPAD)     f32 fc1 bias (padded), resident
    out_ref  : (Bp, NPAD)    f32 partial accumulator (VMEM-resident over axis j)
    """
    c = pl.program_id(0)          # TensorCore (megacore split of the hidden dim)
    j = pl.program_id(1)          # hidden-dim tile within this core

    # fc0 tile on the MXU: bf16 inputs, f32 accumulation.
    h = jnp.dot(feat_ref[...], w0a_ref[...], preferred_element_type=jnp.float32)
    h = h + rb_ref[...]           # ebv contribution + fc0 bias (precomputed)
    g = _gelu_exact(h)

    # fc1 partial for this hidden tile: bf16 inputs, f32 accumulation.
    contrib = jnp.dot(g.astype(w1_ref.dtype), w1_ref[...],
                      preferred_element_type=jnp.float32)

    @pl.when(j == 0)
    def _init():
        out_ref[...] = jnp.zeros_like(out_ref)

    out_ref[...] += contrib

    # Fold fc1's bias in on the last step of core 0 only (partials are summed).
    @pl.when(jnp.logical_and(j == pl.num_programs(1) - 1, c == 0))
    def _bias():
        out_ref[...] += b1_ref[...]


# ----------------------------------------------------------------------------
# Chip-aware configuration + one-time weight preparation.
# ----------------------------------------------------------------------------
def _num_tensorcores_per_chip():
    """Best-effort query; defaults to 1 (correct everywhere, just no megacore split)."""
    try:
        info = pltpu.get_tpu_info()
        for name in ("num_tensorcores", "tensorcores_per_chip", "num_cores",
                     "cores_per_chip"):
            v = getattr(info, name, None)
            if isinstance(v, int) and v >= 1:
                return v
    except Exception:
        pass
    try:
        kind = jax.devices()[0].device_kind.lower()
        if "v7" in kind:          # v7x: 2 TensorCores per chip
            return 2
    except Exception:
        pass
    return 1


def _choose_block_k(hid, n_par):
    """>=2 inner steps per core (keeps weight-DMA double-buffered), <=1024-wide tiles."""
    bk = min(1024, max(128, hid // (2 * n_par)))
    bk = (bk // 128) * 128
    while bk > 128 and hid % (bk * n_par) != 0:
        bk -= 128
    return bk


def prepare_head_params(w0, b0, w1, b1, *, ebv_dim, weight_dtype=jnp.bfloat16,
                        n_par=None, block_k=None):
    """Split / cast / pad / pre-tile the fc0+fc1 weights once, off the hot path."""
    in_dim, hid = w0.shape
    feat_dim = in_dim - ebv_dim
    n_classes = w1.shape[1]
    assert w1.shape[0] == hid and feat_dim > 0

    if n_par is None:
        n_par = 2 if _num_tensorcores_per_chip() >= 2 else 1
    if hid % (256 * n_par) != 0:
        n_par = 1
    if block_k is None:
        block_k = _choose_block_k(hid, n_par)
    assert hid % (block_k * n_par) == 0

    n_tiles = hid // block_k
    n_pad = ((n_classes + 127) // 128) * 128

    w0f = w0.astype(jnp.float32)
    w1f = w1.astype(jnp.float32)

    # W0 split row-wise so cat([feat, ebv]) is never materialized; W0a pre-tiled
    # (n_tiles, F, block_k) so each grid step's weight DMA is one contiguous slab.
    w0a_t = (w0f[:feat_dim].astype(weight_dtype)
             .reshape(feat_dim, n_tiles, block_k).transpose(1, 0, 2))
    w0b = w0f[feat_dim:]                                    # (ebv_dim, hid), tiny, f32
    b0r = b0.reshape(1, hid).astype(jnp.float32)

    # fc1 weights: zero-pad 300 -> 384 lanes, pre-tiled (n_tiles, block_k, n_pad).
    w1_t = (jnp.zeros((hid, n_pad), weight_dtype)
            .at[:, :n_classes].set(w1f.astype(weight_dtype))
            .reshape(n_tiles, block_k, n_pad))
    b1p = jnp.zeros((1, n_pad), jnp.float32).at[:, :n_classes].set(
        b1.astype(jnp.float32))

    return dict(w0a_t=w0a_t, w0b=w0b, b0r=b0r, w1_t=w1_t, b1p=b1p,
                feat_dim=feat_dim, ebv_dim=ebv_dim, hid=hid,
                n_classes=n_classes, n_pad=n_pad,
                n_par=n_par, block_k=block_k, n_tiles=n_tiles,
                weight_dtype=weight_dtype)


# ----------------------------------------------------------------------------
# Fused head: fc0 -> exact GELU -> fc1, streamed over the hidden dim.
# ----------------------------------------------------------------------------
def conv_model_head(feat, ebv, params):
    p = params
    B = feat.shape[0]
    assert feat.shape[1] == p["feat_dim"] and ebv.shape[1] == p["ebv_dim"]

    b_pad = ((B + 7) // 8) * 8
    feat32 = feat.astype(jnp.float32)
    ebv32 = ebv.astype(jnp.float32)
    if b_pad != B:
        feat32 = jnp.pad(feat32, ((0, b_pad - B), (0, 0)))
        ebv32 = jnp.pad(ebv32, ((0, b_pad - B), (0, 0)))
    feat_w = feat32.astype(p["weight_dtype"])               # bf16 into the MXU

    # ebv contribution + fc0 bias folded into one tiny (B,2)x(2,H) XLA matmul.
    row_bias = jnp.dot(ebv32, p["w0b"],
                       preferred_element_type=jnp.float32) + p["b0r"]

    n_par = p["n_par"]
    block_k = p["block_k"]
    ti = p["n_tiles"] // n_par
    F = p["feat_dim"]
    n_pad = p["n_pad"]

    partials = pl.pallas_call(
        _head_kernel,
        out_shape=jax.ShapeDtypeStruct((n_par, b_pad, n_pad), jnp.float32),
        grid=(n_par, ti),
        in_specs=[
            pl.BlockSpec((b_pad, F), lambda c, j: (0, 0)),                       # feat (resident)
            pl.BlockSpec((b_pad, block_k), lambda c, j: (0, c * ti + j)),        # row_bias tile
            pl.BlockSpec((None, F, block_k), lambda c, j: (c * ti + j, 0, 0)),   # W0a tile (contig)
            pl.BlockSpec((None, block_k, n_pad), lambda c, j: (c * ti + j, 0, 0)),  # W1 tile
            pl.BlockSpec((1, n_pad), lambda c, j: (0, 0)),                       # b1 (resident)
        ],
        out_specs=pl.BlockSpec((None, b_pad, n_pad), lambda c, j: (c, 0, 0)),
        compiler_params=pltpu.CompilerParams(
            dimension_semantics=("parallel", "arbitrary"),
            vmem_limit_bytes=32 * 1024 * 1024),
    )(feat_w, row_bias, p["w0a_t"], p["w1_t"], p["b1p"])

    out = partials[0] if n_par == 1 else partials.sum(axis=0)
    return out[:B, :p["n_classes"]]


def conv_model_forward(x, ebv, base_fn, params):
    """ConvModel.forward: Base(x) -> cat with ebv -> fc0 -> GELU -> fc1."""
    feat = base_fn(x)            # injected backbone, applied outside the kernel
    return conv_model_head(feat, ebv, params)


# ----------------------------------------------------------------------------
# References.
# ----------------------------------------------------------------------------
def conv_model_reference_f32(feat, ebv, w0, b0, w1, b1):
    """Pure-JAX f32 reference of the head (exact erf GELU, high-precision dots)."""
    xx = jnp.concatenate([feat, ebv], axis=1).astype(jnp.float32)
    h = jnp.dot(xx, w0, precision=lax.Precision.HIGHEST) + b0
    g = jax.nn.gelu(h, approximate=False)
    return jnp.dot(g, w1, precision=lax.Precision.HIGHEST) + b1


def conv_model_reference_bf16(feat, ebv, w0, b0, w1, b1):
    """Pure-JAX reference using the kernel's numerics (bf16 weights, f32 accum)."""
    F = feat.shape[1]
    w0a = w0[:F].astype(jnp.bfloat16)
    w0b = w0[F:].astype(jnp.float32)
    h = jnp.dot(feat.astype(jnp.bfloat16), w0a, preferred_element_type=jnp.float32)
    h = h + jnp.dot(ebv.astype(jnp.float32), w0b,
                    preferred_element_type=jnp.float32) + b0
    g = _gelu_exact(h)
    out = jnp.dot(g.astype(jnp.bfloat16), w1.astype(jnp.bfloat16),
                  preferred_element_type=jnp.float32) + b1
    return out


if __name__ == "__main__":
    B = 2
    C_IN, H_IN, W_IN = 4, 16, 16        # image fed to Base
    FEAT = 1536                         # Base output width
    EBV = 2                             # 1536 + 2 == 1538 == fc0.in_features
    HID = 2048
    NUM_CLASSES = 300

    key = jax.random.PRNGKey(0)
    ks = jax.random.split(key, 7)

    x_img = jax.random.normal(ks[0], (B, C_IN, H_IN, W_IN), jnp.float32)
    ebv = jax.random.normal(ks[1], (B, EBV), jnp.float32)

    # Stand-in Base (see TODO at top): flatten + fixed deterministic projection.
    w_base = (1.0 / np.sqrt(C_IN * H_IN * W_IN)) * jax.random.normal(
        ks[2], (C_IN * H_IN * W_IN, FEAT), jnp.float32)
    base_fn = lambda img: jnp.dot(img.reshape(img.shape[0], -1), w_base)

    # fc0 / fc1 parameters (stored as (in, out) here).
    w0 = (1.0 / np.sqrt(FEAT + EBV)) * jax.random.normal(ks[3], (FEAT + EBV, HID), jnp.float32)
    b0 = 0.1 * jax.random.normal(ks[4], (HID,), jnp.float32)
    w1 = (1.0 / np.sqrt(HID)) * jax.random.normal(ks[5], (HID, NUM_CLASSES), jnp.float32)
    b1 = 0.1 * jax.random.normal(ks[6], (NUM_CLASSES,), jnp.float32)

    # One-time weight preparation (bf16 cast, split, pad, pre-tile, chip-aware tiling).
    params = prepare_head_params(w0, b0, w1, b1, ebv_dim=EBV)

    out = jax.block_until_ready(conv_model_forward(x_img, ebv, base_fn, params))
    assert out.shape == (B, NUM_CLASSES)

    feat = base_fn(x_img)
    # Structural check: kernel vs a pure-JAX reference with identical bf16 numerics.
    ref_bf16 = jax.block_until_ready(conv_model_reference_bf16(feat, ebv, w0, b0, w1, b1))
    np.testing.assert_allclose(np.asarray(out), np.asarray(ref_bf16), rtol=1e-3, atol=1e-3)
    # Fidelity check vs the full-f32 torch semantics (bf16 weight streaming bounds the error).
    ref_f32 = jax.block_until_ready(conv_model_reference_f32(feat, ebv, w0, b0, w1, b1))
    np.testing.assert_allclose(np.asarray(out), np.asarray(ref_f32), rtol=3e-2, atol=3e-2)

    print("KERNEL_OK")
</pallas_src>

<mosaic_0001>
module attributes {stable_mosaic.version = 11 : i64} {
  func.func @_head_kernel(%arg0: i32, %arg1: i32, %arg2: memref<8x1536xbf16, #tpu.memory_space<vmem>>, %arg3: memref<8x1024xf32, #tpu.memory_space<vmem>>, %arg4: memref<1x1536x1024xbf16, #tpu.memory_space<vmem>>, %arg5: memref<1x1024x384xbf16, #tpu.memory_space<vmem>>, %arg6: memref<1x384xf32, #tpu.memory_space<vmem>>, %arg7: memref<1x8x384xf32, #tpu.memory_space<vmem>>) attributes {dimension_semantics = [#tpu.dimension_semantics<parallel>, #tpu.dimension_semantics<arbitrary>], iteration_bounds = array<i64: 1, 2>, scalar_prefetch = 0 : i64, scratch_operands = 0 : i64, tpu.core_type = #tpu.core_type<tc>, window_params = [{pipeline_mode = #tpu.pipeline_mode<synchronous>, transform_indices = @transform_0, window_bounds = array<i64: 8, 1536>}, {transform_indices = @transform_1, window_bounds = array<i64: 8, 1024>}, {transform_indices = @transform_2, window_bounds = array<i64: 1, 1536, 1024>}, {transform_indices = @transform_3, window_bounds = array<i64: 1, 1024, 384>}, {pipeline_mode = #tpu.pipeline_mode<synchronous>, transform_indices = @transform_4, window_bounds = array<i64: 1, 384>}, {transform_indices = @transform_5, window_bounds = array<i64: 1, 8, 384>}]} {
    %c0 = arith.constant 0 : index
    %c0_0 = arith.constant 0 : index
    %0 = vector.load %arg2[%c0, %c0_0] : memref<8x1536xbf16, #tpu.memory_space<vmem>>, vector<8x1536xbf16>
    %c0_1 = arith.constant 0 : index
    %c0_2 = arith.constant 0 : index
    %c0_3 = arith.constant 0 : index
    %1 = vector.load %arg4[%c0_1, %c0_2, %c0_3] : memref<1x1536x1024xbf16, #tpu.memory_space<vmem>>, vector<1x1536x1024xbf16>
    %2 = vector.shape_cast %1 : vector<1x1536x1024xbf16> to vector<1536x1024xbf16>
    %cst = arith.constant dense<0.000000e+00> : vector<8x1024xf32>
    %3 = tpu.matmul %0, %2, %cst {dimension_numbers = #tpu.dot_dimension_numbers<[1], [0], [0], [1], [0, 0, 1, 1], [], []>} : vector<8x1536xbf16>, vector<1536x1024xbf16>, vector<8x1024xf32> -> vector<8x1024xf32>
    %c0_4 = arith.constant 0 : index
    %c0_5 = arith.constant 0 : index
    %4 = vector.load %arg3[%c0_4, %c0_5] : memref<8x1024xf32, #tpu.memory_space<vmem>>, vector<8x1024xf32>
    %5 = arith.addf %3, %4 : vector<8x1024xf32>
    %cst_6 = arith.constant 5.000000e-01 : f32
    %6 = vector.broadcast %cst_6 : f32 to vector<8x1024xf32>
    %7 = arith.mulf %6, %5 : vector<8x1024xf32>
    %cst_7 = arith.constant 0.707106769 : f32
    %8 = vector.broadcast %cst_7 : f32 to vector<8x1024xf32>
    %9 = arith.mulf %5, %8 : vector<8x1024xf32>
    %10 = math.absf %9 : vector<8x1024xf32>
    %cst_8 = arith.constant 0.327591091 : f32
    %11 = vector.broadcast %cst_8 : f32 to vector<8x1024xf32>
    %12 = arith.mulf %11, %10 : vector<8x1024xf32>
    %cst_9 = arith.constant 1.000000e+00 : f32
    %13 = vector.broadcast %cst_9 : f32 to vector<8x1024xf32>
    %14 = arith.addf %13, %12 : vector<8x1024xf32>
    %cst_10 = arith.constant 1.000000e+00 : f32
    %15 = vector.broadcast %cst_10 : f32 to vector<8x1024xf32>
    %16 = arith.divf %15, %14 : vector<8x1024xf32>
    %cst_11 = arith.constant 1.06140542 : f32
    %17 = vector.broadcast %cst_11 : f32 to vector<8x1024xf32>
    %18 = arith.mulf %16, %17 : vector<8x1024xf32>
    %cst_12 = arith.constant -1.45315206 : f32
    %19 = vector.broadcast %cst_12 : f32 to vector<8x1024xf32>
    %20 = arith.addf %19, %18 : vector<8x1024xf32>
    %21 = arith.mulf %16, %20 : vector<8x1024xf32>
    %cst_13 = arith.constant 1.42141378 : f32
    %22 = vector.broadcast %cst_13 : f32 to vector<8x1024xf32>
    %23 = arith.addf %22, %21 : vector<8x1024xf32>
    %24 = arith.mulf %16, %23 : vector<8x1024xf32>
    %cst_14 = arith.constant -0.284496725 : f32
    %25 = vector.broadcast %cst_14 : f32 to vector<8x1024xf32>
    %26 = arith.addf %25, %24 : vector<8x1024xf32>
    %27 = arith.mulf %16, %26 : vector<8x1024xf32>
    %cst_15 = arith.constant 0.254829586 : f32
    %28 = vector.broadcast %cst_15 : f32 to vector<8x1024xf32>
    %29 = arith.addf %28, %27 : vector<8x1024xf32>
    %30 = arith.mulf %16, %29 : vector<8x1024xf32>
    %cst_16 = arith.constant 0.000000e+00 : f32
    %31 = vector.broadcast %cst_16 : f32 to vector<8x1024xf32>
    %32 = arith.subf %31, %10 : vector<8x1024xf32>
    %33 = arith.mulf %32, %10 : vector<8x1024xf32>
    %34 = math.exp %33 : vector<8x1024xf32>
    %35 = arith.mulf %30, %34 : vector<8x1024xf32>
    %cst_17 = arith.constant 1.000000e+00 : f32
    %36 = vector.broadcast %cst_17 : f32 to vector<8x1024xf32>
    %37 = arith.subf %36, %35 : vector<8x1024xf32>
    %cst_18 = arith.constant 0.000000e+00 : f32
    %38 = vector.broadcast %cst_18 : f32 to vector<8x1024xf32>
    %39 = arith.cmpf oge, %9, %38 : vector<8x1024xf32>
    %cst_19 = arith.constant 0.000000e+00 : f32
    %40 = vector.broadcast %cst_19 : f32 to vector<8x1024xf32>
    %41 = arith.subf %40, %37 : vector<8x1024xf32>
    %42 = arith.select %39, %37, %41 : vector<8x1024xi1>, vector<8x1024xf32>
    %cst_20 = arith.constant 1.000000e+00 : f32
    %43 = vector.broadcast %cst_20 : f32 to vector<8x1024xf32>
    %44 = arith.addf %43, %42 : vector<8x1024xf32>
    %45 = arith.mulf %7, %44 : vector<8x1024xf32>
    %46 = arith.truncf %45 : vector<8x1024xf32> to vector<8x1024xbf16>
    %c0_21 = arith.constant 0 : index
    %c0_22 = arith.constant 0 : index
    %c0_23 = arith.constant 0 : index
    %47 = vector.load %arg5[%c0_21, %c0_22, %c0_23] : memref<1x1024x384xbf16, #tpu.memory_space<vmem>>, vector<1x1024x384xbf16>
    %48 = vector.shape_cast %47 : vector<1x1024x384xbf16> to vector<1024x384xbf16>
    %cst_24 = arith.constant dense<0.000000e+00> : vector<8x384xf32>
    %49 = tpu.matmul %46, %48, %cst_24 {dimension_numbers = #tpu.dot_dimension_numbers<[1], [0], [0], [1], [0, 0, 1, 1], [], []>} : vector<8x1024xbf16>, vector<1024x384xbf16>, vector<8x384xf32> -> vector<8x384xf32>
    %c0_i32 = arith.constant 0 : i32
    %50 = arith.cmpi eq, %arg1, %c0_i32 : i32
    %51 = arith.extui %50 : i1 to i32
    %c0_i32_25 = arith.constant 0 : i32
    %52 = arith.cmpi ne, %51, %c0_i32_25 : i32
    scf.if %52 {
      %cst_34 = arith.constant 0.000000e+00 : f32
      %64 = vector.broadcast %cst_34 : f32 to vector<8x384xf32>
      %c0_35 = arith.constant 0 : index
      %c0_36 = arith.constant 0 : index
      %c0_37 = arith.constant 0 : index
      %65 = vector.load %arg7[%c0_35, %c0_36, %c0_37] : memref<1x8x384xf32, #tpu.memory_space<vmem>>, vector<1x8x384xf32>
      %66 = vector.shape_cast %65 : vector<1x8x384xf32> to vector<8x384xf32>
      %67 = vector.shape_cast %64 : vector<8x384xf32> to vector<1x8x384xf32>
      tpu.vector_store %arg7[%c0_35, %c0_36, %c0_37], %67 {strides = array<i32>} : memref<1x8x384xf32, #tpu.memory_space<vmem>>, vector<1x8x384xf32>,
    } else {
    }
    %c0_26 = arith.constant 0 : index
    %c0_27 = arith.constant 0 : index
    %c0_28 = arith.constant 0 : index
    %53 = vector.load %arg7[%c0_26, %c0_27, %c0_28] : memref<1x8x384xf32, #tpu.memory_space<vmem>>, vector<1x8x384xf32>
    %54 = vector.shape_cast %53 : vector<1x8x384xf32> to vector<8x384xf32>
    %55 = arith.addf %54, %49 : vector<8x384xf32>
    %c0_29 = arith.constant 0 : index
    %c0_30 = arith.constant 0 : index
    %c0_31 = arith.constant 0 : index
    %56 = vector.load %arg7[%c0_29, %c0_30, %c0_31] : memref<1x8x384xf32, #tpu.memory_space<vmem>>, vector<1x8x384xf32>
    %57 = vector.shape_cast %56 : vector<1x8x384xf32> to vector<8x384xf32>
    %58 = vector.shape_cast %55 : vector<8x384xf32> to vector<1x8x384xf32>
    tpu.vector_store %arg7[%c0_29, %c0_30, %c0_31], %58 {strides = array<i32>} : memref<1x8x384xf32, #tpu.memory_space<vmem>>, vector<1x8x384xf32>,
    %c1_i32 = arith.constant 1 : i32
    %59 = arith.cmpi eq, %arg1, %c1_i32 : i32
    %c0_i32_32 = arith.constant 0 : i32
    %60 = arith.cmpi eq, %arg0, %c0_i32_32 : i32
    %61 = arith.andi %59, %60 : i1
    %62 = arith.extui %61 : i1 to i32
    %c0_i32_33 = arith.constant 0 : i32
    %63 = arith.cmpi ne, %62, %c0_i32_33 : i32
    scf.if %63 {
      %c0_34 = arith.constant 0 : index
      %c0_35 = arith.constant 0 : index
      %c0_36 = arith.constant 0 : index
      %64 = vector.load %arg7[%c0_34, %c0_35, %c0_36] : memref<1x8x384xf32, #tpu.memory_space<vmem>>, vector<1x8x384xf32>
      %65 = vector.shape_cast %64 : vector<1x8x384xf32> to vector<8x384xf32>
      %c0_37 = arith.constant 0 : index
      %c0_38 = arith.constant 0 : index
      %66 = vector.load %arg6[%c0_37, %c0_38] : memref<1x384xf32, #tpu.memory_space<vmem>>, vector<1x384xf32>
      %67 = vector.broadcast %66 : vector<1x384xf32> to vector<8x384xf32>
      %68 = arith.addf %65, %67 : vector<8x384xf32>
      %c0_39 = arith.constant 0 : index
      %c0_40 = arith.constant 0 : index
      %c0_41 = arith.constant 0 : index
      %69 = vector.load %arg7[%c0_39, %c0_40, %c0_41] : memref<1x8x384xf32, #tpu.memory_space<vmem>>, vector<1x8x384xf32>
      %70 = vector.shape_cast %69 : vector<1x8x384xf32> to vector<8x384xf32>
      %71 = vector.shape_cast %68 : vector<8x384xf32> to vector<1x8x384xf32>
      tpu.vector_store %arg7[%c0_39, %c0_40, %c0_41], %71 {strides = array<i32>} : memref<1x8x384xf32, #tpu.memory_space<vmem>>, vector<1x8x384xf32>,
    } else {
    }
    return
  }
  func.func @transform_0(%arg0: i32, %arg1: i32) -> (i32, i32) {
    %c0_i32 = arith.constant 0 : i32
    %c0_i32_0 = arith.constant 0 : i32
    %c0_i32_1 = arith.constant 0 : i32
    return %c0_i32, %c0_i32_0 : i32, i32
  }
  func.func @transform_1(%arg0: i32, %arg1: i32) -> (i32, i32) {
    %c2_i32 = arith.constant 2 : i32
    %0 = arith.muli %arg0, %c2_i32 : i32
    %1 = arith.addi %0, %arg1 : i32
    %c0_i32 = arith.constant 0 : i32
    %c0_i32_0 = arith.constant 0 : i32
    return %c0_i32, %1 : i32, i32
  }
  func.func @transform_2(%arg0: i32, %arg1: i32) -> (i32, i32, i32) {
    %c2_i32 = arith.constant 2 : i32
    %0 = arith.muli %arg0, %c2_i32 : i32
    %1 = arith.addi %0, %arg1 : i32
    %c0_i32 = arith.constant 0 : i32
    %c0_i32_0 = arith.constant 0 : i32
    %c0_i32_1 = arith.constant 0 : i32
    return %1, %c0_i32, %c0_i32_0 : i32, i32, i32
  }
  func.func @transform_3(%arg0: i32, %arg1: i32) -> (i32, i32, i32) {
    %c2_i32 = arith.constant 2 : i32
    %0 = arith.muli %arg0, %c2_i32 : i32
    %1 = arith.addi %0, %arg1 : i32
    %c0_i32 = arith.constant 0 : i32
    %c0_i32_0 = arith.constant 0 : i32
    %c0_i32_1 = arith.constant 0 : i32
    return %1, %c0_i32, %c0_i32_0 : i32, i32, i32
  }
  func.func @transform_4(%arg0: i32, %arg1: i32) -> (i32, i32) {
    %c0_i32 = arith.constant 0 : i32
    %c0_i32_0 = arith.constant 0 : i32
    %c0_i32_1 = arith.constant 0 : i32
    return %c0_i32, %c0_i32_0 : i32, i32
  }
  func.func @transform_5(%arg0: i32, %arg1: i32) -> (i32, i32, i32) {
    %c0_i32 = arith.constant 0 : i32
    %c0_i32_0 = arith.constant 0 : i32
    %c0_i32_1 = arith.constant 0 : i32
    return %arg0, %c0_i32, %c0_i32_0 : i32, i32, i32
  }
}

</mosaic_0001>

<bundles_post_ra>
// kernel: tpu_custom_call.1
= control target key start
LH: loop header
LB: loop body
LE: loop exit
PB: predicated region body
PF: predicated region fallthrough
CT: control target
= control target key end

     0   :  { %s11265_s0 = inlined_call_operand.hbm [shape: bf16[8,1536], index: 0, kind: input, shape index: {}]   ;;  %s11266_s1 = inlined_call_operand.hbm [shape: f32[8,2048], index: 1, kind: input, shape index: {}]   ;;  %s11267_s2 = inlined_call_operand.hbm [shape: bf16[2,1536,1024], index: 2, kind: input, shape index: {}]   ;;  %s11268_s3 = inlined_call_operand.hbm [shape: bf16[2,1024,384], index: 3, kind: input, shape index: {}]   ;;  %s11269_s4 = inlined_call_operand.hbm [shape: f32[1,384], index: 4, kind: input, shape index: {}]   ;;  %s11270_s5 = inlined_call_operand.hbm [shape: f32[1,8,384], index: 5, kind: output, shape index: {}]  }
   0x1   :  { %11272 = sst [smem:[#allocation17_spill]] %s11265_s0 }
   0x2   :  { %11273 = sst [smem:[#allocation18_spill]] %s11266_s1 }
   0x3   :  { %10 = vsyncpa [#allocation3], 0 }
   0x4   :  { %11 = vsyncpa [#allocation6], 0 }
   0x5   :  { %13 = vsyncpa [#allocation6 + $0x1], 0 }
   0x6   :  { %14 = vsyncpa [#allocation9], 0 }
   0x7   :  { %16 = vsyncpa [#allocation9 + $0x1], 0 }
   0x8   :  { %17 = vsyncpa [#allocation4], 0  ;;  %s9794_s18 = smov 0   ;;  %s9796_s19 = smov 0  }
   0x9   :  { %s9798_s20 = smov 0   ;;  %s9800_s21 = smov 0  }
   0xa   :  { %s9802_s22 = smov 0   ;;  %s9804_s23 = smov 0  }
   0xb LB: > { %s9823_s24 = sadd.s32 4294967295, %s9751_s23   ;;  %p80_p0 = scmp.ne.s32.totalorder %s9735_s19, %s9731_s18  ;;  %s9751_s23 = sphi %s9804_s23, %s23_s23   ;;  %s9747_s22 = sphi %s9802_s22, %s11285_s22   ;;  %s9743_s21 = sphi %s9800_s21, %s11284_s21   ;;  %s9739_s20 = sphi %s9798_s20, %s11283_s20   ;;  %s9735_s19 = sphi %s9796_s19, %s11282_s19   ;;  %s9731_s18 = sphi %s9794_s18, %s11281_s18  }
   0xc   : > { %p81_p1 = scmp.eq.s32.totalorder %s9823_s24, 0  ;;  %p8040_p2 = scmp.ge.s32.totalorder %s9751_s23, 1 }
   0xd   : > { %p198_p3 = scmp.lt.s32.totalorder %s9751_s23, 3  ;;  %s9753_s27 = smov [#allocation10]  }
   0xe   : > { %p9831_p4 = por %p81_p1, %p80_p0  ;;  %s222_s28 = sshll.u32 %s9753_s27, 4  ;;  %s223_s28 = int_to_ptr.vmem [resolvable:$true] %s222_s28 }
   0xf   : > { %p9835_p5 = pnand %p8040_p2, %p198_p3  ;;  %s32_s30 = sadd.s32 1, %s9747_s22 }
  0x10   : > { %s67_s6 = sadd.s32 1, %s9739_s20  ;;  %p33_p8 = scmp.ge.s32.totalorder %s32_s30, 2 }
  0x11   : > { %p9145_p6 = pneg %p9835_p5  ;;  %s9536_s7 = scalar_lea.vmem %s223_s28, 48 }
  0x12   : > { %p9537_p10 = scmp.ne.s32.totalorder %s223_s28, %s9536_s7  ;;  %s9543_s8 = scalar_lea.vmem %s223_s28, 64 }
  0x13   : > { %p9843_p7 = pnand %p9145_p6, %p81_p1  ;;  %p9544_p13 = scmp.lt.s32.totalorder %s223_s28, %s223_s28 }
  0x14   : > { %p9545_p0 = scmp.lt.s32.totalorder %s9543_s8, %s9536_s7 }
  0x15   : > { %p9527_p9 = pneg %p9843_p7 }
  0x16   : > { %p9546_p2 = por %p9545_p0, %p9544_p13 }
  0x17   : > { %p9539_p11 = pnand %p9537_p10, %p9527_p9 }
  0x19   : > { %p9540_p12 = pneg %p9539_p11 }
  0x1b   : > { %p9547_p3 = pnand %p9546_p2, %p9540_p12 }
  0x1d   : > { %9550 = shalt.err (!%p9547_p3)
}
  0x1e   : > { %9151 = dma.hbm_to_vmem [thread:$0]  (!%p9843_p7), %s11269_s4, 48, %s223_s28, [#allocation9]  }
  0x1f   : > { %s11287_s30 = smov (%p33_p8, %s32_s30), 0  ;;  %p74_p6 = scmp.ne.s32.totalorder %s9739_s20, %s9735_s19 }
  0x20   : > { %p75_p10 = scmp.eq.s32.totalorder %s9751_s23, 0  ;;  %s64_s11 = ssub.s32 %s9747_s22, %s11287_s30 }
  0x21   : > { %p9164_p11 = scmp.lt.s32.totalorder %s9751_s23, 2  ;;  %p65_p12 = scmp.eq.s32.totalorder %s64_s11, 0 }
  0x22   : > { %p76_p13 = por %p75_p10, %p74_p6  ;;  %s11271_s12 = sand.u32 1, %s9751_s23  }
  0x23   : > { %s9869_s13 = sand.u32 1, %s9739_s20   ;;  %s9031_s16 = sshll.u32 %s9747_s22, 10 }
  0x24   : > { %s9872_s14 = scalar_select %p65_p12, %s9739_s20, %s67_s6  }
  0x25   : > { %s8044_s15 = sshll.u32 %s9869_s13, 6  ;;  %s11277_s1 = sld [smem:[#allocation18_spill]] }
  0x26   : > { %s237_s28 = scalar_lea.vmem [#allocation5], %s8044_s15  ;;  %p9879_p8 = pnand %p9164_p11, %p76_p13 }
  0x27   : > { %s247_s7 = sshll.u32 %s237_s28, 4  ;;  %s9121_s9 = smul.u32 6144, %s9869_s13  ;;  %s248_s7 = int_to_ptr.vmem [resolvable:$true] %s247_s7 }
  0x28   : > { %s9123_s10 = smul.u32 1536, %s9869_s13  ;;  %s9887_s6 = scalar_lea.sflag [#allocation6], %s11271_s12 }
  0x29   : > { %p9553_p0 = pneg %p9879_p8  ;;  %s9564_s11 = scalar_lea.vmem %s248_s7, 1024 }
  0x2a   : > { %p9565_p2 = scmp.ne.s32.totalorder %s248_s7, %s9564_s11  ;;  %s9754_s15 = smov [#allocation5]  }
  0x2b   : > { %s245_s27 = scalar_lea.hbm %s11277_s1, %s9031_s16  ;;  %s9569_s16 = sshll.u32 %s9754_s15, 4  ;;  %s9570_s16 = int_to_ptr.vmem [resolvable:$false] %s9569_s16 }
  0x2c   : > { %p9567_p3 = pnand %p9565_p2, %p9553_p0  ;;  %s9571_s17 = scalar_lea.vmem %s9570_s16, 2048 }
  0x2d   : > { %p9572_p10 = scmp.lt.s32.totalorder %s248_s7, %s9570_s16  ;;  %p9573_p11 = scmp.lt.s32.totalorder %s9571_s17, %s9564_s11 }
  0x2e   : > { %p9568_p6 = pneg %p9567_p3 }
  0x2f   : > { %p9574_p12 = por %p9573_p11, %p9572_p10 }
  0x31   : > { %p9575_p13 = pnand %p9574_p12, %p9568_p6 }
  0x33   : > { %9578 = shalt.err (!%p9575_p13)
}
  0x34   : > { %9155 = dma.hbm_to_vmem [thread:$0]  (!%p9879_p8), %s245_s27, 1024, %s248_s7, %s9887_s6  }
  0x35   : > { %s258_s13 = scalar_lea.vmem [#allocation7], %s9121_s9  ;;  %s281_s28 = scalar_lea.vmem [#allocation8], %s9123_s10 }
  0x36   : > { %s267_s18 = sshll.u32 %s258_s13, 4  ;;  %s290_s12 = sshll.u32 %s281_s28, 4  ;;  %s9897_s18 = int_to_ptr.vmem [resolvable:$true] %s267_s18  ;;  %s9899_s12 = int_to_ptr.vmem [resolvable:$true] %s290_s12 }
  0x37   : > { %s9755_s15 = smov [#allocation2]   ;;  %s9122_s11 = smul.u32 98304, %s9747_s22 }
  0x38   : > { %s211_s16 = sshll.u32 %s9755_s15, 4  ;;  %s212_s16 = int_to_ptr.vmem [resolvable:$true] %s211_s16 }
  0x39   : > { %s9590_s17 = scalar_lea.vmem %s212_s16, 768  ;;  %p9598_p10 = scmp.lt.s32.totalorder %s212_s16, %s212_s16 }
  0x3a   : > { %p9591_p2 = scmp.ne.s32.totalorder %s212_s16, %s9590_s17  ;;  %p9599_p11 = scmp.lt.s32.totalorder %s9590_s17, %s9590_s17 }
  0x3c   : > { %p9593_p3 = pnand %p9591_p2, %p9527_p9  ;;  %p9600_p12 = por %p9599_p11, %p9598_p10 }
  0x3e   : > { %p9594_p6 = pneg %p9593_p3 }
  0x40   : > { %p9601_p13 = pnand %p9600_p12, %p9594_p6 }
  0x42   : > { %9604 = shalt.err (!%p9601_p13)
}
  0x43   : > { %s11279_s0 = sld [smem:[#allocation17_spill]]  ;;  %s266_s13 = scalar_lea.hbm %s11267_s2, %s9122_s11 }
  0x44   : > { %s9124_s28 = smul.u32 24576, %s9747_s22  ;;  %s9618_s15 = scalar_lea.vmem %s9897_s18, 98304 }
  0x45   : > { %p9619_p9 = scmp.ne.s32.totalorder %s9897_s18, %s9618_s15  ;;  %s9756_s29 = smov [#allocation7]  }
  0x46   : > { %s9623_s17 = sshll.u32 %s9756_s29, 4  ;;  %s9624_s17 = int_to_ptr.vmem [resolvable:$false] %s9623_s17 }
  0x47   : > { %p9621_p2 = pnand %p9619_p9, %p9553_p0  ;;  %s9625_s27 = scalar_lea.vmem %s9624_s17, 196608 }
  0x48   : > { %p9626_p6 = scmp.lt.s32.totalorder %s9897_s18, %s9624_s17  ;;  %p9627_p10 = scmp.lt.s32.totalorder %s9625_s27, %s9618_s15 }
  0x49   : > { %9148 = dma.hbm_to_vmem [thread:$0]  (!%p9843_p7), %s11279_s0, 768, %s212_s16, [#allocation3]  }
  0x4a   : > { %p9622_p3 = pneg %p9621_p2  ;;  %p9628_p11 = por %p9627_p10, %p9626_p6 }
  0x4c   : > { %p9629_p12 = pnand %p9628_p11, %p9622_p3 }
  0x4e   : > { %9632 = shalt.err (!%p9629_p12)
}
  0x4f   : > { %s9757_s16 = smov 512   ;;  %s9758_s11 = smov 32  }
  0x50   : > { %9158 = dma.hbm_to_vmem [thread:$0]  (!%p9879_p8), %s266_s13, 98304, %s9897_s18, %s9887_s6, %s9757_s16, %s9757_s16, %s9758_s11  }
  0x51   : > { %s289_s10 = scalar_lea.hbm %s11268_s3, %s9124_s28  ;;  %s11280_s15 = sand.u32 1, %s9751_s23  }
  0x52   : > { %s278_s29 = scalar_lea.sflag [#allocation9], %s11280_s15  ;;  %s9646_s17 = scalar_lea.vmem %s9899_s12, 24576 }
  0x53   : > { %p9647_p7 = scmp.ne.s32.totalorder %s9899_s12, %s9646_s17  ;;  %s9759_s27 = smov [#allocation8]  }
  0x54   : > { %s9651_s0 = sshll.u32 %s9759_s27, 4  ;;  %s9652_s0 = int_to_ptr.vmem [resolvable:$false] %s9651_s0 }
  0x55   : > { %p9649_p13 = pnand %p9647_p7, %p9553_p0  ;;  %s9653_s1 = scalar_lea.vmem %s9652_s0, 49152 }
  0x56   : > { %p9654_p2 = scmp.lt.s32.totalorder %s9899_s12, %s9652_s0  ;;  %p9655_p3 = scmp.lt.s32.totalorder %s9653_s1, %s9646_s17 }
  0x57   : > { %p9650_p9 = pneg %p9649_p13 }
  0x58   : > { %p9656_p6 = por %p9655_p3, %p9654_p2 }
  0x5a   : > { %p9657_p10 = pnand %p9656_p6, %p9650_p9 }
  0x5c   : > { %9660 = shalt.err (!%p9657_p10)
}
  0x5d   : > { %s9760_s6 = smov 192   ;;  %s9761_s18 = smov 12  }
  0x5e   : > { %9161 = dma.hbm_to_vmem [thread:$0]  (!%p9879_p8), %s289_s10, 24576, %s9899_s12, %s278_s29, %s9760_s6, %s9760_s6, %s9761_s18  }
  0x5f   : > { %302 = sbr.rel (%p9835_p5) target bundleno = 1439 (0x59f), region = 40 }
  0x64   : > { %9710 = dma.done.wait (%p81_p1), [#allocation3], 768  }
  0x65   : > { %9712 = vsyncadd (%p81_p1), [#allocation3], 4294966528  ;;  %s308_s0 = sand.u32 1, %s9823_s24   ;;  %s310_s1 = sand.u32 1, %s9735_s19  }
  0x66   : > { %s8051_s13 = sshll.u32 %s310_s1, 6  ;;  %s309_s28 = scalar_lea.sflag [#allocation6], %s308_s0 }
  0x67   : > { %s9946_s16 = scalar_lea.vmem [#allocation5], %s8051_s13 }
  0x68   : > { %9714 = dma.done.wait (%p9831_p4), %s309_s28, 99328  }
  0x69   : > { %9716 = vsyncadd (%p9831_p4), %s309_s28, 4294867968  ;;  %s9125_s26 = smul.u32 6144, %s310_s1  ;;  %s327_s11 = scalar_lea.sflag [#allocation9], %s308_s0 }
  0x6a   : > { %s9126_s12 = smul.u32 1536, %s310_s1 }
  0x6b   : > { %s9952_s8 = scalar_lea.vmem [#allocation7], %s9125_s26 }
  0x6c   : > { %s9954_s7 = scalar_lea.vmem [#allocation8], %s9126_s12 }
  0x6d   : > { %9718 = dma.done.wait (%p9831_p4), %s327_s11, 24576  }
  0x6e   : > { %9720 = vsyncadd (%p9831_p4), %s327_s11, 4294942720 }
  0x6f   : > { %9722 = dma.done.wait (%p81_p1), [#allocation9], 48  }
  0x70   : > { %9724 = vsyncadd (%p81_p1), [#allocation9], 4294967248  ;;  %v436_v0 = vld [vmem:[%s9952_s8 + $0x1c0] sm:$0xff]  ;;  %v9992_v53 = vld [vmem:[#allocation2] sm:$0xff]  ;;  %p9025_p1 = scmp.ne.s32.totalorder %s9743_s21, 0 }
  0x71   : > { %v440_v1 = vld [vmem:[%s9952_s8 + $0x1e0] sm:$0xff]  ;;  %v9994_v54 = vld [vmem:[#allocation2 + $0x8] sm:$0xff]  ;;  %v10000_v58 = vcombine.high %v9992_v53, %v9992_v53 }
  0x72   : > { %v564_v2 = vld [vmem:[%s9952_s8 + $0x5c0] sm:$0xff]  ;;  %v8122_v3 = vcombine.high %v436_v0, %v440_v1  ;;  %v8121_v5 = vcombine.low %v436_v0, %v440_v1  ;;  %v10004_v59 = vcombine.high %v9994_v54, %v9994_v54 }
  0x73   : > { %v568_v4 = vld [vmem:[%s9952_s8 + $0x5e0] sm:$0xff]  ;;  %5070 = vmatprep.mubr.bf16.mxu0 %v10000_v58 }
  0x74   : > { %v428_v6 = vld [vmem:[%s9952_s8 + $0x180] sm:$0xff]  ;;  %v8250_v8 = vcombine.high %v564_v2, %v568_v4  ;;  %v8249_v9 = vcombine.low %v564_v2, %v568_v4  ;;  %5038 = vmatprep.subr.bf16.mxu0 %v8122_v3  ;;  %5111 = vmatprep.mubr.bf16.mxu1 %v10004_v59 }
  0x75   : > { %v432_v7 = vld [vmem:[%s9952_s8 + $0x1a0] sm:$0xff]  ;;  %5039 = vmatpush1.bf16.msra.mxu0 %v8121_v5 }
  0x76   : > { %v8114_v10 = vcombine.high %v428_v6, %v432_v7  ;;  %v556_v11 = vld [vmem:[%s9952_s8 + $0x580] sm:$0xff]  ;;  %5079 = vmatprep.subr.bf16.mxu1 %v8250_v8  ;;  %v8113_v18 = vcombine.low %v428_v6, %v432_v7 }
  0x77   : > { %v560_v12 = vld [vmem:[%s9952_s8 + $0x5a0] sm:$0xff]  ;;  %5080 = vmatpush1.bf16.msra.mxu1 %v8249_v9 }
  0x78   : > { %v420_v13 = vld [vmem:[%s9952_s8 + $0x140] sm:$0xff]  ;;  %v8242_v14 = vcombine.high %v556_v11, %v560_v12  ;;  %5040 = vmatprep.subr.bf16.mxu0 %v8114_v10  ;;  %v8241_v19 = vcombine.low %v556_v11, %v560_v12 }
  0x79   : > { %v424_v15 = vld [vmem:[%s9952_s8 + $0x160] sm:$0xff]  ;;  %5041 = vmatpush1.bf16.msra.mxu0 %v8113_v18 }
  0x7a   : > { %v548_v16 = vld [vmem:[%s9952_s8 + $0x540] sm:$0xff]  ;;  %v8106_v20 = vcombine.high %v420_v13, %v424_v15  ;;  %5081 = vmatprep.subr.bf16.mxu1 %v8242_v14  ;;  %v8105_v26 = vcombine.low %v420_v13, %v424_v15 }
  0x7b   : > { %v552_v17 = vld [vmem:[%s9952_s8 + $0x560] sm:$0xff]  ;;  %5082 = vmatpush1.bf16.msra.mxu1 %v8241_v19 }
  0x7c   : > { %v8234_v21 = vcombine.high %v548_v16, %v552_v17  ;;  %v412_v22 = vld [vmem:[%s9952_s8 + $0x100] sm:$0xff]  ;;  %5042 = vmatprep.subr.bf16.mxu0 %v8106_v20  ;;  %v8233_v27 = vcombine.low %v548_v16, %v552_v17 }
  0x7d   : > { %v416_v23 = vld [vmem:[%s9952_s8 + $0x120] sm:$0xff]  ;;  %5043 = vmatpush1.bf16.msra.mxu0 %v8105_v26 }
  0x7e   : > { %v540_v24 = vld [vmem:[%s9952_s8 + $0x500] sm:$0xff]  ;;  %v8098_v28 = vcombine.high %v412_v22, %v416_v23  ;;  %5083 = vmatprep.subr.bf16.mxu1 %v8234_v21  ;;  %v8097_v34 = vcombine.low %v412_v22, %v416_v23 }
  0x7f   : > { %v544_v25 = vld [vmem:[%s9952_s8 + $0x520] sm:$0xff]  ;;  %5084 = vmatpush1.bf16.msra.mxu1 %v8233_v27 }
  0x80   : > { %v8226_v29 = vcombine.high %v540_v24, %v544_v25  ;;  %v404_v30 = vld [vmem:[%s9952_s8 + $0xc0] sm:$0xff]  ;;  %5044 = vmatprep.subr.bf16.mxu0 %v8098_v28  ;;  %v8225_v35 = vcombine.low %v540_v24, %v544_v25 }
  0x81   : > { %v408_v31 = vld [vmem:[%s9952_s8 + $0xe0] sm:$0xff]  ;;  %5045 = vmatpush1.bf16.msra.mxu0 %v8097_v34 }
  0x82   : > { %v532_v32 = vld [vmem:[%s9952_s8 + $0x4c0] sm:$0xff]  ;;  %v8090_v36 = vcombine.high %v404_v30, %v408_v31  ;;  %5085 = vmatprep.subr.bf16.mxu1 %v8226_v29  ;;  %v8089_v42 = vcombine.low %v404_v30, %v408_v31 }
  0x83   : > { %v536_v33 = vld [vmem:[%s9952_s8 + $0x4e0] sm:$0xff]  ;;  %5086 = vmatpush1.bf16.msra.mxu1 %v8225_v35 }
  0x84   : > { %v8218_v37 = vcombine.high %v532_v32, %v536_v33  ;;  %v396_v38 = vld [vmem:[%s9952_s8 + $0x80] sm:$0xff]  ;;  %5046 = vmatprep.subr.bf16.mxu0 %v8090_v36  ;;  %v8217_v43 = vcombine.low %v532_v32, %v536_v33 }
  0x85   : > { %v400_v39 = vld [vmem:[%s9952_s8 + $0xa0] sm:$0xff]  ;;  %5047 = vmatpush1.bf16.msra.mxu0 %v8089_v42 }
  0x86   : > { %v524_v40 = vld [vmem:[%s9952_s8 + $0x480] sm:$0xff]  ;;  %v8082_v44 = vcombine.high %v396_v38, %v400_v39  ;;  %5087 = vmatprep.subr.bf16.mxu1 %v8218_v37  ;;  %v8081_v50 = vcombine.low %v396_v38, %v400_v39 }
  0x87   : > { %v528_v41 = vld [vmem:[%s9952_s8 + $0x4a0] sm:$0xff]  ;;  %5088 = vmatpush1.bf16.msra.mxu1 %v8217_v43 }
  0x88   : > { %v8210_v45 = vcombine.high %v524_v40, %v528_v41  ;;  %v388_v46 = vld [vmem:[%s9952_s8 + $0x40] sm:$0xff]  ;;  %5048 = vmatprep.subr.bf16.mxu0 %v8082_v44  ;;  %v8209_v51 = vcombine.low %v524_v40, %v528_v41 }
  0x89   : > { %v392_v47 = vld [vmem:[%s9952_s8 + $0x60] sm:$0xff]  ;;  %5049 = vmatpush1.bf16.msra.mxu0 %v8081_v50 }
  0x8a   : > { %v516_v48 = vld [vmem:[%s9952_s8 + $0x440] sm:$0xff]  ;;  %v8074_v52 = vcombine.high %v388_v46, %v392_v47  ;;  %5089 = vmatprep.subr.bf16.mxu1 %v8210_v45  ;;  %v8073_v62 = vcombine.low %v388_v46, %v392_v47 }
  0x8b   : > { %v520_v49 = vld [vmem:[%s9952_s8 + $0x460] sm:$0xff]  ;;  %5090 = vmatpush1.bf16.msra.mxu1 %v8209_v51 }
  0x8c   : > { %v8202_v55 = vcombine.high %v516_v48, %v520_v49  ;;  %v380_v56 = vld [vmem:[%s9952_s8] sm:$0xff]  ;;  %5050 = vmatprep.subr.bf16.mxu0 %v8074_v52  ;;  %v8201_v63 = vcombine.low %v516_v48, %v520_v49 }
  0x8d   : > { %v384_v57 = vld [vmem:[%s9952_s8 + $0x20] sm:$0xff]  ;;  %5051 = vmatpush1.bf16.msra.mxu0 %v8073_v62 }
  0x8e   : > { %v508_v60 = vld [vmem:[%s9952_s8 + $0x400] sm:$0xff]  ;;  %v8066_v0 = vcombine.high %v380_v56, %v384_v57  ;;  %5091 = vmatprep.subr.bf16.mxu1 %v8202_v55  ;;  %v8065_v6 = vcombine.low %v380_v56, %v384_v57 }
  0x8f   : > { %v512_v61 = vld [vmem:[%s9952_s8 + $0x420] sm:$0xff]  ;;  %5092 = vmatpush1.bf16.msra.mxu1 %v8201_v63 }
  0x90   : > { %v8194_v1 = vcombine.high %v508_v60, %v512_v61  ;;  %v500_v2 = vld [vmem:[%s9952_s8 + $0x3c0] sm:$0xff]  ;;  %5052 = vmatprep.subr.bf16.mxu0 %v8066_v0  ;;  %v8193_v7 = vcombine.low %v508_v60, %v512_v61 }
  0x91   : > { %v504_v3 = vld [vmem:[%s9952_s8 + $0x3e0] sm:$0xff]  ;;  %5053 = vmatpush1.bf16.msra.mxu0 %v8065_v6 }
  0x92   : > { %v628_v4 = vld [vmem:[%s9952_s8 + $0x7c0] sm:$0xff]  ;;  %v8186_v8 = vcombine.high %v500_v2, %v504_v3  ;;  %5093 = vmatprep.subr.bf16.mxu1 %v8194_v1  ;;  %v8185_v14 = vcombine.low %v500_v2, %v504_v3 }
  0x93   : > { %v632_v5 = vld [vmem:[%s9952_s8 + $0x7e0] sm:$0xff]  ;;  %5094 = vmatpush1.bf16.msra.mxu1 %v8193_v7 }
  0x94   : > { %v8314_v9 = vcombine.high %v628_v4, %v632_v5  ;;  %v492_v10 = vld [vmem:[%s9952_s8 + $0x380] sm:$0xff]  ;;  %5054 = vmatprep.subr.bf16.mxu0 %v8186_v8  ;;  %v8313_v15 = vcombine.low %v628_v4, %v632_v5 }
  0x95   : > { %v496_v11 = vld [vmem:[%s9952_s8 + $0x3a0] sm:$0xff]  ;;  %5055 = vmatpush2.bf16.msra.mxu0 %v8185_v14 }
  0x96   : > { %v620_v12 = vld [vmem:[%s9952_s8 + $0x780] sm:$0xff]  ;;  %v8178_v16 = vcombine.high %v492_v10, %v496_v11  ;;  %5095 = vmatprep.subr.bf16.mxu1 %v8314_v9  ;;  %v8177_v22 = vcombine.low %v492_v10, %v496_v11 }
  0x97   : > { %v624_v13 = vld [vmem:[%s9952_s8 + $0x7a0] sm:$0xff]  ;;  %5096 = vmatpush2.bf16.msra.mxu1 %v8313_v15 }
  0x98   : > { %v8306_v17 = vcombine.high %v620_v12, %v624_v13  ;;  %v484_v18 = vld [vmem:[%s9952_s8 + $0x340] sm:$0xff]  ;;  %5056 = vmatprep.subr.bf16.mxu0 %v8178_v16  ;;  %v8305_v23 = vcombine.low %v620_v12, %v624_v13  ;;  %v10050_v16 = vcombine.low %v9992_v53, %v9992_v53 }
  0x99   : > { %v488_v19 = vld [vmem:[%s9952_s8 + $0x360] sm:$0xff]  ;;  %5057 = vmatpush2.bf16.msra.mxu0 %v8177_v22  ;;  %v10060_v22 = vld [vmem:[#allocation2 + $0x18] sm:$0xff] }
  0x9a   : > { %v612_v20 = vld [vmem:[%s9952_s8 + $0x740] sm:$0xff]  ;;  %v8170_v24 = vcombine.high %v484_v18, %v488_v19  ;;  %5097 = vmatprep.subr.bf16.mxu1 %v8306_v17  ;;  %v8169_v30 = vcombine.low %v484_v18, %v488_v19 }
  0x9b   : > { %v616_v21 = vld [vmem:[%s9952_s8 + $0x760] sm:$0xff]  ;;  %5098 = vmatpush2.bf16.msra.mxu1 %v8305_v23 }
  0x9c   : > { %v8298_v25 = vcombine.high %v612_v20, %v616_v21  ;;  %v476_v26 = vld [vmem:[%s9952_s8 + $0x300] sm:$0xff]  ;;  %5058 = vmatprep.subr.bf16.mxu0 %v8170_v24  ;;  %v8297_v31 = vcombine.low %v612_v20, %v616_v21  ;;  %v10058_v20 = vcombine.low %v9994_v54, %v9994_v54 }
  0x9d   : > { %v480_v27 = vld [vmem:[%s9952_s8 + $0x320] sm:$0xff]  ;;  %5059 = vmatpush2.bf16.msra.mxu0 %v8169_v30 }
  0x9e   : > { %v604_v28 = vld [vmem:[%s9952_s8 + $0x700] sm:$0xff]  ;;  %v8162_v32 = vcombine.high %v476_v26, %v480_v27  ;;  %5099 = vmatprep.subr.bf16.mxu1 %v8298_v25  ;;  %v8161_v38 = vcombine.low %v476_v26, %v480_v27 }
  0x9f   : > { %v608_v29 = vld [vmem:[%s9952_s8 + $0x720] sm:$0xff]  ;;  %5100 = vmatpush2.bf16.msra.mxu1 %v8297_v31 }
  0xa0   : > { %v8290_v33 = vcombine.high %v604_v28, %v608_v29  ;;  %v468_v34 = vld [vmem:[%s9952_s8 + $0x2c0] sm:$0xff]  ;;  %5060 = vmatprep.subr.bf16.mxu0 %v8162_v32  ;;  %v8289_v39 = vcombine.low %v604_v28, %v608_v29  ;;  %v10073_v29 = vcombine.high %v10060_v22, %v10060_v22 }
  0xa1   : > { %v472_v35 = vld [vmem:[%s9952_s8 + $0x2e0] sm:$0xff]  ;;  %5061 = vmatpush2.bf16.msra.mxu0 %v8161_v38 }
  0xa2   : > { %v596_v36 = vld [vmem:[%s9952_s8 + $0x6c0] sm:$0xff]  ;;  %v8154_v40 = vcombine.high %v468_v34, %v472_v35  ;;  %5101 = vmatprep.subr.bf16.mxu1 %v8290_v33  ;;  %v8153_v46 = vcombine.low %v468_v34, %v472_v35 }
  0xa3   : > { %v600_v37 = vld [vmem:[%s9952_s8 + $0x6e0] sm:$0xff]  ;;  %5102 = vmatpush2.bf16.msra.mxu1 %v8289_v39 }
  0xa4   : > { %v8282_v41 = vcombine.high %v596_v36, %v600_v37  ;;  %v460_v42 = vld [vmem:[%s9952_s8 + $0x280] sm:$0xff]  ;;  %5062 = vmatprep.subr.bf16.mxu0 %v8154_v40  ;;  %v8281_v47 = vcombine.low %v596_v36, %v600_v37 }
  0xa5   : > { %v464_v43 = vld [vmem:[%s9952_s8 + $0x2a0] sm:$0xff]  ;;  %5063 = vmatpush2.bf16.msra.mxu0 %v8153_v46 }
  0xa6   : > { %v588_v44 = vld [vmem:[%s9952_s8 + $0x680] sm:$0xff]  ;;  %v8146_v48 = vcombine.high %v460_v42, %v464_v43  ;;  %5103 = vmatprep.subr.bf16.mxu1 %v8282_v41  ;;  %v8145_v56 = vcombine.low %v460_v42, %v464_v43 }
  0xa7   : > { %v592_v45 = vld [vmem:[%s9952_s8 + $0x6a0] sm:$0xff]  ;;  %5104 = vmatpush2.bf16.msra.mxu1 %v8281_v47 }
  0xa8   : > { %v8274_v49 = vcombine.high %v588_v44, %v592_v45  ;;  %v452_v50 = vld [vmem:[%s9952_s8 + $0x240] sm:$0xff]  ;;  %5064 = vmatprep.subr.bf16.mxu0 %v8146_v48  ;;  %v8273_v57 = vcombine.low %v588_v44, %v592_v45 }
  0xa9   : > { %v456_v51 = vld [vmem:[%s9952_s8 + $0x260] sm:$0xff]  ;;  %5065 = vmatpush2.bf16.msra.mxu0 %v8145_v56 }
  0xaa   : > { %v580_v52 = vld [vmem:[%s9952_s8 + $0x640] sm:$0xff]  ;;  %v8138_v60 = vcombine.high %v452_v50, %v456_v51  ;;  %5105 = vmatprep.subr.bf16.mxu1 %v8274_v49  ;;  %v8137_v2 = vcombine.low %v452_v50, %v456_v51 }
  0xab   : > { %v584_v55 = vld [vmem:[%s9952_s8 + $0x660] sm:$0xff]  ;;  %5106 = vmatpush2.bf16.msra.mxu1 %v8273_v57 }
  0xac   : > { %v8266_v61 = vcombine.high %v580_v52, %v584_v55  ;;  %v444_v62 = vld [vmem:[%s9952_s8 + $0x200] sm:$0xff]  ;;  %5066 = vmatprep.subr.bf16.mxu0 %v8138_v60  ;;  %v8265_v3 = vcombine.low %v580_v52, %v584_v55 }
  0xad   : > { %v448_v63 = vld [vmem:[%s9952_s8 + $0x220] sm:$0xff]  ;;  %5067 = vmatpush2.bf16.msra.mxu0 %v8137_v2 }
  0xae   : > { %v572_v0 = vld [vmem:[%s9952_s8 + $0x600] sm:$0xff]  ;;  %v8130_v4 = vcombine.high %v444_v62, %v448_v63  ;;  %5107 = vmatprep.subr.bf16.mxu1 %v8266_v61  ;;  %v8129_v10 = vcombine.low %v444_v62, %v448_v63 }
  0xaf   : > { %v576_v1 = vld [vmem:[%s9952_s8 + $0x620] sm:$0xff]  ;;  %5108 = vmatpush2.bf16.msra.mxu1 %v8265_v3 }
  0xb0   : > { %v8258_v5 = vcombine.high %v572_v0, %v576_v1  ;;  %v692_v6 = vld [vmem:[%s9952_s8 + $0x9c0] sm:$0xff]  ;;  %5068 = vmatprep.subr.bf16.mxu0 %v8130_v4  ;;  %v8257_v11 = vcombine.low %v572_v0, %v576_v1 }
  0xb1   : > { %v696_v7 = vld [vmem:[%s9952_s8 + $0x9e0] sm:$0xff]  ;;  %5069 = vmatpush2.bf16.msra.mxu0 %v8129_v10 }
  0xb2   : > { %v820_v8 = vld [vmem:[%s9952_s8 + $0xdc0] sm:$0xff]  ;;  %v8378_v12 = vcombine.high %v692_v6, %v696_v7  ;;  %5109 = vmatprep.subr.bf16.mxu1 %v8258_v5  ;;  %v8377_v21 = vcombine.low %v692_v6, %v696_v7 }
  0xb3   : > { %v824_v9 = vld [vmem:[%s9952_s8 + $0xde0] sm:$0xff]  ;;  %5110 = vmatpush2.bf16.msra.mxu1 %v8257_v11 }
  0xb4   : > { %v8506_v13 = vcombine.high %v820_v8, %v824_v9  ;;  %v684_v14 = vld [vmem:[%s9952_s8 + $0x980] sm:$0xff]  ;;  %5120 = vmatprep.subr.bf16.mxu0 %v8378_v12  ;;  %v8505_v23 = vcombine.low %v820_v8, %v824_v9  ;;  %5071 = vmatmul.mubr.bf16.vlgmr.msra.gmra.mxu0 %v10050_v16 }
  0xb5   : > { %v688_v15 = vld [vmem:[%s9952_s8 + $0x9a0] sm:$0xff]  ;;  %5121 = vmatpush1.bf16.msra.mxu0 %v8377_v21 }
  0xb6   : > { %v812_v17 = vld [vmem:[%s9952_s8 + $0xd80] sm:$0xff]  ;;  %v8370_v24 = vcombine.high %v684_v14, %v688_v15  ;;  %5161 = vmatprep.subr.bf16.mxu1 %v8506_v13  ;;  %5112 = vmatmul.mubr.bf16.vlgmr.msra.gmra.mxu1 %v10058_v20  ;;  %v8369_v30 = vcombine.low %v684_v14, %v688_v15 }
  0xb7   : > { %v816_v18 = vld [vmem:[%s9952_s8 + $0xda0] sm:$0xff]  ;;  %5162 = vmatpush1.bf16.msra.mxu1 %v8505_v23  ;;  %5193 = vmatprep.mubr.bf16.mxu1 %v10073_v29 }
  0xb8   : > { %v10054_v19 = vld [vmem:[#allocation2 + $0x10] sm:$0xff]  ;;  %v8498_v53 = vcombine.high %v812_v17, %v816_v18  ;;  %5122 = vmatprep.subr.bf16.mxu0 %v8370_v24  ;;  %v8497_v31 = vcombine.low %v812_v17, %v816_v18 }
  0xb9   : > { %v676_v25 = vld [vmem:[%s9952_s8 + $0x940] sm:$0xff]  ;;  %v10067_v28 = vcombine.high %v10054_v19, %v10054_v19  ;;  %5123 = vmatpush1.bf16.msra.mxu0 %v8369_v30 }
  0xba   : > { %v680_v26 = vld [vmem:[%s9952_s8 + $0x960] sm:$0xff]  ;;  %5163 = vmatprep.subr.bf16.mxu1 %v8498_v53 }
  0xbb   : > { %v804_v27 = vld [vmem:[%s9952_s8 + $0xd40] sm:$0xff]  ;;  %v8362_v32 = vcombine.high %v676_v25, %v680_v26  ;;  %5152 = vmatprep.mubr.bf16.mxu0 %v10067_v28  ;;  %v8361_v38 = vcombine.low %v676_v25, %v680_v26  ;;  %5164 = vmatpush1.bf16.msra.mxu1 %v8497_v31 }
  0xbc   : > { %v808_v54 = vld [vmem:[%s9952_s8 + $0xd60] sm:$0xff] }
  0xbd   : > { %v668_v33 = vld [vmem:[%s9952_s8 + $0x900] sm:$0xff]  ;;  %v8490_v36 = vcombine.high %v804_v27, %v808_v54  ;;  %5124 = vmatprep.subr.bf16.mxu0 %v8362_v32  ;;  %v8489_v39 = vcombine.low %v804_v27, %v808_v54 }
  0xbe   : > { %v672_v34 = vld [vmem:[%s9952_s8 + $0x920] sm:$0xff]  ;;  %5125 = vmatpush1.bf16.msra.mxu0 %v8361_v38 }
  0xbf   : > { %v796_v35 = vld [vmem:[%s9952_s8 + $0xd00] sm:$0xff]  ;;  %v8354_v40 = vcombine.high %v668_v33, %v672_v34  ;;  %5165 = vmatprep.subr.bf16.mxu1 %v8490_v36  ;;  %v8353_v46 = vcombine.low %v668_v33, %v672_v34 }
  0xc0   : > { %v800_v37 = vld [vmem:[%s9952_s8 + $0xd20] sm:$0xff]  ;;  %5166 = vmatpush1.bf16.msra.mxu1 %v8489_v39 }
  0xc1   : > { %v660_v41 = vld [vmem:[%s9952_s8 + $0x8c0] sm:$0xff]  ;;  %v8482_v44 = vcombine.high %v796_v35, %v800_v37  ;;  %5126 = vmatprep.subr.bf16.mxu0 %v8354_v40  ;;  %v8481_v47 = vcombine.low %v796_v35, %v800_v37 }
  0xc2   : > { %v664_v42 = vld [vmem:[%s9952_s8 + $0x8e0] sm:$0xff]  ;;  %5127 = vmatpush1.bf16.msra.mxu0 %v8353_v46 }
  0xc3   : > { %v788_v43 = vld [vmem:[%s9952_s8 + $0xcc0] sm:$0xff]  ;;  %v8346_v48 = vcombine.high %v660_v41, %v664_v42  ;;  %5167 = vmatprep.subr.bf16.mxu1 %v8482_v44  ;;  %v8345_v56 = vcombine.low %v660_v41, %v664_v42 }
  0xc4   : > { %v792_v45 = vld [vmem:[%s9952_s8 + $0xce0] sm:$0xff]  ;;  %5168 = vmatpush1.bf16.msra.mxu1 %v8481_v47 }
  0xc5   : > { %v652_v49 = vld [vmem:[%s9952_s8 + $0x880] sm:$0xff]  ;;  %v8474_v52 = vcombine.high %v788_v43, %v792_v45  ;;  %5128 = vmatprep.subr.bf16.mxu0 %v8346_v48  ;;  %v8473_v57 = vcombine.low %v788_v43, %v792_v45 }
  0xc6   : > { %v656_v50 = vld [vmem:[%s9952_s8 + $0x8a0] sm:$0xff]  ;;  %5129 = vmatpush1.bf16.msra.mxu0 %v8345_v56 }
  0xc7   : > { %v780_v51 = vld [vmem:[%s9952_s8 + $0xc80] sm:$0xff]  ;;  %v8338_v60 = vcombine.high %v652_v49, %v656_v50  ;;  %5169 = vmatprep.subr.bf16.mxu1 %v8474_v52  ;;  %v8337_v2 = vcombine.low %v652_v49, %v656_v50 }
  0xc8   : > { %v784_v55 = vld [vmem:[%s9952_s8 + $0xca0] sm:$0xff]  ;;  %5170 = vmatpush1.bf16.msra.mxu1 %v8473_v57 }
  0xc9   : > { %v644_v61 = vld [vmem:[%s9952_s8 + $0x840] sm:$0xff]  ;;  %v8466_v0 = vcombine.high %v780_v51, %v784_v55  ;;  %5130 = vmatprep.subr.bf16.mxu0 %v8338_v60  ;;  %v8465_v3 = vcombine.low %v780_v51, %v784_v55 }
  0xca   : > { %v648_v62 = vld [vmem:[%s9952_s8 + $0x860] sm:$0xff]  ;;  %5131 = vmatpush1.bf16.msra.mxu0 %v8337_v2 }
  0xcb   : > { %v772_v63 = vld [vmem:[%s9952_s8 + $0xc40] sm:$0xff]  ;;  %v8330_v4 = vcombine.high %v644_v61, %v648_v62  ;;  %5171 = vmatprep.subr.bf16.mxu1 %v8466_v0  ;;  %v8329_v10 = vcombine.low %v644_v61, %v648_v62 }
  0xcc   : > { %v776_v1 = vld [vmem:[%s9952_s8 + $0xc60] sm:$0xff]  ;;  %5172 = vmatpush1.bf16.msra.mxu1 %v8465_v3 }
  0xcd   : > { %v636_v5 = vld [vmem:[%s9952_s8 + $0x800] sm:$0xff]  ;;  %v8458_v8 = vcombine.high %v772_v63, %v776_v1  ;;  %5132 = vmatprep.subr.bf16.mxu0 %v8330_v4  ;;  %v8457_v11 = vcombine.low %v772_v63, %v776_v1 }
  0xce   : > { %v640_v6 = vld [vmem:[%s9952_s8 + $0x820] sm:$0xff]  ;;  %5133 = vmatpush1.bf16.msra.mxu0 %v8329_v10 }
  0xcf   : > { %v764_v7 = vld [vmem:[%s9952_s8 + $0xc00] sm:$0xff]  ;;  %v8322_v12 = vcombine.high %v636_v5, %v640_v6  ;;  %5173 = vmatprep.subr.bf16.mxu1 %v8458_v8  ;;  %v8321_v21 = vcombine.low %v636_v5, %v640_v6 }
  0xd0   : > { %v768_v9 = vld [vmem:[%s9952_s8 + $0xc20] sm:$0xff]  ;;  %5174 = vmatpush1.bf16.msra.mxu1 %v8457_v11 }
  0xd1   : > { %v756_v13 = vld [vmem:[%s9952_s8 + $0xbc0] sm:$0xff]  ;;  %v8450_v17 = vcombine.high %v764_v7, %v768_v9  ;;  %5134 = vmatprep.subr.bf16.mxu0 %v8322_v12  ;;  %v8449_v23 = vcombine.low %v764_v7, %v768_v9 }
  0xd2   : > { %v760_v14 = vld [vmem:[%s9952_s8 + $0xbe0] sm:$0xff]  ;;  %5135 = vmatpush1.bf16.msra.mxu0 %v8321_v21 }
  0xd3   : > { %v884_v15 = vld [vmem:[%s9952_s8 + $0xfc0] sm:$0xff]  ;;  %v8442_v24 = vcombine.high %v756_v13, %v760_v14  ;;  %5175 = vmatprep.subr.bf16.mxu1 %v8450_v17  ;;  %v8441_v30 = vcombine.low %v756_v13, %v760_v14 }
  0xd4   : > { %v888_v18 = vld [vmem:[%s9952_s8 + $0xfe0] sm:$0xff]  ;;  %5176 = vmatpush1.bf16.msra.mxu1 %v8449_v23 }
  0xd5   : > { %v748_v53 = vld [vmem:[%s9952_s8 + $0xb80] sm:$0xff]  ;;  %v8570_v27 = vcombine.high %v884_v15, %v888_v18  ;;  %5136 = vmatprep.subr.bf16.mxu0 %v8442_v24  ;;  %v8569_v31 = vcombine.low %v884_v15, %v888_v18 }
  0xd6   : > { %v752_v25 = vld [vmem:[%s9952_s8 + $0xba0] sm:$0xff]  ;;  %5137 = vmatpush2.bf16.msra.mxu0 %v8441_v30 }
  0xd7   : > { %v876_v26 = vld [vmem:[%s9952_s8 + $0xf80] sm:$0xff]  ;;  %v8434_v32 = vcombine.high %v748_v53, %v752_v25  ;;  %5177 = vmatprep.subr.bf16.mxu1 %v8570_v27  ;;  %v8433_v38 = vcombine.low %v748_v53, %v752_v25 }
  0xd8   : > { %v880_v54 = vld [vmem:[%s9952_s8 + $0xfa0] sm:$0xff]  ;;  %5178 = vmatpush2.bf16.msra.mxu1 %v8569_v31 }
  0xd9   : > { %v740_v33 = vld [vmem:[%s9952_s8 + $0xb40] sm:$0xff]  ;;  %v8562_v36 = vcombine.high %v876_v26, %v880_v54  ;;  %5138 = vmatprep.subr.bf16.mxu0 %v8434_v32  ;;  %v8561_v39 = vcombine.low %v876_v26, %v880_v54 }
  0xda   : > { %v744_v34 = vld [vmem:[%s9952_s8 + $0xb60] sm:$0xff]  ;;  %5139 = vmatpush2.bf16.msra.mxu0 %v8433_v38 }
  0xdb   : > { %v868_v35 = vld [vmem:[%s9952_s8 + $0xf40] sm:$0xff]  ;;  %v8426_v40 = vcombine.high %v740_v33, %v744_v34  ;;  %5179 = vmatprep.subr.bf16.mxu1 %v8562_v36  ;;  %v8425_v46 = vcombine.low %v740_v33, %v744_v34 }
  0xdc   : > { %v872_v37 = vld [vmem:[%s9952_s8 + $0xf60] sm:$0xff]  ;;  %5180 = vmatpush2.bf16.msra.mxu1 %v8561_v39  ;;  %v10140_v39 = vld [vmem:[#allocation2 + $0x28] sm:$0xff] }
  0xdd   : > { %v732_v41 = vld [vmem:[%s9952_s8 + $0xb00] sm:$0xff]  ;;  %v8554_v44 = vcombine.high %v868_v35, %v872_v37  ;;  %5140 = vmatprep.subr.bf16.mxu0 %v8426_v40  ;;  %v8553_v47 = vcombine.low %v868_v35, %v872_v37  ;;  %v10138_v37 = vld [vmem:[#allocation2 + $0x20] sm:$0xff]  ;;  %v10144_v40 = vcombine.low %v10054_v19, %v10054_v19 }
  0xde   : > { %v736_v42 = vld [vmem:[%s9952_s8 + $0xb20] sm:$0xff]  ;;  %5141 = vmatpush2.bf16.msra.mxu0 %v8425_v46 }
  0xdf   : > { %v860_v43 = vld [vmem:[%s9952_s8 + $0xf00] sm:$0xff]  ;;  %v8418_v48 = vcombine.high %v732_v41, %v736_v42  ;;  %5181 = vmatprep.subr.bf16.mxu1 %v8554_v44  ;;  %v8417_v56 = vcombine.low %v732_v41, %v736_v42  ;;  %v10148_v41 = vcombine.low %v10060_v22, %v10060_v22  ;;  %v10161_v22 = vcombine.high %v10140_v39, %v10140_v39 }
  0xe0   : > { %v864_v45 = vld [vmem:[%s9952_s8 + $0xf20] sm:$0xff]  ;;  %5182 = vmatpush2.bf16.msra.mxu1 %v8553_v47 }
  0xe1   : > { %v724_v49 = vld [vmem:[%s9952_s8 + $0xac0] sm:$0xff]  ;;  %v8546_v52 = vcombine.high %v860_v43, %v864_v45  ;;  %5142 = vmatprep.subr.bf16.mxu0 %v8418_v48  ;;  %v8545_v57 = vcombine.low %v860_v43, %v864_v45 }
  0xe2   : > { %v728_v50 = vld [vmem:[%s9952_s8 + $0xae0] sm:$0xff]  ;;  %5143 = vmatpush2.bf16.msra.mxu0 %v8417_v56 }
  0xe3   : > { %v852_v51 = vld [vmem:[%s9952_s8 + $0xec0] sm:$0xff]  ;;  %v8410_v60 = vcombine.high %v724_v49, %v728_v50  ;;  %5183 = vmatprep.subr.bf16.mxu1 %v8546_v52  ;;  %v8409_v2 = vcombine.low %v724_v49, %v728_v50  ;;  %v10156_v49 = vcombine.high %v10138_v37, %v10138_v37 }
  0xe4   : > { %v856_v55 = vld [vmem:[%s9952_s8 + $0xee0] sm:$0xff]  ;;  %5184 = vmatpush2.bf16.msra.mxu1 %v8545_v57 }
  0xe5   : > { %v716_v61 = vld [vmem:[%s9952_s8 + $0xa80] sm:$0xff]  ;;  %v8538_v0 = vcombine.high %v852_v51, %v856_v55  ;;  %5144 = vmatprep.subr.bf16.mxu0 %v8410_v60  ;;  %v8537_v3 = vcombine.low %v852_v51, %v856_v55 }
  0xe6   : > { %v720_v62 = vld [vmem:[%s9952_s8 + $0xaa0] sm:$0xff]  ;;  %5145 = vmatpush2.bf16.msra.mxu0 %v8409_v2 }
  0xe7   : > { %v844_v63 = vld [vmem:[%s9952_s8 + $0xe80] sm:$0xff]  ;;  %v8402_v4 = vcombine.high %v716_v61, %v720_v62  ;;  %5185 = vmatprep.subr.bf16.mxu1 %v8538_v0  ;;  %v8401_v10 = vcombine.low %v716_v61, %v720_v62 }
  0xe8   : > { %v848_v1 = vld [vmem:[%s9952_s8 + $0xea0] sm:$0xff]  ;;  %5186 = vmatpush2.bf16.msra.mxu1 %v8537_v3 }
  0xe9   : > { %v708_v5 = vld [vmem:[%s9952_s8 + $0xa40] sm:$0xff]  ;;  %v8530_v8 = vcombine.high %v844_v63, %v848_v1  ;;  %5146 = vmatprep.subr.bf16.mxu0 %v8402_v4  ;;  %v8529_v11 = vcombine.low %v844_v63, %v848_v1 }
  0xea   : > { %v712_v6 = vld [vmem:[%s9952_s8 + $0xa60] sm:$0xff]  ;;  %5147 = vmatpush2.bf16.msra.mxu0 %v8401_v10 }
  0xeb   : > { %v836_v7 = vld [vmem:[%s9952_s8 + $0xe40] sm:$0xff]  ;;  %v8394_v12 = vcombine.high %v708_v5, %v712_v6  ;;  %5187 = vmatprep.subr.bf16.mxu1 %v8530_v8  ;;  %v8393_v21 = vcombine.low %v708_v5, %v712_v6 }
  0xec   : > { %v840_v9 = vld [vmem:[%s9952_s8 + $0xe60] sm:$0xff]  ;;  %5188 = vmatpush2.bf16.msra.mxu1 %v8529_v11 }
  0xed   : > { %v700_v13 = vld [vmem:[%s9952_s8 + $0xa00] sm:$0xff]  ;;  %v8522_v17 = vcombine.high %v836_v7, %v840_v9  ;;  %5148 = vmatprep.subr.bf16.mxu0 %v8394_v12  ;;  %v8521_v23 = vcombine.low %v836_v7, %v840_v9 }
  0xee   : > { %v704_v14 = vld [vmem:[%s9952_s8 + $0xa20] sm:$0xff]  ;;  %5149 = vmatpush2.bf16.msra.mxu0 %v8393_v21 }
  0xef   : > { %v828_v15 = vld [vmem:[%s9952_s8 + $0xe00] sm:$0xff]  ;;  %v8386_v24 = vcombine.high %v700_v13, %v704_v14  ;;  %5189 = vmatprep.subr.bf16.mxu1 %v8522_v17  ;;  %v8385_v30 = vcombine.low %v700_v13, %v704_v14 }
  0xf0   : > { %v832_v18 = vld [vmem:[%s9952_s8 + $0xe20] sm:$0xff]  ;;  %5190 = vmatpush2.bf16.msra.mxu1 %v8521_v23 }
  0xf1   : > { %v948_v53 = vld [vmem:[%s9952_s8 + $0x11c0] sm:$0xff]  ;;  %v8514_v27 = vcombine.high %v828_v15, %v832_v18  ;;  %5150 = vmatprep.subr.bf16.mxu0 %v8386_v24  ;;  %v8513_v33 = vcombine.low %v828_v15, %v832_v18 }
  0xf2   : > { %v952_v25 = vld [vmem:[%s9952_s8 + $0x11e0] sm:$0xff]  ;;  %5151 = vmatpush2.bf16.msra.mxu0 %v8385_v30 }
  0xf3   : > { %v1076_v26 = vld [vmem:[%s9952_s8 + $0x15c0] sm:$0xff]  ;;  %v8634_v34 = vcombine.high %v948_v53, %v952_v25  ;;  %5191 = vmatprep.subr.bf16.mxu1 %v8514_v27  ;;  %v8633_v42 = vcombine.low %v948_v53, %v952_v25 }
  0xf4   : > { %v1080_v54 = vld [vmem:[%s9952_s8 + $0x15e0] sm:$0xff]  ;;  %5192 = vmatpush2.bf16.msra.mxu1 %v8513_v33 }
  0xf5   : > { %v940_v31 = vld [vmem:[%s9952_s8 + $0x1180] sm:$0xff]  ;;  %v8762_v38 = vcombine.high %v1076_v26, %v1080_v54  ;;  %5202 = vmatprep.subr.bf16.mxu0 %v8634_v34  ;;  %v8761_v43 = vcombine.low %v1076_v26, %v1080_v54  ;;  %5153 = vmatmul.mubr.bf16.vlgmr.msra.gmra.mxu0 %v10144_v40 }
  0xf6   : > { %v944_v32 = vld [vmem:[%s9952_s8 + $0x11a0] sm:$0xff]  ;;  %5203 = vmatpush1.bf16.msra.mxu0 %v8633_v42  ;;  %5234 = vmatprep.mubr.bf16.mxu0 %v10156_v49 }
  0xf7   : > { %v1068_v35 = vld [vmem:[%s9952_s8 + $0x1580] sm:$0xff]  ;;  %v8626_v44 = vcombine.high %v940_v31, %v944_v32  ;;  %5243 = vmatprep.subr.bf16.mxu1 %v8762_v38  ;;  %5194 = vmatmul.mubr.bf16.vlgmr.msra.gmra.mxu1 %v10148_v41  ;;  %v8625_v50 = vcombine.low %v940_v31, %v944_v32 }
  0xf8   : > { %v1072_v36 = vld [vmem:[%s9952_s8 + $0x15a0] sm:$0xff]  ;;  %5244 = vmatpush1.bf16.msra.mxu1 %v8761_v43  ;;  %5275 = vmatprep.mubr.bf16.mxu1 %v10161_v22 }
  0xf9   : > { %v932_v45 = vld [vmem:[%s9952_s8 + $0x1140] sm:$0xff]  ;;  %v8754_v47 = vcombine.high %v1068_v35, %v1072_v36  ;;  %5204 = vmatprep.subr.bf16.mxu0 %v8626_v44  ;;  %v8753_v51 = vcombine.low %v1068_v35, %v1072_v36 }
  0xfa   : > { %v936_v46 = vld [vmem:[%s9952_s8 + $0x1160] sm:$0xff]  ;;  %5205 = vmatpush1.bf16.msra.mxu0 %v8625_v50 }
  0xfb   : > { %v1060_v48 = vld [vmem:[%s9952_s8 + $0x1540] sm:$0xff]  ;;  %v8618_v52 = vcombine.high %v932_v45, %v936_v46  ;;  %5245 = vmatprep.subr.bf16.mxu1 %v8754_v47  ;;  %v8617_v62 = vcombine.low %v932_v45, %v936_v46 }
  0xfc   : > { %v1064_v19 = vld [vmem:[%s9952_s8 + $0x1560] sm:$0xff]  ;;  %5246 = vmatpush1.bf16.msra.mxu1 %v8753_v51 }
  0xfd   : > { %v924_v55 = vld [vmem:[%s9952_s8 + $0x1100] sm:$0xff]  ;;  %v8746_v57 = vcombine.high %v1060_v48, %v1064_v19  ;;  %5206 = vmatprep.subr.bf16.mxu0 %v8618_v52  ;;  %v8745_v63 = vcombine.low %v1060_v48, %v1064_v19 }
  0xfe   : > { %v928_v56 = vld [vmem:[%s9952_s8 + $0x1120] sm:$0xff]  ;;  %5207 = vmatpush1.bf16.msra.mxu0 %v8617_v62 }
  0xff   : > { %v1052_v60 = vld [vmem:[%s9952_s8 + $0x1500] sm:$0xff]  ;;  %v8610_v0 = vcombine.high %v924_v55, %v928_v56  ;;  %5247 = vmatprep.subr.bf16.mxu1 %v8746_v57  ;;  %v8609_v6 = vcombine.low %v924_v55, %v928_v56 }
 0x100   : > { %v1056_v61 = vld [vmem:[%s9952_s8 + $0x1520] sm:$0xff]  ;;  %5248 = vmatpush1.bf16.msra.mxu1 %v8745_v63 }
 0x101   : > { %v916_v1 = vld [vmem:[%s9952_s8 + $0x10c0] sm:$0xff]  ;;  %v8738_v4 = vcombine.high %v1052_v60, %v1056_v61  ;;  %5208 = vmatprep.subr.bf16.mxu0 %v8610_v0  ;;  %v8737_v7 = vcombine.low %v1052_v60, %v1056_v61 }
 0x102   : > { %v920_v2 = vld [vmem:[%s9952_s8 + $0x10e0] sm:$0xff]  ;;  %5209 = vmatpush1.bf16.msra.mxu0 %v8609_v6 }
 0x103   : > { %v1044_v3 = vld [vmem:[%s9952_s8 + $0x14c0] sm:$0xff]  ;;  %v8602_v8 = vcombine.high %v916_v1, %v920_v2  ;;  %5249 = vmatprep.subr.bf16.mxu1 %v8738_v4  ;;  %v8601_v14 = vcombine.low %v916_v1, %v920_v2 }
 0x104   : > { %v1048_v5 = vld [vmem:[%s9952_s8 + $0x14e0] sm:$0xff]  ;;  %5250 = vmatpush1.bf16.msra.mxu1 %v8737_v7 }
 0x105   : > { %v908_v9 = vld [vmem:[%s9952_s8 + $0x1080] sm:$0xff]  ;;  %v8730_v12 = vcombine.high %v1044_v3, %v1048_v5  ;;  %5210 = vmatprep.subr.bf16.mxu0 %v8602_v8  ;;  %v8729_v15 = vcombine.low %v1044_v3, %v1048_v5 }
 0x106   : > { %v912_v10 = vld [vmem:[%s9952_s8 + $0x10a0] sm:$0xff]  ;;  %5211 = vmatpush1.bf16.msra.mxu0 %v8601_v14 }
 0x107   : > { %v1036_v11 = vld [vmem:[%s9952_s8 + $0x1480] sm:$0xff]  ;;  %v8594_v17 = vcombine.high %v908_v9, %v912_v10  ;;  %5251 = vmatprep.subr.bf16.mxu1 %v8730_v12  ;;  %v8593_v25 = vcombine.low %v908_v9, %v912_v10 }
 0x108   : > { %v1040_v13 = vld [vmem:[%s9952_s8 + $0x14a0] sm:$0xff]  ;;  %5252 = vmatpush1.bf16.msra.mxu1 %v8729_v15 }
 0x109   : > { %v900_v18 = vld [vmem:[%s9952_s8 + $0x1040] sm:$0xff]  ;;  %v8722_v24 = vcombine.high %v1036_v11, %v1040_v13  ;;  %5212 = vmatprep.subr.bf16.mxu0 %v8594_v17  ;;  %v8721_v26 = vcombine.low %v1036_v11, %v1040_v13 }
 0x10a   : > { %v904_v21 = vld [vmem:[%s9952_s8 + $0x1060] sm:$0xff]  ;;  %5213 = vmatpush1.bf16.msra.mxu0 %v8593_v25 }
 0x10b   : > { %v1028_v23 = vld [vmem:[%s9952_s8 + $0x1440] sm:$0xff]  ;;  %v8586_v27 = vcombine.high %v900_v18, %v904_v21  ;;  %5253 = vmatprep.subr.bf16.mxu1 %v8722_v24  ;;  %v8585_v34 = vcombine.low %v900_v18, %v904_v21 }
 0x10c   : > { %v1032_v53 = vld [vmem:[%s9952_s8 + $0x1460] sm:$0xff]  ;;  %5254 = vmatpush1.bf16.msra.mxu1 %v8721_v26 }
 0x10d   : > { %v892_v54 = vld [vmem:[%s9952_s8 + $0x1000] sm:$0xff]  ;;  %v8714_v32 = vcombine.high %v1028_v23, %v1032_v53  ;;  %5214 = vmatprep.subr.bf16.mxu0 %v8586_v27  ;;  %v8713_v35 = vcombine.low %v1028_v23, %v1032_v53 }
 0x10e   : > { %v896_v30 = vld [vmem:[%s9952_s8 + $0x1020] sm:$0xff]  ;;  %5215 = vmatpush1.bf16.msra.mxu0 %v8585_v34 }
 0x10f   : > { %v1020_v31 = vld [vmem:[%s9952_s8 + $0x1400] sm:$0xff]  ;;  %v8578_v36 = vcombine.high %v892_v54, %v896_v30  ;;  %5255 = vmatprep.subr.bf16.mxu1 %v8714_v32  ;;  %v8577_v46 = vcombine.low %v892_v54, %v896_v30 }
 0x110   : > { %v1024_v33 = vld [vmem:[%s9952_s8 + $0x1420] sm:$0xff]  ;;  %5256 = vmatpush1.bf16.msra.mxu1 %v8713_v35 }
 0x111   : > { %v1012_v38 = vld [vmem:[%s9952_s8 + $0x13c0] sm:$0xff]  ;;  %v8706_v44 = vcombine.high %v1020_v31, %v1024_v33  ;;  %5216 = vmatprep.subr.bf16.mxu0 %v8578_v36  ;;  %v8705_v47 = vcombine.low %v1020_v31, %v1024_v33 }
 0x112   : > { %v1016_v42 = vld [vmem:[%s9952_s8 + $0x13e0] sm:$0xff]  ;;  %5217 = vmatpush1.bf16.msra.mxu0 %v8577_v46 }
 0x113   : > { %v1140_v43 = vld [vmem:[%s9952_s8 + $0x17c0] sm:$0xff]  ;;  %v8698_v48 = vcombine.high %v1012_v38, %v1016_v42  ;;  %5257 = vmatprep.subr.bf16.mxu1 %v8706_v44  ;;  %v8697_v56 = vcombine.low %v1012_v38, %v1016_v42 }
 0x114   : > { %v1144_v45 = vld [vmem:[%s9952_s8 + $0x17e0] sm:$0xff]  ;;  %5258 = vmatpush1.bf16.msra.mxu1 %v8705_v47 }
 0x115   : > { %v1004_v19 = vld [vmem:[%s9952_s8 + $0x1380] sm:$0xff]  ;;  %v8826_v52 = vcombine.high %v1140_v43, %v1144_v45  ;;  %5218 = vmatprep.subr.bf16.mxu0 %v8698_v48  ;;  %v8825_v57 = vcombine.low %v1140_v43, %v1144_v45 }
 0x116   : > { %v1008_v50 = vld [vmem:[%s9952_s8 + $0x13a0] sm:$0xff]  ;;  %5219 = vmatpush2.bf16.msra.mxu0 %v8697_v56  ;;  %v441_v56 = vld [vmem:[%s9952_s8 + $0x1e8] sm:$0xff] }
 0x117   : > { %v1132_v51 = vld [vmem:[%s9952_s8 + $0x1780] sm:$0xff]  ;;  %v8690_v60 = vcombine.high %v1004_v19, %v1008_v50  ;;  %5259 = vmatprep.subr.bf16.mxu1 %v8826_v52  ;;  %v8689_v2 = vcombine.low %v1004_v19, %v1008_v50 }
 0x118   : > { %v1136_v55 = vld [vmem:[%s9952_s8 + $0x17a0] sm:$0xff]  ;;  %5260 = vmatpush2.bf16.msra.mxu1 %v8825_v57  ;;  %v565_v57 = vld [vmem:[%s9952_s8 + $0x5c8] sm:$0xff] }
 0x119   : > { %v996_v61 = vld [vmem:[%s9952_s8 + $0x1340] sm:$0xff]  ;;  %v8818_v0 = vcombine.high %v1132_v51, %v1136_v55  ;;  %5220 = vmatprep.subr.bf16.mxu0 %v8690_v60  ;;  %v8817_v3 = vcombine.low %v1132_v51, %v1136_v55  ;;  %v437_v55 = vld [vmem:[%s9952_s8 + $0x1c8] sm:$0xff] }
 0x11a   : > { %v1000_v62 = vld [vmem:[%s9952_s8 + $0x1360] sm:$0xff]  ;;  %5221 = vmatpush2.bf16.msra.mxu0 %v8689_v2  ;;  %v433_v2 = vld [vmem:[%s9952_s8 + $0x1a8] sm:$0xff] }
 0x11b   : > { %v1124_v63 = vld [vmem:[%s9952_s8 + $0x1740] sm:$0xff]  ;;  %v8682_v4 = vcombine.high %v996_v61, %v1000_v62  ;;  %5261 = vmatprep.subr.bf16.mxu1 %v8818_v0  ;;  %v8681_v10 = vcombine.low %v996_v61, %v1000_v62  ;;  %v569_v61 = vld [vmem:[%s9952_s8 + $0x5e8] sm:$0xff]  ;;  %v8124_v0 = vcombine.high %v437_v55, %v441_v56 }
 0x11c   : > { %v1128_v1 = vld [vmem:[%s9952_s8 + $0x1760] sm:$0xff]  ;;  %5262 = vmatpush2.bf16.msra.mxu1 %v8817_v3  ;;  %v557_v3 = vld [vmem:[%s9952_s8 + $0x588] sm:$0xff] }
 0x11d   : > { %v988_v5 = vld [vmem:[%s9952_s8 + $0x1300] sm:$0xff]  ;;  %v8810_v8 = vcombine.high %v1124_v63, %v1128_v1  ;;  %5222 = vmatprep.subr.bf16.mxu0 %v8682_v4  ;;  %v8809_v11 = vcombine.low %v1124_v63, %v1128_v1  ;;  %v429_v1 = vld [vmem:[%s9952_s8 + $0x188] sm:$0xff]  ;;  %v8252_v4 = vcombine.high %v565_v57, %v569_v61 }
 0x11e   : > { %v992_v6 = vld [vmem:[%s9952_s8 + $0x1320] sm:$0xff]  ;;  %5223 = vmatpush2.bf16.msra.mxu0 %v8681_v10  ;;  %v8116_v10 = vcombine.high %v429_v1, %v433_v2 }
 0x11f   : > { %v1116_v7 = vld [vmem:[%s9952_s8 + $0x1700] sm:$0xff]  ;;  %v8674_v12 = vcombine.high %v988_v5, %v992_v6  ;;  %5263 = vmatprep.subr.bf16.mxu1 %v8810_v8  ;;  %v8673_v21 = vcombine.low %v988_v5, %v992_v6  ;;  %v561_v5 = vld [vmem:[%s9952_s8 + $0x5a8] sm:$0xff]  ;;  %v10228_v6 = vcombine.low %v10138_v37, %v10138_v37  ;;  %v8123_v8 = vcombine.low %v437_v55, %v441_v56 }
 0x120   : > { %v1120_v9 = vld [vmem:[%s9952_s8 + $0x1720] sm:$0xff]  ;;  %5264 = vmatpush2.bf16.msra.mxu1 %v8809_v11  ;;  %v421_v11 = vld [vmem:[%s9952_s8 + $0x148] sm:$0xff] }
 0x121   : > { %v980_v13 = vld [vmem:[%s9952_s8 + $0x12c0] sm:$0xff]  ;;  %v8802_v17 = vcombine.high %v1116_v7, %v1120_v9  ;;  %5224 = vmatprep.subr.bf16.mxu0 %v8674_v12  ;;  %v8801_v23 = vcombine.low %v1116_v7, %v1120_v9  ;;  %v10232_v7 = vcombine.low %v10140_v39, %v10140_v39  ;;  %v8251_v9 = vcombine.low %v565_v57, %v569_v61  ;;  %v425_v12 = vld [vmem:[%s9952_s8 + $0x168] sm:$0xff] }
 0x122   : > { %v984_v14 = vld [vmem:[%s9952_s8 + $0x12e0] sm:$0xff]  ;;  %5225 = vmatpush2.bf16.msra.mxu0 %v8673_v21  ;;  %v553_v37 = vld [vmem:[%s9952_s8 + $0x568] sm:$0xff]  ;;  %v8115_v39 = vcombine.low %v429_v1, %v433_v2 }
 0x123   : > { %v1108_v15 = vld [vmem:[%s9952_s8 + $0x16c0] sm:$0xff]  ;;  %v8666_v24 = vcombine.high %v980_v13, %v984_v14  ;;  %5265 = vmatprep.subr.bf16.mxu1 %v8802_v17  ;;  %v8665_v30 = vcombine.low %v980_v13, %v984_v14  ;;  %v549_v13 = vld [vmem:[%s9952_s8 + $0x548] sm:$0xff]  ;;  %v8244_v14 = vcombine.high %v557_v3, %v561_v5  ;;  %v8108_v17 = vcombine.high %v421_v11, %v425_v12 }
 0x124   : > { %v1112_v18 = vld [vmem:[%s9952_s8 + $0x16e0] sm:$0xff]  ;;  %5266 = vmatpush2.bf16.msra.mxu1 %v8801_v23  ;;  %v413_v21 = vld [vmem:[%s9952_s8 + $0x108] sm:$0xff] }
 0x125   : > { %v972_v53 = vld [vmem:[%s9952_s8 + $0x1280] sm:$0xff]  ;;  %v8794_v27 = vcombine.high %v1108_v15, %v1112_v18  ;;  %5226 = vmatprep.subr.bf16.mxu0 %v8666_v24  ;;  %v8793_v31 = vcombine.low %v1108_v15, %v1112_v18  ;;  %v8243_v15 = vcombine.low %v557_v3, %v561_v5  ;;  %v8236_v18 = vcombine.high %v549_v13, %v553_v37  ;;  %v417_v23 = vld [vmem:[%s9952_s8 + $0x128] sm:$0xff] }
 0x126   : > { %v976_v25 = vld [vmem:[%s9952_s8 + $0x12a0] sm:$0xff]  ;;  %5227 = vmatpush2.bf16.msra.mxu0 %v8665_v30  ;;  %v541_v24 = vld [vmem:[%s9952_s8 + $0x508] sm:$0xff] }
 0x127   : > { %v1100_v26 = vld [vmem:[%s9952_s8 + $0x1680] sm:$0xff]  ;;  %v8658_v32 = vcombine.high %v972_v53, %v976_v25  ;;  %5267 = vmatprep.subr.bf16.mxu1 %v8794_v27  ;;  %v8657_v42 = vcombine.low %v972_v53, %v976_v25  ;;  %v545_v53 = vld [vmem:[%s9952_s8 + $0x528] sm:$0xff]  ;;  %v8107_v25 = vcombine.low %v421_v11, %v425_v12  ;;  %v8100_v27 = vcombine.high %v413_v21, %v417_v23 }
 0x128   : > { %v1104_v54 = vld [vmem:[%s9952_s8 + $0x16a0] sm:$0xff]  ;;  %5268 = vmatpush2.bf16.msra.mxu1 %v8793_v31  ;;  %v405_v30 = vld [vmem:[%s9952_s8 + $0xc8] sm:$0xff] }
 0x129   : > { %v964_v33 = vld [vmem:[%s9952_s8 + $0x1240] sm:$0xff]  ;;  %v8786_v36 = vcombine.high %v1100_v26, %v1104_v54  ;;  %5228 = vmatprep.subr.bf16.mxu0 %v8658_v32  ;;  %v8785_v43 = vcombine.low %v1100_v26, %v1104_v54  ;;  %v8235_v26 = vcombine.low %v549_v13, %v553_v37  ;;  %v8228_v54 = vcombine.high %v541_v24, %v545_v53  ;;  %v409_v31 = vld [vmem:[%s9952_s8 + $0xe8] sm:$0xff] }
 0x12a   : > { %v968_v34 = vld [vmem:[%s9952_s8 + $0x1260] sm:$0xff]  ;;  %5229 = vmatpush2.bf16.msra.mxu0 %v8657_v42  ;;  %v533_v32 = vld [vmem:[%s9952_s8 + $0x4c8] sm:$0xff] }
 0x12b   : > { %v1092_v35 = vld [vmem:[%s9952_s8 + $0x1640] sm:$0xff]  ;;  %v8650_v44 = vcombine.high %v964_v33, %v968_v34  ;;  %5269 = vmatprep.subr.bf16.mxu1 %v8786_v36  ;;  %v8649_v50 = vcombine.low %v964_v33, %v968_v34  ;;  %v537_v33 = vld [vmem:[%s9952_s8 + $0x4e8] sm:$0xff]  ;;  %v8099_v34 = vcombine.low %v413_v21, %v417_v23  ;;  %v8092_v36 = vcombine.high %v405_v30, %v409_v31 }
 0x12c   : > { %v1096_v38 = vld [vmem:[%s9952_s8 + $0x1660] sm:$0xff]  ;;  %5270 = vmatpush2.bf16.msra.mxu1 %v8785_v43  ;;  %v397_v42 = vld [vmem:[%s9952_s8 + $0x88] sm:$0xff] }
 0x12d   : > { %v956_v45 = vld [vmem:[%s9952_s8 + $0x1200] sm:$0xff]  ;;  %v8778_v48 = vcombine.high %v1092_v35, %v1096_v38  ;;  %5230 = vmatprep.subr.bf16.mxu0 %v8650_v44  ;;  %v8777_v51 = vcombine.low %v1092_v35, %v1096_v38  ;;  %v8227_v35 = vcombine.low %v541_v24, %v545_v53  ;;  %v8220_v38 = vcombine.high %v533_v32, %v537_v33  ;;  %v401_v43 = vld [vmem:[%s9952_s8 + $0xa8] sm:$0xff] }
 0x12e   : > { %v960_v46 = vld [vmem:[%s9952_s8 + $0x1220] sm:$0xff]  ;;  %5231 = vmatpush2.bf16.msra.mxu0 %v8649_v50  ;;  %v525_v44 = vld [vmem:[%s9952_s8 + $0x488] sm:$0xff]  ;;  %v8083_v56 = vcombine.low %v397_v42, %v401_v43 }
 0x12f   : > { %v1084_v47 = vld [vmem:[%s9952_s8 + $0x1600] sm:$0xff]  ;;  %v8642_v52 = vcombine.high %v956_v45, %v960_v46  ;;  %5271 = vmatprep.subr.bf16.mxu1 %v8778_v48  ;;  %v8641_v62 = vcombine.low %v956_v45, %v960_v46  ;;  %v529_v45 = vld [vmem:[%s9952_s8 + $0x4a8] sm:$0xff]  ;;  %v8091_v46 = vcombine.low %v405_v30, %v409_v31  ;;  %v8084_v48 = vcombine.high %v397_v42, %v401_v43 }
 0x130   : > { %v1088_v19 = vld [vmem:[%s9952_s8 + $0x1620] sm:$0xff]  ;;  %5272 = vmatpush2.bf16.msra.mxu1 %v8777_v51  ;;  %v389_v50 = vld [vmem:[%s9952_s8 + $0x48] sm:$0xff]  ;;  %v8211_v57 = vcombine.low %v525_v44, %v529_v45 }
 0x131   : > { %v8770_v60 = vcombine.high %v1084_v47, %v1088_v19  ;;  %5232 = vmatprep.subr.bf16.mxu0 %v8642_v52  ;;  %v8769_v63 = vcombine.low %v1084_v47, %v1088_v19  ;;  %v8219_v47 = vcombine.low %v533_v32, %v537_v33  ;;  %v8212_v19 = vcombine.high %v525_v44, %v529_v45  ;;  %v393_v51 = vld [vmem:[%s9952_s8 + $0x68] sm:$0xff] }
 0x132   : > { %5233 = vmatpush2.bf16.msra.mxu0 %v8641_v62  ;;  %v517_v52 = vld [vmem:[%s9952_s8 + $0x448] sm:$0xff]  ;;  %v8075_v2 = vcombine.low %v389_v50, %v393_v51 }
 0x133   : > { %5273 = vmatprep.subr.bf16.mxu1 %v8770_v60  ;;  %5284 = vmatprep.subr.bf16.mxu0 %v8124_v0  ;;  %v521_v55 = vld [vmem:[%s9952_s8 + $0x468] sm:$0xff]  ;;  %v8076_v60 = vcombine.high %v389_v50, %v393_v51 }
 0x134   : > { %5274 = vmatpush2.bf16.msra.mxu1 %v8769_v63  ;;  %v8204_v61 = vcombine.high %v517_v52, %v521_v55  ;;  %v381_v62 = vld [vmem:[%s9952_s8 + $0x8] sm:$0xff]  ;;  %v8203_v3 = vcombine.low %v517_v52, %v521_v55 }
 0x135   : > { %5325 = vmatprep.subr.bf16.mxu1 %v8252_v4  ;;  %5235 = vmatmul.mubr.bf16.vlgmr.msra.gmra.mxu0 %v10228_v6  ;;  %v385_v63 = vld [vmem:[%s9952_s8 + $0x28] sm:$0xff] }
 0x136   : > { %5285 = vmatpush1.bf16.msra.mxu0 %v8123_v8  ;;  %5316 = vmatprep.mubr.bf16.mxu0 %v10000_v58  ;;  %v509_v0 = vld [vmem:[%s9952_s8 + $0x408] sm:$0xff]  ;;  %v8068_v4 = vcombine.high %v381_v62, %v385_v63  ;;  %v8067_v12 = vcombine.low %v381_v62, %v385_v63 }
 0x137   : > { %5276 = vmatmul.mubr.bf16.vlgmr.msra.gmra.mxu1 %v10232_v7  ;;  %5286 = vmatprep.subr.bf16.mxu0 %v8116_v10  ;;  %v513_v1 = vld [vmem:[%s9952_s8 + $0x428] sm:$0xff] }
 0x138   : > { %5326 = vmatpush1.bf16.msra.mxu1 %v8251_v9  ;;  %5357 = vmatprep.mubr.bf16.mxu1 %v10004_v59  ;;  %v8196_v5 = vcombine.high %v509_v0, %v513_v1  ;;  %v501_v8 = vld [vmem:[%s9952_s8 + $0x3c8] sm:$0xff]  ;;  %v8195_v13 = vcombine.low %v509_v0, %v513_v1 }
 0x139   : > { %5327 = vmatprep.subr.bf16.mxu1 %v8244_v14  ;;  %v505_v9 = vld [vmem:[%s9952_s8 + $0x3e8] sm:$0xff] }
 0x13a   : > { %5287 = vmatpush1.bf16.msra.mxu0 %v8115_v39  ;;  %v629_v10 = vld [vmem:[%s9952_s8 + $0x7c8] sm:$0xff]  ;;  %v8188_v14 = vcombine.high %v501_v8, %v505_v9  ;;  %v8187_v21 = vcombine.low %v501_v8, %v505_v9 }
 0x13b   : > { %5288 = vmatprep.subr.bf16.mxu0 %v8108_v17  ;;  %v633_v11 = vld [vmem:[%s9952_s8 + $0x7e8] sm:$0xff] }
 0x13c   : > { %5328 = vmatpush1.bf16.msra.mxu1 %v8243_v15  ;;  %v8316_v37 = vcombine.high %v629_v10, %v633_v11  ;;  %v493_v39 = vld [vmem:[%s9952_s8 + $0x388] sm:$0xff]  ;;  %v8315_v23 = vcombine.low %v629_v10, %v633_v11 }
 0x13d   : > { %5329 = vmatprep.subr.bf16.mxu1 %v8236_v18  ;;  %v497_v15 = vld [vmem:[%s9952_s8 + $0x3a8] sm:$0xff] }
 0x13e   : > { %5289 = vmatpush1.bf16.msra.mxu0 %v8107_v25  ;;  %v621_v17 = vld [vmem:[%s9952_s8 + $0x788] sm:$0xff]  ;;  %v8180_v24 = vcombine.high %v493_v39, %v497_v15  ;;  %v8179_v30 = vcombine.low %v493_v39, %v497_v15 }
 0x13f   : > { %5290 = vmatprep.subr.bf16.mxu0 %v8100_v27  ;;  %v625_v18 = vld [vmem:[%s9952_s8 + $0x7a8] sm:$0xff] }
 0x140   : > { %5330 = vmatpush1.bf16.msra.mxu1 %v8235_v26  ;;  %v8308_v53 = vcombine.high %v621_v17, %v625_v18  ;;  %v485_v25 = vld [vmem:[%s9952_s8 + $0x348] sm:$0xff]  ;;  %v8307_v31 = vcombine.low %v621_v17, %v625_v18 }
 0x141   : > { %5331 = vmatprep.subr.bf16.mxu1 %v8228_v54  ;;  %v489_v26 = vld [vmem:[%s9952_s8 + $0x368] sm:$0xff] }
 0x142   : > { %5291 = vmatpush1.bf16.msra.mxu0 %v8099_v34  ;;  %v613_v27 = vld [vmem:[%s9952_s8 + $0x748] sm:$0xff]  ;;  %v8172_v32 = vcombine.high %v485_v25, %v489_v26  ;;  %v8171_v42 = vcombine.low %v485_v25, %v489_v26 }
 0x143   : > { %5292 = vmatprep.subr.bf16.mxu0 %v8092_v36  ;;  %v617_v54 = vld [vmem:[%s9952_s8 + $0x768] sm:$0xff] }
 0x144   : > { %5332 = vmatpush1.bf16.msra.mxu1 %v8227_v35  ;;  %v8300_v33 = vcombine.high %v613_v27, %v617_v54  ;;  %v477_v34 = vld [vmem:[%s9952_s8 + $0x308] sm:$0xff]  ;;  %v8299_v43 = vcombine.low %v613_v27, %v617_v54 }
 0x145   : > { %5333 = vmatprep.subr.bf16.mxu1 %v8220_v38  ;;  %v481_v35 = vld [vmem:[%s9952_s8 + $0x328] sm:$0xff] }
 0x146   : > { %5293 = vmatpush1.bf16.msra.mxu0 %v8091_v46  ;;  %v605_v36 = vld [vmem:[%s9952_s8 + $0x708] sm:$0xff]  ;;  %v8164_v44 = vcombine.high %v477_v34, %v481_v35  ;;  %v8163_v50 = vcombine.low %v477_v34, %v481_v35  ;;  %v1148_v35 = vld [vmem:[%s9946_s16] sm:$0xff] }
 0x147   : > { %5294 = vmatprep.subr.bf16.mxu0 %v8084_v48  ;;  %v609_v38 = vld [vmem:[%s9952_s8 + $0x728] sm:$0xff] }
 0x148   : > { %5334 = vmatpush1.bf16.msra.mxu1 %v8219_v47  ;;  %v8292_v45 = vcombine.high %v605_v36, %v609_v38  ;;  %v469_v46 = vld [vmem:[%s9952_s8 + $0x2c8] sm:$0xff]  ;;  %v8291_v51 = vcombine.low %v605_v36, %v609_v38 }
 0x149   : > { %5335 = vmatprep.subr.bf16.mxu1 %v8212_v19  ;;  %v473_v47 = vld [vmem:[%s9952_s8 + $0x2e8] sm:$0xff] }
 0x14a   : > { %5295 = vmatpush1.bf16.msra.mxu0 %v8083_v56  ;;  %v597_v48 = vld [vmem:[%s9952_s8 + $0x6c8] sm:$0xff]  ;;  %v8156_v52 = vcombine.high %v469_v46, %v473_v47  ;;  %v8155_v62 = vcombine.low %v469_v46, %v473_v47 }
 0x14b   : > { %5296 = vmatprep.subr.bf16.mxu0 %v8076_v60  ;;  %v601_v19 = vld [vmem:[%s9952_s8 + $0x6e8] sm:$0xff] }
 0x14c   : > { %5336 = vmatpush1.bf16.msra.mxu1 %v8211_v57  ;;  %v8284_v55 = vcombine.high %v597_v48, %v601_v19  ;;  %v461_v56 = vld [vmem:[%s9952_s8 + $0x288] sm:$0xff]  ;;  %v8283_v63 = vcombine.low %v597_v48, %v601_v19 }
 0x14d   : > { %5337 = vmatprep.subr.bf16.mxu1 %v8204_v61  ;;  %v465_v57 = vld [vmem:[%s9952_s8 + $0x2a8] sm:$0xff] }
 0x14e   : > { %5297 = vmatpush1.bf16.msra.mxu0 %v8075_v2  ;;  %v589_v60 = vld [vmem:[%s9952_s8 + $0x688] sm:$0xff]  ;;  %v8148_v0 = vcombine.high %v461_v56, %v465_v57  ;;  %v8147_v8 = vcombine.low %v461_v56, %v465_v57 }
 0x14f   : > { %5298 = vmatprep.subr.bf16.mxu0 %v8068_v4  ;;  %v593_v61 = vld [vmem:[%s9952_s8 + $0x6a8] sm:$0xff] }
 0x150   : > { %5338 = vmatpush1.bf16.msra.mxu1 %v8203_v3  ;;  %v8276_v1 = vcombine.high %v589_v60, %v593_v61  ;;  %v453_v2 = vld [vmem:[%s9952_s8 + $0x248] sm:$0xff]  ;;  %v8275_v9 = vcombine.low %v589_v60, %v593_v61 }
 0x151   : > { %5339 = vmatprep.subr.bf16.mxu1 %v8196_v5  ;;  %v457_v3 = vld [vmem:[%s9952_s8 + $0x268] sm:$0xff] }
 0x152   : > { %5299 = vmatpush1.bf16.msra.mxu0 %v8067_v12  ;;  %v581_v4 = vld [vmem:[%s9952_s8 + $0x648] sm:$0xff]  ;;  %v8140_v10 = vcombine.high %v453_v2, %v457_v3  ;;  %v8139_v39 = vcombine.low %v453_v2, %v457_v3 }
 0x153   : > { %5300 = vmatprep.subr.bf16.mxu0 %v8188_v14  ;;  %v585_v5 = vld [vmem:[%s9952_s8 + $0x668] sm:$0xff] }
 0x154   : > { %5340 = vmatpush1.bf16.msra.mxu1 %v8195_v13  ;;  %v8268_v11 = vcombine.high %v581_v4, %v585_v5  ;;  %v445_v12 = vld [vmem:[%s9952_s8 + $0x208] sm:$0xff]  ;;  %v8267_v15 = vcombine.low %v581_v4, %v585_v5 }
 0x155   : > { %5341 = vmatprep.subr.bf16.mxu1 %v8316_v37  ;;  %v449_v13 = vld [vmem:[%s9952_s8 + $0x228] sm:$0xff] }
 0x156   : > { %5301 = vmatpush2.bf16.msra.mxu0 %v8187_v21  ;;  %v573_v14 = vld [vmem:[%s9952_s8 + $0x608] sm:$0xff]  ;;  %v8132_v17 = vcombine.high %v445_v12, %v449_v13  ;;  %v8131_v25 = vcombine.low %v445_v12, %v449_v13 }
 0x157   : > { %5302 = vmatprep.subr.bf16.mxu0 %v8180_v24  ;;  %v577_v37 = vld [vmem:[%s9952_s8 + $0x628] sm:$0xff] }
 0x158   : > { %5342 = vmatpush2.bf16.msra.mxu1 %v8315_v23  ;;  %v8260_v18 = vcombine.high %v573_v14, %v577_v37  ;;  %v693_v21 = vld [vmem:[%s9952_s8 + $0x9c8] sm:$0xff]  ;;  %v8259_v26 = vcombine.low %v573_v14, %v577_v37 }
 0x159   : > { %5343 = vmatprep.subr.bf16.mxu1 %v8308_v53  ;;  %v697_v23 = vld [vmem:[%s9952_s8 + $0x9e8] sm:$0xff] }
 0x15a   : > { %5303 = vmatpush2.bf16.msra.mxu0 %v8179_v30  ;;  %v821_v24 = vld [vmem:[%s9952_s8 + $0xdc8] sm:$0xff]  ;;  %v8380_v27 = vcombine.high %v693_v21, %v697_v23  ;;  %v8379_v34 = vcombine.low %v693_v21, %v697_v23 }
 0x15b   : > { %5304 = vmatprep.subr.bf16.mxu0 %v8172_v32  ;;  %v825_v53 = vld [vmem:[%s9952_s8 + $0xde8] sm:$0xff] }
 0x15c   : > { %5344 = vmatpush2.bf16.msra.mxu1 %v8307_v31  ;;  %v8508_v54 = vcombine.high %v821_v24, %v825_v53  ;;  %v685_v30 = vld [vmem:[%s9952_s8 + $0x988] sm:$0xff]  ;;  %v8507_v36 = vcombine.low %v821_v24, %v825_v53 }
 0x15d   : > { %5345 = vmatprep.subr.bf16.mxu1 %v8300_v33  ;;  %v689_v31 = vld [vmem:[%s9952_s8 + $0x9a8] sm:$0xff] }
 0x15e   : > { %5305 = vmatpush2.bf16.msra.mxu0 %v8171_v42  ;;  %v813_v32 = vld [vmem:[%s9952_s8 + $0xd88] sm:$0xff]  ;;  %v8372_v38 = vcombine.high %v685_v30, %v689_v31 }
 0x15f   : > { %5306 = vmatprep.subr.bf16.mxu0 %v8164_v44  ;;  %v817_v33 = vld [vmem:[%s9952_s8 + $0xda8] sm:$0xff] }
 0x160   : > { %5346 = vmatpush2.bf16.msra.mxu1 %v8299_v43  ;;  %v8500_v42 = vcombine.high %v813_v32, %v817_v33  ;;  %v677_v43 = vld [vmem:[%s9952_s8 + $0x948] sm:$0xff] }
 0x161   : > { %5347 = vmatprep.subr.bf16.mxu1 %v8292_v45  ;;  %v681_v44 = vld [vmem:[%s9952_s8 + $0x968] sm:$0xff] }
 0x162   : > { %5307 = vmatpush2.bf16.msra.mxu0 %v8163_v50  ;;  %v1149_v46 = vld [vmem:[%s9946_s16 + $0x8] sm:$0xff]  ;;  %v8364_v56 = vcombine.high %v677_v43, %v681_v44 }
 0x163   : > { %5308 = vmatprep.subr.bf16.mxu0 %v8156_v52  ;;  %v805_v47 = vld [vmem:[%s9952_s8 + $0xd48] sm:$0xff] }
 0x164   : > { %5348 = vmatpush2.bf16.msra.mxu1 %v8291_v51  ;;  %v809_v48 = vld [vmem:[%s9952_s8 + $0xd68] sm:$0xff]  ;;  %v8371_v51 = vcombine.low %v685_v30, %v689_v31 }
 0x165   : > { %5349 = vmatprep.subr.bf16.mxu1 %v8284_v55  ;;  %v8499_v55 = vcombine.low %v813_v32, %v817_v33  ;;  %v797_v2 = vld [vmem:[%s9952_s8 + $0xd08] sm:$0xff] }
 0x166   : > { %5309 = vmatpush2.bf16.msra.mxu0 %v8155_v62  ;;  %v8492_v62 = vcombine.high %v805_v47, %v809_v48  ;;  %v801_v3 = vld [vmem:[%s9952_s8 + $0xd28] sm:$0xff] }
 0x167   : > { %5310 = vmatprep.subr.bf16.mxu0 %v8148_v0  ;;  %v673_v0 = vld [vmem:[%s9952_s8 + $0x928] sm:$0xff]  ;;  %v8484_v13 = vcombine.high %v797_v2, %v801_v3 }
 0x168   : > { %5350 = vmatpush2.bf16.msra.mxu1 %v8283_v63  ;;  %v669_v63 = vld [vmem:[%s9952_s8 + $0x908] sm:$0xff] }
 0x169   : > { %5351 = vmatprep.subr.bf16.mxu1 %v8276_v1  ;;  %v661_v14 = vld [vmem:[%s9952_s8 + $0x8c8] sm:$0xff] }
 0x16a   : > { %5311 = vmatpush2.bf16.msra.mxu0 %v8147_v8  ;;  %v8363_v8 = vcombine.low %v677_v43, %v681_v44  ;;  %v665_v37 = vld [vmem:[%s9952_s8 + $0x8e8] sm:$0xff] }
 0x16b   : > { %5312 = vmatprep.subr.bf16.mxu0 %v8140_v10  ;;  %v8491_v10 = vcombine.low %v805_v47, %v809_v48  ;;  %v8348_v21 = vcombine.high %v661_v14, %v665_v37  ;;  %v653_v24 = vld [vmem:[%s9952_s8 + $0x888] sm:$0xff] }
 0x16c   : > { %5352 = vmatpush2.bf16.msra.mxu1 %v8275_v9  ;;  %v657_v53 = vld [vmem:[%s9952_s8 + $0x8a8] sm:$0xff] }
 0x16d   : > { %5353 = vmatprep.subr.bf16.mxu1 %v8268_v11  ;;  %v8356_v11 = vcombine.high %v669_v63, %v673_v0  ;;  %v8340_v30 = vcombine.high %v653_v24, %v657_v53  ;;  %v645_v32 = vld [vmem:[%s9952_s8 + $0x848] sm:$0xff] }
 0x16e   : > { %5313 = vmatpush2.bf16.msra.mxu0 %v8139_v39  ;;  %v789_v39 = vld [vmem:[%s9952_s8 + $0xcc8] sm:$0xff] }
 0x16f   : > { %5314 = vmatprep.subr.bf16.mxu0 %v8132_v17  ;;  %v8355_v17 = vcombine.low %v669_v63, %v673_v0  ;;  %v649_v33 = vld [vmem:[%s9952_s8 + $0x868] sm:$0xff] }
 0x170   : > { %5354 = vmatpush2.bf16.msra.mxu1 %v8267_v15  ;;  %v793_v15 = vld [vmem:[%s9952_s8 + $0xce8] sm:$0xff]  ;;  %v8331_v48 = vcombine.low %v645_v32, %v649_v33 }
 0x171   : > { %5355 = vmatprep.subr.bf16.mxu1 %v8260_v18  ;;  %v8483_v18 = vcombine.low %v797_v2, %v801_v3  ;;  %v8476_v23 = vcombine.high %v789_v39, %v793_v15  ;;  %v637_v44 = vld [vmem:[%s9952_s8 + $0x808] sm:$0xff] }
 0x172   : > { %5315 = vmatpush2.bf16.msra.mxu0 %v8131_v25  ;;  %v781_v25 = vld [vmem:[%s9952_s8 + $0xc88] sm:$0xff] }
 0x173   : > { %5366 = vmatprep.subr.bf16.mxu0 %v8380_v27  ;;  %v8347_v27 = vcombine.low %v661_v14, %v665_v37  ;;  %v769_v47 = vld [vmem:[%s9952_s8 + $0xc28] sm:$0xff] }
 0x174   : > { %5356 = vmatpush2.bf16.msra.mxu1 %v8259_v26  ;;  %v5072_v45 = vpop.f32.mrf.mxu0  ;;  %v785_v26 = vld [vmem:[%s9952_s8 + $0xca8] sm:$0xff] }
 0x175   : > { %5407 = vmatprep.subr.bf16.mxu1 %v8508_v54  ;;  %5317 = vmatmul.mubr.bf16.vlgmr.msra.gmra.mxu0 %v10050_v16  ;;  %v5073_v19 = vadd.f32 %v5072_v45, %v1148_v35  ;;  %v8475_v54 = vcombine.low %v789_v39, %v793_v15  ;;  %v8468_v31 = vcombine.high %v781_v25, %v785_v26  ;;  %v777_v35 = vld [vmem:[%s9952_s8 + $0xc68] sm:$0xff] }
 0x176   : > { %v5113_v50 = vpop.f32.mrf.mxu1  ;;  %5367 = vmatpush1.bf16.msra.mxu0 %v8379_v34  ;;  %v5074_v52 = vpop.f32.mrf.mxu0  ;;  %5398 = vmatprep.mubr.bf16.mxu0 %v10067_v28  ;;  %v773_v34 = vld [vmem:[%s9952_s8 + $0xc48] sm:$0xff] }
 0x177   : > { %5358 = vmatmul.mubr.bf16.vlgmr.msra.gmra.mxu1 %v10058_v20  ;;  %5368 = vmatprep.subr.bf16.mxu0 %v8372_v38  ;;  %v10310_v57 = vadd.f32 %v5113_v50, %v5073_v19  ;;  %v5075_v60 = vadd.f32 %v5074_v52, %v1149_v46  ;;  %v8467_v38 = vcombine.low %v781_v25, %v785_v26  ;;  %v641_v45 = vld [vmem:[%s9952_s8 + $0x828] sm:$0xff] }
 0x178   : > { %5408 = vmatpush1.bf16.msra.mxu1 %v8507_v36  ;;  %v5115_v61 = vpop.f32.mrf.mxu1  ;;  %v5076_v1 = vpop.f32.mrf.mxu0  ;;  %5439 = vmatprep.mubr.bf16.mxu1 %v10073_v29  ;;  %v8339_v36 = vcombine.low %v653_v24, %v657_v53  ;;  %v8460_v43 = vcombine.high %v773_v34, %v777_v35  ;;  %v765_v46 = vld [vmem:[%s9952_s8 + $0xc08] sm:$0xff]  ;;  %v8459_v19 = vcombine.low %v773_v34, %v777_v35 }
 0x179   : > { %5409 = vmatprep.subr.bf16.mxu1 %v8500_v42  ;;  %v10318_v4 = vadd.f32 %v5115_v61, %v5075_v60  ;;  %v8332_v42 = vcombine.high %v645_v32, %v649_v33  ;;  %v8324_v50 = vcombine.high %v637_v44, %v641_v45  ;;  %v757_v52 = vld [vmem:[%s9952_s8 + $0xbc8] sm:$0xff]  ;;  %v8323_v61 = vcombine.low %v637_v44, %v641_v45 }
 0x17a   : > { %v5117_v5 = vpop.f32.mrf.mxu1  ;;  %5369 = vmatpush1.bf16.msra.mxu0 %v8371_v51  ;;  %v5077_v9 = vpop.f32.mrf.mxu0  ;;  %v8452_v51 = vcombine.high %v765_v46, %v769_v47  ;;  %v889_v60 = vld [vmem:[%s9952_s8 + $0xfe8] sm:$0xff] }
 0x17b   : > { %5370 = vmatprep.subr.bf16.mxu0 %v8364_v56  ;;  %v885_v56 = vld [vmem:[%s9952_s8 + $0xfc8] sm:$0xff] }
 0x17c   : > { %5410 = vmatpush1.bf16.msra.mxu1 %v8499_v55  ;;  %v5118_v12 = vpop.f32.mrf.mxu1  ;;  %v761_v55 = vld [vmem:[%s9952_s8 + $0xbe8] sm:$0xff]  ;;  %v8572_v0 = vcombine.high %v885_v56, %v889_v60  ;;  %v8571_v9 = vcombine.low %v885_v56, %v889_v60 }
 0x17d   : > { %5411 = vmatprep.subr.bf16.mxu1 %v8492_v62  ;;  %v8451_v62 = vcombine.low %v765_v46, %v769_v47  ;;  %v8444_v63 = vcombine.high %v757_v52, %v761_v55  ;;  %v749_v1 = vld [vmem:[%s9952_s8 + $0xb88] sm:$0xff] }
 0x17e   : > { %5371 = vmatpush1.bf16.msra.mxu0 %v8363_v8  ;;  %v753_v2 = vld [vmem:[%s9952_s8 + $0xba8] sm:$0xff]  ;;  %v8443_v8 = vcombine.low %v757_v52, %v761_v55 }
 0x17f   : > { %5372 = vmatprep.subr.bf16.mxu0 %v8356_v11  ;;  %v877_v3 = vld [vmem:[%s9952_s8 + $0xf88] sm:$0xff]  ;;  %v8435_v39 = vcombine.low %v749_v1, %v753_v2 }
 0x180   : > { %5412 = vmatpush1.bf16.msra.mxu1 %v8491_v10  ;;  %v881_v5 = vld [vmem:[%s9952_s8 + $0xfa8] sm:$0xff]  ;;  %v8436_v10 = vcombine.high %v749_v1, %v753_v2 }
 0x181   : > { %5413 = vmatprep.subr.bf16.mxu1 %v8484_v13  ;;  %v8564_v11 = vcombine.high %v877_v3, %v881_v5  ;;  %v741_v12 = vld [vmem:[%s9952_s8 + $0xb48] sm:$0xff]  ;;  %v8563_v15 = vcombine.low %v877_v3, %v881_v5 }
 0x182   : > { %5373 = vmatpush1.bf16.msra.mxu0 %v8355_v17  ;;  %v745_v13 = vld [vmem:[%s9952_s8 + $0xb68] sm:$0xff] }
 0x183   : > { %5374 = vmatprep.subr.bf16.mxu0 %v8348_v21  ;;  %v869_v14 = vld [vmem:[%s9952_s8 + $0xf48] sm:$0xff]  ;;  %v8428_v17 = vcombine.high %v741_v12, %v745_v13  ;;  %v8427_v25 = vcombine.low %v741_v12, %v745_v13 }
 0x184   : > { %5414 = vmatpush1.bf16.msra.mxu1 %v8483_v18  ;;  %v873_v37 = vld [vmem:[%s9952_s8 + $0xf68] sm:$0xff] }
 0x185   : > { %5415 = vmatprep.subr.bf16.mxu1 %v8476_v23  ;;  %v8556_v18 = vcombine.high %v869_v14, %v873_v37  ;;  %v733_v21 = vld [vmem:[%s9952_s8 + $0xb08] sm:$0xff]  ;;  %v8555_v26 = vcombine.low %v869_v14, %v873_v37 }
 0x186   : > { %5375 = vmatpush1.bf16.msra.mxu0 %v8347_v27  ;;  %v737_v23 = vld [vmem:[%s9952_s8 + $0xb28] sm:$0xff] }
 0x187   : > { %5376 = vmatprep.subr.bf16.mxu0 %v8340_v30  ;;  %v861_v24 = vld [vmem:[%s9952_s8 + $0xf08] sm:$0xff]  ;;  %v8420_v27 = vcombine.high %v733_v21, %v737_v23  ;;  %v8419_v34 = vcombine.low %v733_v21, %v737_v23 }
 0x188   : > { %5416 = vmatpush1.bf16.msra.mxu1 %v8475_v54  ;;  %v865_v53 = vld [vmem:[%s9952_s8 + $0xf28] sm:$0xff] }
 0x189   : > { %5417 = vmatprep.subr.bf16.mxu1 %v8468_v31  ;;  %v8548_v54 = vcombine.high %v861_v24, %v865_v53  ;;  %v725_v30 = vld [vmem:[%s9952_s8 + $0xac8] sm:$0xff]  ;;  %v8547_v35 = vcombine.low %v861_v24, %v865_v53 }
 0x18a   : > { %5377 = vmatpush1.bf16.msra.mxu0 %v8339_v36  ;;  %v729_v31 = vld [vmem:[%s9952_s8 + $0xae8] sm:$0xff] }
 0x18b   : > { %5378 = vmatprep.subr.bf16.mxu0 %v8332_v42  ;;  %v853_v32 = vld [vmem:[%s9952_s8 + $0xec8] sm:$0xff]  ;;  %v8412_v36 = vcombine.high %v725_v30, %v729_v31  ;;  %v8411_v46 = vcombine.low %v725_v30, %v729_v31 }
 0x18c   : > { %5418 = vmatpush1.bf16.msra.mxu1 %v8467_v38  ;;  %v857_v33 = vld [vmem:[%s9952_s8 + $0xee8] sm:$0xff] }
 0x18d   : > { %5419 = vmatprep.subr.bf16.mxu1 %v8460_v43  ;;  %v8540_v38 = vcombine.high %v853_v32, %v857_v33  ;;  %v717_v42 = vld [vmem:[%s9952_s8 + $0xa88] sm:$0xff]  ;;  %v8539_v47 = vcombine.low %v853_v32, %v857_v33 }
 0x18e   : > { %5379 = vmatpush1.bf16.msra.mxu0 %v8331_v48  ;;  %v721_v43 = vld [vmem:[%s9952_s8 + $0xaa8] sm:$0xff] }
 0x18f   : > { %5380 = vmatprep.subr.bf16.mxu0 %v8324_v50  ;;  %v845_v44 = vld [vmem:[%s9952_s8 + $0xe88] sm:$0xff]  ;;  %v8404_v48 = vcombine.high %v717_v42, %v721_v43  ;;  %v8403_v56 = vcombine.low %v717_v42, %v721_v43 }
 0x190   : > { %5420 = vmatpush1.bf16.msra.mxu1 %v8459_v19  ;;  %v849_v45 = vld [vmem:[%s9952_s8 + $0xea8] sm:$0xff] }
 0x191   : > { %5421 = vmatprep.subr.bf16.mxu1 %v8452_v51  ;;  %v8532_v19 = vcombine.high %v845_v44, %v849_v45  ;;  %v709_v50 = vld [vmem:[%s9952_s8 + $0xa48] sm:$0xff]  ;;  %v8531_v60 = vcombine.low %v845_v44, %v849_v45 }
 0x192   : > { %5381 = vmatpush1.bf16.msra.mxu0 %v8323_v61  ;;  %v713_v51 = vld [vmem:[%s9952_s8 + $0xa68] sm:$0xff] }
 0x193   : > { %5382 = vmatprep.subr.bf16.mxu0 %v8444_v63  ;;  %v837_v52 = vld [vmem:[%s9952_s8 + $0xe48] sm:$0xff]  ;;  %v8396_v61 = vcombine.high %v709_v50, %v713_v51  ;;  %v8395_v3 = vcombine.low %v709_v50, %v713_v51 }
 0x194   : > { %5422 = vmatpush1.bf16.msra.mxu1 %v8451_v62  ;;  %v841_v55 = vld [vmem:[%s9952_s8 + $0xe68] sm:$0xff] }
 0x195   : > { %5423 = vmatprep.subr.bf16.mxu1 %v8572_v0  ;;  %v8524_v62 = vcombine.high %v837_v52, %v841_v55  ;;  %v701_v63 = vld [vmem:[%s9952_s8 + $0xa08] sm:$0xff]  ;;  %v8523_v5 = vcombine.low %v837_v52, %v841_v55 }
 0x196   : > { %5383 = vmatpush2.bf16.msra.mxu0 %v8443_v8  ;;  %v705_v0 = vld [vmem:[%s9952_s8 + $0xa28] sm:$0xff] }
 0x197   : > { %5384 = vmatprep.subr.bf16.mxu0 %v8436_v10  ;;  %v829_v1 = vld [vmem:[%s9952_s8 + $0xe08] sm:$0xff]  ;;  %v8388_v8 = vcombine.high %v701_v63, %v705_v0  ;;  %v8387_v14 = vcombine.low %v701_v63, %v705_v0 }
 0x198   : > { %5424 = vmatpush2.bf16.msra.mxu1 %v8571_v9  ;;  %v833_v2 = vld [vmem:[%s9952_s8 + $0xe28] sm:$0xff] }
 0x199   : > { %5425 = vmatprep.subr.bf16.mxu1 %v8564_v11  ;;  %v8516_v9 = vcombine.high %v829_v1, %v833_v2  ;;  %v949_v10 = vld [vmem:[%s9952_s8 + $0x11c8] sm:$0xff]  ;;  %v8515_v37 = vcombine.low %v829_v1, %v833_v2 }
 0x19a   : > { %5385 = vmatpush2.bf16.msra.mxu0 %v8435_v39  ;;  %v953_v11 = vld [vmem:[%s9952_s8 + $0x11e8] sm:$0xff] }
 0x19b   : > { %5386 = vmatprep.subr.bf16.mxu0 %v8428_v17  ;;  %v1077_v12 = vld [vmem:[%s9952_s8 + $0x15c8] sm:$0xff]  ;;  %v8636_v39 = vcombine.high %v949_v10, %v953_v11  ;;  %v8635_v24 = vcombine.low %v949_v10, %v953_v11 }
 0x19c   : > { %5426 = vmatpush2.bf16.msra.mxu1 %v8563_v15  ;;  %v1081_v13 = vld [vmem:[%s9952_s8 + $0x15e8] sm:$0xff] }
 0x19d   : > { %5427 = vmatprep.subr.bf16.mxu1 %v8556_v18  ;;  %v8764_v15 = vcombine.high %v1077_v12, %v1081_v13  ;;  %v941_v17 = vld [vmem:[%s9952_s8 + $0x1188] sm:$0xff]  ;;  %v8763_v53 = vcombine.low %v1077_v12, %v1081_v13 }
 0x19e   : > { %5387 = vmatpush2.bf16.msra.mxu0 %v8427_v25  ;;  %v945_v18 = vld [vmem:[%s9952_s8 + $0x11a8] sm:$0xff] }
 0x19f   : > { %5388 = vmatprep.subr.bf16.mxu0 %v8420_v27  ;;  %v1069_v21 = vld [vmem:[%s9952_s8 + $0x1588] sm:$0xff]  ;;  %v8628_v25 = vcombine.high %v941_v17, %v945_v18 }
 0x1a0   : > { %5428 = vmatpush2.bf16.msra.mxu1 %v8555_v26  ;;  %v1073_v23 = vld [vmem:[%s9952_s8 + $0x15a8] sm:$0xff] }
 0x1a1   : > { %5429 = vmatprep.subr.bf16.mxu1 %v8548_v54  ;;  %v8756_v26 = vcombine.high %v1069_v21, %v1073_v23  ;;  %v933_v27 = vld [vmem:[%s9952_s8 + $0x1148] sm:$0xff] }
 0x1a2   : > { %5389 = vmatpush2.bf16.msra.mxu0 %v8419_v34  ;;  %v937_v54 = vld [vmem:[%s9952_s8 + $0x1168] sm:$0xff] }
 0x1a3   : > { %5390 = vmatprep.subr.bf16.mxu0 %v8412_v36  ;;  %v1061_v31 = vld [vmem:[%s9952_s8 + $0x1548] sm:$0xff]  ;;  %v8620_v42 = vcombine.high %v933_v27, %v937_v54 }
 0x1a4   : > { %5430 = vmatpush2.bf16.msra.mxu1 %v8547_v35  ;;  %v1065_v32 = vld [vmem:[%s9952_s8 + $0x1568] sm:$0xff]  ;;  %v8627_v35 = vcombine.low %v941_v17, %v945_v18 }
 0x1a5   : > { %5431 = vmatprep.subr.bf16.mxu1 %v8540_v38  ;;  %v8755_v38 = vcombine.low %v1069_v21, %v1073_v23  ;;  %v1057_v50 = vld [vmem:[%s9952_s8 + $0x1528] sm:$0xff] }
 0x1a6   : > { %5391 = vmatpush2.bf16.msra.mxu0 %v8411_v46  ;;  %v925_v46 = vld [vmem:[%s9952_s8 + $0x1108] sm:$0xff] }
 0x1a7   : > { %5392 = vmatprep.subr.bf16.mxu0 %v8404_v48  ;;  %v917_v63 = vld [vmem:[%s9952_s8 + $0x10c8] sm:$0xff] }
 0x1a8   : > { %5432 = vmatpush2.bf16.msra.mxu1 %v8539_v47  ;;  %v929_v47 = vld [vmem:[%s9952_s8 + $0x1128] sm:$0xff] }
 0x1a9   : > { %5433 = vmatprep.subr.bf16.mxu1 %v8532_v19  ;;  %v1053_v19 = vld [vmem:[%s9952_s8 + $0x1508] sm:$0xff] }
 0x1aa   : > { %5393 = vmatpush2.bf16.msra.mxu0 %v8403_v56  ;;  %v8747_v56 = vcombine.low %v1061_v31, %v1065_v32  ;;  %v921_v0 = vld [vmem:[%s9952_s8 + $0x10e8] sm:$0xff] }
 0x1ab   : > { %5394 = vmatprep.subr.bf16.mxu0 %v8396_v61  ;;  %v1045_v1 = vld [vmem:[%s9952_s8 + $0x14c8] sm:$0xff] }
 0x1ac   : > { %5434 = vmatpush2.bf16.msra.mxu1 %v8531_v60  ;;  %v8612_v60 = vcombine.high %v925_v46, %v929_v47  ;;  %v1049_v2 = vld [vmem:[%s9952_s8 + $0x14e8] sm:$0xff] }
 0x1ad   : > { %5435 = vmatprep.subr.bf16.mxu1 %v8524_v62  ;;  %v8740_v62 = vcombine.high %v1053_v19, %v1057_v50  ;;  %v909_v10 = vld [vmem:[%s9952_s8 + $0x1088] sm:$0xff] }
 0x1ae   : > { %5395 = vmatpush2.bf16.msra.mxu0 %v8395_v3  ;;  %v8611_v3 = vcombine.low %v925_v46, %v929_v47  ;;  %v913_v11 = vld [vmem:[%s9952_s8 + $0x10a8] sm:$0xff] }
 0x1af   : > { %5396 = vmatprep.subr.bf16.mxu0 %v8388_v8  ;;  %v8604_v8 = vcombine.high %v917_v63, %v921_v0  ;;  %v1037_v12 = vld [vmem:[%s9952_s8 + $0x1488] sm:$0xff] }
 0x1b0   : > { %5436 = vmatpush2.bf16.msra.mxu1 %v8523_v5  ;;  %v8739_v5 = vcombine.low %v1053_v19, %v1057_v50  ;;  %v1041_v13 = vld [vmem:[%s9952_s8 + $0x14a8] sm:$0xff] }
 0x1b1   : > { %5437 = vmatprep.subr.bf16.mxu1 %v8516_v9  ;;  %v8732_v9 = vcombine.high %v1045_v1, %v1049_v2  ;;  %v901_v17 = vld [vmem:[%s9952_s8 + $0x1048] sm:$0xff] }
 0x1b2   : > { %5397 = vmatpush2.bf16.msra.mxu0 %v8387_v14  ;;  %v8603_v14 = vcombine.low %v917_v63, %v921_v0  ;;  %v905_v18 = vld [vmem:[%s9952_s8 + $0x1068] sm:$0xff] }
 0x1b3   : > { %5448 = vmatprep.subr.bf16.mxu0 %v8636_v39  ;;  %v8596_v39 = vcombine.high %v909_v10, %v913_v11  ;;  %v1029_v21 = vld [vmem:[%s9952_s8 + $0x1448] sm:$0xff] }
 0x1b4   : > { %5438 = vmatpush2.bf16.msra.mxu1 %v8515_v37  ;;  %v8731_v37 = vcombine.low %v1045_v1, %v1049_v2  ;;  %v1033_v23 = vld [vmem:[%s9952_s8 + $0x1468] sm:$0xff] }
 0x1b5   : > { %5489 = vmatprep.subr.bf16.mxu1 %v8764_v15  ;;  %v5154_v30 = vpop.f32.mrf.mxu0  ;;  %5399 = vmatmul.mubr.bf16.vlgmr.msra.gmra.mxu0 %v10144_v40  ;;  %v8724_v15 = vcombine.high %v1037_v12, %v1041_v13  ;;  %v1009_v19 = vld [vmem:[%s9952_s8 + $0x13a8] sm:$0xff] }
 0x1b6   : > { %v5155_v33 = vadd.f32 %v5154_v30, %v10310_v57  ;;  %5449 = vmatpush1.bf16.msra.mxu0 %v8635_v24  ;;  %v8748_v57 = vcombine.high %v1061_v31, %v1065_v32  ;;  %5480 = vmatprep.mubr.bf16.mxu0 %v10156_v49  ;;  %v8595_v24 = vcombine.low %v909_v10, %v913_v11  ;;  %v1021_v30 = vld [vmem:[%s9952_s8 + $0x1408] sm:$0xff] }
 0x1b7   : > { %v5195_v34 = vpop.f32.mrf.mxu1  ;;  %5440 = vmatmul.mubr.bf16.vlgmr.msra.gmra.mxu1 %v10148_v41  ;;  %v5156_v36 = vpop.f32.mrf.mxu0  ;;  %5450 = vmatprep.subr.bf16.mxu0 %v8628_v25  ;;  %v8588_v25 = vcombine.high %v901_v17, %v905_v18  ;;  %v1025_v31 = vld [vmem:[%s9952_s8 + $0x1428] sm:$0xff]  ;;  %v8587_v32 = vcombine.low %v901_v17, %v905_v18 }
 0x1b8   : > { %5490 = vmatpush1.bf16.msra.mxu1 %v8763_v53  ;;  %v10383_v43 = vadd.f32 %v5195_v34, %v5155_v33  ;;  %v5157_v44 = vadd.f32 %v5156_v36, %v10318_v4  ;;  %5521 = vmatprep.mubr.bf16.mxu1 %v10161_v22  ;;  %v8619_v4 = vcombine.low %v933_v27, %v937_v54  ;;  %v893_v27 = vld [vmem:[%s9952_s8 + $0x1008] sm:$0xff] }
 0x1b9   : > { %v5197_v45 = vpop.f32.mrf.mxu1  ;;  %5491 = vmatprep.subr.bf16.mxu1 %v8756_v26  ;;  %v5158_v48 = vpop.f32.mrf.mxu0  ;;  %v8723_v53 = vcombine.low %v1037_v12, %v1041_v13  ;;  %v8716_v26 = vcombine.high %v1029_v21, %v1033_v23  ;;  %v897_v54 = vld [vmem:[%s9952_s8 + $0x1028] sm:$0xff]  ;;  %v8715_v33 = vcombine.low %v1029_v21, %v1033_v23 }
 0x1ba   : > { %v10392_v51 = vadd.f32 %v5197_v45, %v5157_v44  ;;  %5451 = vmatpush1.bf16.msra.mxu0 %v8627_v35  ;;  %v8580_v34 = vcombine.high %v893_v27, %v897_v54  ;;  %v8708_v35 = vcombine.high %v1021_v30, %v1025_v31  ;;  %v1013_v36 = vld [vmem:[%s9952_s8 + $0x13c8] sm:$0xff]  ;;  %v8579_v45 = vcombine.low %v893_v27, %v897_v54 }
 0x1bb   : > { %v5199_v52 = vpop.f32.mrf.mxu1  ;;  %v5159_v55 = vpop.f32.mrf.mxu0  ;;  %5452 = vmatprep.subr.bf16.mxu0 %v8620_v42  ;;  %v1141_v42 = vld [vmem:[%s9952_s8 + $0x17c8] sm:$0xff] }
 0x1bc   : > { %5492 = vmatpush1.bf16.msra.mxu1 %v8755_v38  ;;  %v1017_v38 = vld [vmem:[%s9952_s8 + $0x13e8] sm:$0xff] }
 0x1bd   : > { %v5200_v61 = vpop.f32.mrf.mxu1  ;;  %5493 = vmatprep.subr.bf16.mxu1 %v8748_v57  ;;  %v1145_v44 = vld [vmem:[%s9952_s8 + $0x17e8] sm:$0xff]  ;;  %v8707_v57 = vcombine.low %v1021_v30, %v1025_v31  ;;  %v8700_v46 = vcombine.high %v1013_v36, %v1017_v38 }
 0x1be   : > { %5453 = vmatpush1.bf16.msra.mxu0 %v8619_v4  ;;  %v8828_v47 = vcombine.high %v1141_v42, %v1145_v44  ;;  %v1005_v48 = vld [vmem:[%s9952_s8 + $0x1388] sm:$0xff]  ;;  %v8699_v4 = vcombine.low %v1013_v36, %v1017_v38  ;;  %v8827_v55 = vcombine.low %v1141_v42, %v1145_v44 }
 0x1bf   : > { %5454 = vmatprep.subr.bf16.mxu0 %v8612_v60  ;;  %v1133_v50 = vld [vmem:[%s9952_s8 + $0x1788] sm:$0xff]  ;;  %v8691_v1 = vcombine.low %v1005_v48, %v1009_v19 }
 0x1c0   : > { %5494 = vmatpush1.bf16.msra.mxu1 %v8747_v56  ;;  %v1137_v52 = vld [vmem:[%s9952_s8 + $0x17a8] sm:$0xff]  ;;  %v8692_v56 = vcombine.high %v1005_v48, %v1009_v19 }
 0x1c1   : > { %5495 = vmatprep.subr.bf16.mxu1 %v8740_v62  ;;  %v8820_v60 = vcombine.high %v1133_v50, %v1137_v52  ;;  %v997_v61 = vld [vmem:[%s9952_s8 + $0x1348] sm:$0xff]  ;;  %v8819_v2 = vcombine.low %v1133_v50, %v1137_v52 }
 0x1c2   : > { %5455 = vmatpush1.bf16.msra.mxu0 %v8611_v3  ;;  %v1001_v62 = vld [vmem:[%s9952_s8 + $0x1368] sm:$0xff] }
 0x1c3   : > { %5456 = vmatprep.subr.bf16.mxu0 %v8604_v8  ;;  %v1125_v63 = vld [vmem:[%s9952_s8 + $0x1748] sm:$0xff]  ;;  %v8684_v3 = vcombine.high %v997_v61, %v1001_v62  ;;  %v8683_v12 = vcombine.low %v997_v61, %v1001_v62  ;;  %v566_v61 = vld [vmem:[%s9952_s8 + $0x5d0] sm:$0xff] }
 0x1c4   : > { %5496 = vmatpush1.bf16.msra.mxu1 %v8739_v5  ;;  %v1129_v0 = vld [vmem:[%s9952_s8 + $0x1768] sm:$0xff]  ;;  %v570_v62 = vld [vmem:[%s9952_s8 + $0x5f0] sm:$0xff] }
 0x1c5   : > { %5497 = vmatprep.subr.bf16.mxu1 %v8732_v9  ;;  %v8812_v5 = vcombine.high %v1125_v63, %v1129_v0  ;;  %v989_v8 = vld [vmem:[%s9952_s8 + $0x1308] sm:$0xff]  ;;  %v8811_v13 = vcombine.low %v1125_v63, %v1129_v0 }
 0x1c6   : > { %5457 = vmatpush1.bf16.msra.mxu0 %v8603_v14  ;;  %v993_v9 = vld [vmem:[%s9952_s8 + $0x1328] sm:$0xff] }
 0x1c7   : > { %5458 = vmatprep.subr.bf16.mxu0 %v8596_v39  ;;  %v1117_v10 = vld [vmem:[%s9952_s8 + $0x1708] sm:$0xff]  ;;  %v8676_v14 = vcombine.high %v989_v8, %v993_v9  ;;  %v8675_v21 = vcombine.low %v989_v8, %v993_v9  ;;  %v558_v8 = vld [vmem:[%s9952_s8 + $0x590] sm:$0xff] }
 0x1c8   : > { %5498 = vmatpush1.bf16.msra.mxu1 %v8731_v37  ;;  %v1121_v11 = vld [vmem:[%s9952_s8 + $0x1728] sm:$0xff]  ;;  %v562_v9 = vld [vmem:[%s9952_s8 + $0x5b0] sm:$0xff] }
 0x1c9   : > { %5499 = vmatprep.subr.bf16.mxu1 %v8724_v15  ;;  %v8804_v37 = vcombine.high %v1117_v10, %v1121_v11  ;;  %v981_v39 = vld [vmem:[%s9952_s8 + $0x12c8] sm:$0xff]  ;;  %v8803_v23 = vcombine.low %v1117_v10, %v1121_v11  ;;  %v8253_v11 = vcombine.low %v566_v61, %v570_v62 }
 0x1ca   : > { %5459 = vmatpush1.bf16.msra.mxu0 %v8595_v24  ;;  %v985_v15 = vld [vmem:[%s9952_s8 + $0x12e8] sm:$0xff] }
 0x1cb   : > { %5460 = vmatprep.subr.bf16.mxu0 %v8588_v25  ;;  %v1109_v17 = vld [vmem:[%s9952_s8 + $0x16c8] sm:$0xff]  ;;  %v8668_v24 = vcombine.high %v981_v39, %v985_v15  ;;  %v8667_v30 = vcombine.low %v981_v39, %v985_v15  ;;  %v550_v15 = vld [vmem:[%s9952_s8 + $0x550] sm:$0xff] }
 0x1cc   : > { %5500 = vmatpush1.bf16.msra.mxu1 %v8723_v53  ;;  %v1113_v18 = vld [vmem:[%s9952_s8 + $0x16e8] sm:$0xff] }
 0x1cd   : > { %5501 = vmatprep.subr.bf16.mxu1 %v8716_v26  ;;  %v8796_v53 = vcombine.high %v1109_v17, %v1113_v18  ;;  %v973_v25 = vld [vmem:[%s9952_s8 + $0x1288] sm:$0xff]  ;;  %v8795_v31 = vcombine.low %v1109_v17, %v1113_v18  ;;  %v554_v17 = vld [vmem:[%s9952_s8 + $0x570] sm:$0xff] }
 0x1ce   : > { %5461 = vmatpush1.bf16.msra.mxu0 %v8587_v32  ;;  %v977_v26 = vld [vmem:[%s9952_s8 + $0x12a8] sm:$0xff] }
 0x1cf   : > { %5462 = vmatprep.subr.bf16.mxu0 %v8580_v34  ;;  %v1101_v27 = vld [vmem:[%s9952_s8 + $0x1688] sm:$0xff]  ;;  %v8660_v32 = vcombine.high %v973_v25, %v977_v26  ;;  %v8659_v42 = vcombine.low %v973_v25, %v977_v26 }
 0x1d0   : > { %5502 = vmatpush1.bf16.msra.mxu1 %v8715_v33  ;;  %v1105_v54 = vld [vmem:[%s9952_s8 + $0x16a8] sm:$0xff] }
 0x1d1   : > { %5503 = vmatprep.subr.bf16.mxu1 %v8708_v35  ;;  %v8788_v33 = vcombine.high %v1101_v27, %v1105_v54  ;;  %v965_v34 = vld [vmem:[%s9952_s8 + $0x1248] sm:$0xff]  ;;  %v8787_v44 = vcombine.low %v1101_v27, %v1105_v54 }
 0x1d2   : > { %5463 = vmatpush1.bf16.msra.mxu0 %v8579_v45  ;;  %v969_v35 = vld [vmem:[%s9952_s8 + $0x1268] sm:$0xff] }
 0x1d3   : > { %5464 = vmatprep.subr.bf16.mxu0 %v8700_v46  ;;  %v1093_v36 = vld [vmem:[%s9952_s8 + $0x1648] sm:$0xff]  ;;  %v8652_v45 = vcombine.high %v965_v34, %v969_v35  ;;  %v8651_v50 = vcombine.low %v965_v34, %v969_v35  ;;  %v546_v34 = vld [vmem:[%s9952_s8 + $0x530] sm:$0xff] }
 0x1d4   : > { %5504 = vmatpush1.bf16.msra.mxu1 %v8707_v57  ;;  %v1097_v38 = vld [vmem:[%s9952_s8 + $0x1668] sm:$0xff] }
 0x1d5   : > { %5505 = vmatprep.subr.bf16.mxu1 %v8828_v47  ;;  %v8780_v57 = vcombine.high %v1093_v36, %v1097_v38  ;;  %v957_v46 = vld [vmem:[%s9952_s8 + $0x1208] sm:$0xff]  ;;  %v8779_v52 = vcombine.low %v1093_v36, %v1097_v38 }
 0x1d6   : > { %5465 = vmatpush2.bf16.msra.mxu0 %v8699_v4  ;;  %v961_v47 = vld [vmem:[%s9952_s8 + $0x1228] sm:$0xff] }
 0x1d7   : > { %5466 = vmatprep.subr.bf16.mxu0 %v8692_v56  ;;  %v1085_v48 = vld [vmem:[%s9952_s8 + $0x1608] sm:$0xff]  ;;  %v8644_v4 = vcombine.high %v957_v46, %v961_v47  ;;  %v438_v56 = vld [vmem:[%s9952_s8 + $0x1d0] sm:$0xff]  ;;  %v8643_v63 = vcombine.low %v957_v46, %v961_v47 }
 0x1d8   : > { %5506 = vmatpush2.bf16.msra.mxu1 %v8827_v55  ;;  %v1089_v19 = vld [vmem:[%s9952_s8 + $0x1628] sm:$0xff]  ;;  %v406_v46 = vld [vmem:[%s9952_s8 + $0xd0] sm:$0xff] }
 0x1d9   : > { %5507 = vmatprep.subr.bf16.mxu1 %v8820_v60  ;;  %v8772_v55 = vcombine.high %v1085_v48, %v1089_v19  ;;  %v442_v60 = vld [vmem:[%s9952_s8 + $0x1f0] sm:$0xff]  ;;  %v8771_v0 = vcombine.low %v1085_v48, %v1089_v19 }
 0x1da   : > { %5467 = vmatpush2.bf16.msra.mxu0 %v8691_v1  ;;  %v8126_v1 = vcombine.high %v438_v56, %v442_v60  ;;  %v8125_v10 = vcombine.low %v438_v56, %v442_v60  ;;  %v410_v47 = vld [vmem:[%s9952_s8 + $0xf0] sm:$0xff] }
 0x1db   : > { %5468 = vmatprep.subr.bf16.mxu0 %v8684_v3  ;;  %v430_v3 = vld [vmem:[%s9952_s8 + $0x190] sm:$0xff] }
 0x1dc   : > { %5508 = vmatpush2.bf16.msra.mxu1 %v8819_v2  ;;  %v8254_v2 = vcombine.high %v566_v61, %v570_v62  ;;  %v534_v48 = vld [vmem:[%s9952_s8 + $0x4d0] sm:$0xff] }
 0x1dd   : > { %5509 = vmatprep.subr.bf16.mxu1 %v8812_v5  ;;  %v434_v5 = vld [vmem:[%s9952_s8 + $0x1b0] sm:$0xff] }
 0x1de   : > { %5469 = vmatpush2.bf16.msra.mxu0 %v8683_v12  ;;  %v8118_v12 = vcombine.high %v430_v3, %v434_v5  ;;  %v538_v19 = vld [vmem:[%s9952_s8 + $0x4f0] sm:$0xff] }
 0x1df   : > { %5470 = vmatprep.subr.bf16.mxu0 %v8676_v14  ;;  %v422_v14 = vld [vmem:[%s9952_s8 + $0x150] sm:$0xff] }
 0x1e0   : > { %5510 = vmatpush2.bf16.msra.mxu1 %v8811_v13  ;;  %v8246_v13 = vcombine.high %v558_v8, %v562_v9  ;;  %v398_v56 = vld [vmem:[%s9952_s8 + $0x90] sm:$0xff] }
 0x1e1   : > { %5511 = vmatprep.subr.bf16.mxu1 %v8804_v37  ;;  %v426_v37 = vld [vmem:[%s9952_s8 + $0x170] sm:$0xff] }
 0x1e2   : > { %5471 = vmatpush2.bf16.msra.mxu0 %v8675_v21  ;;  %v8110_v25 = vcombine.high %v422_v14, %v426_v37  ;;  %v402_v60 = vld [vmem:[%s9952_s8 + $0xb0] sm:$0xff] }
 0x1e3   : > { %5472 = vmatprep.subr.bf16.mxu0 %v8668_v24  ;;  %v526_v61 = vld [vmem:[%s9952_s8 + $0x490] sm:$0xff] }
 0x1e4   : > { %5512 = vmatpush2.bf16.msra.mxu1 %v8803_v23  ;;  %v8117_v23 = vcombine.low %v430_v3, %v434_v5  ;;  %v530_v62 = vld [vmem:[%s9952_s8 + $0x4b0] sm:$0xff] }
 0x1e5   : > { %5513 = vmatprep.subr.bf16.mxu1 %v8796_v53  ;;  %v8245_v53 = vcombine.low %v558_v8, %v562_v9  ;;  %v390_v3 = vld [vmem:[%s9952_s8 + $0x50] sm:$0xff] }
 0x1e6   : > { %5473 = vmatpush2.bf16.msra.mxu0 %v8667_v30  ;;  %v414_v30 = vld [vmem:[%s9952_s8 + $0x110] sm:$0xff] }
 0x1e7   : > { %5474 = vmatprep.subr.bf16.mxu0 %v8660_v32  ;;  %v394_v5 = vld [vmem:[%s9952_s8 + $0x70] sm:$0xff] }
 0x1e8   : > { %5514 = vmatpush2.bf16.msra.mxu1 %v8795_v31  ;;  %v418_v31 = vld [vmem:[%s9952_s8 + $0x130] sm:$0xff] }
 0x1e9   : > { %5515 = vmatprep.subr.bf16.mxu1 %v8788_v33  ;;  %v542_v33 = vld [vmem:[%s9952_s8 + $0x510] sm:$0xff] }
 0x1ea   : > { %5475 = vmatpush2.bf16.msra.mxu0 %v8659_v42  ;;  %v8237_v42 = vcombine.low %v550_v15, %v554_v17  ;;  %v518_v8 = vld [vmem:[%s9952_s8 + $0x450] sm:$0xff] }
 0x1eb   : > { %5476 = vmatprep.subr.bf16.mxu0 %v8652_v45  ;;  %v522_v9 = vld [vmem:[%s9952_s8 + $0x470] sm:$0xff] }
 0x1ec   : > { %5516 = vmatpush2.bf16.msra.mxu1 %v8787_v44  ;;  %v8102_v44 = vcombine.high %v414_v30, %v418_v31 }
 0x1ed   : > { %5517 = vmatprep.subr.bf16.mxu1 %v8780_v57  ;;  %v8230_v57 = vcombine.high %v542_v33, %v546_v34 }
 0x1ee   : > { %5477 = vmatpush2.bf16.msra.mxu0 %v8651_v50  ;;  %v8101_v50 = vcombine.low %v414_v30, %v418_v31 }
 0x1ef   : > { %5478 = vmatprep.subr.bf16.mxu0 %v8644_v4  ;;  %v8094_v4 = vcombine.high %v406_v46, %v410_v47 }
 0x1f0   : > { %5518 = vmatpush2.bf16.msra.mxu1 %v8779_v52  ;;  %v8229_v52 = vcombine.low %v542_v33, %v546_v34  ;;  %v498_v33 = vld [vmem:[%s9952_s8 + $0x3b0] sm:$0xff] }
 0x1f1   : > { %5519 = vmatprep.subr.bf16.mxu1 %v8772_v55  ;;  %v8222_v55 = vcombine.high %v534_v48, %v538_v19  ;;  %v622_v34 = vld [vmem:[%s9952_s8 + $0x790] sm:$0xff] }
 0x1f2   : > { %5479 = vmatpush2.bf16.msra.mxu0 %v8643_v63  ;;  %v8093_v63 = vcombine.low %v406_v46, %v410_v47  ;;  %v614_v46 = vld [vmem:[%s9952_s8 + $0x750] sm:$0xff] }
 0x1f3   : > { %5530 = vmatprep.subr.bf16.mxu0 %v8126_v1  ;;  %v8086_v1 = vcombine.high %v398_v56, %v402_v60  ;;  %v618_v47 = vld [vmem:[%s9952_s8 + $0x770] sm:$0xff] }
 0x1f4   : > { %5520 = vmatpush2.bf16.msra.mxu1 %v8771_v0  ;;  %v8221_v0 = vcombine.low %v534_v48, %v538_v19 }
 0x1f5   : > { %5571 = vmatprep.subr.bf16.mxu1 %v8254_v2  ;;  %v5236_v39 = vpop.f32.mrf.mxu0  ;;  %5481 = vmatmul.mubr.bf16.vlgmr.msra.gmra.mxu0 %v10228_v6  ;;  %v8214_v2 = vcombine.high %v526_v61, %v530_v62 }
 0x1f6   : > { %v5237_v18 = vadd.f32 %v5236_v39, %v10383_v43  ;;  %5531 = vmatpush1.bf16.msra.mxu0 %v8125_v10  ;;  %v8238_v43 = vcombine.high %v550_v15, %v554_v17  ;;  %5562 = vmatprep.mubr.bf16.mxu0 %v10000_v58  ;;  %v8085_v10 = vcombine.low %v398_v56, %v402_v60  ;;  %v510_v39 = vld [vmem:[%s9952_s8 + $0x410] sm:$0xff] }
 0x1f7   : > { %v5277_v21 = vpop.f32.mrf.mxu1  ;;  %5522 = vmatmul.mubr.bf16.vlgmr.msra.gmra.mxu1 %v10232_v7  ;;  %v5238_v24 = vpop.f32.mrf.mxu0  ;;  %5532 = vmatprep.subr.bf16.mxu0 %v8118_v12  ;;  %v8078_v12 = vcombine.high %v390_v3, %v394_v5  ;;  %v514_v15 = vld [vmem:[%s9952_s8 + $0x430] sm:$0xff]  ;;  %v8077_v17 = vcombine.low %v390_v3, %v394_v5 }
 0x1f8   : > { %5572 = vmatpush1.bf16.msra.mxu1 %v8253_v11  ;;  %v10457_v26 = vadd.f32 %v5277_v21, %v5237_v18  ;;  %v5239_v27 = vadd.f32 %v5238_v24, %v10392_v51  ;;  %5603 = vmatprep.mubr.bf16.mxu1 %v10004_v59  ;;  %v8109_v51 = vcombine.low %v422_v14, %v426_v37  ;;  %v382_v14 = vld [vmem:[%s9952_s8 + $0x10] sm:$0xff] }
 0x1f9   : > { %v5279_v54 = vpop.f32.mrf.mxu1  ;;  %5573 = vmatprep.subr.bf16.mxu1 %v8246_v13  ;;  %v5240_v32 = vpop.f32.mrf.mxu0  ;;  %v8213_v11 = vcombine.low %v526_v61, %v530_v62  ;;  %v8206_v13 = vcombine.high %v518_v8, %v522_v9  ;;  %v386_v37 = vld [vmem:[%s9952_s8 + $0x30] sm:$0xff]  ;;  %v8205_v18 = vcombine.low %v518_v8, %v522_v9  ;;  %v8301_v62 = vcombine.low %v614_v46, %v618_v47 }
 0x1fa   : > { %v10466_v35 = vadd.f32 %v5279_v54, %v5239_v27  ;;  %5533 = vmatpush1.bf16.msra.mxu0 %v8117_v23  ;;  %v8070_v21 = vcombine.high %v382_v14, %v386_v37  ;;  %v8198_v23 = vcombine.high %v510_v39, %v514_v15  ;;  %v502_v24 = vld [vmem:[%s9952_s8 + $0x3d0] sm:$0xff]  ;;  %v8069_v54 = vcombine.low %v382_v14, %v386_v37 }
 0x1fb   : > { %v5281_v36 = vpop.f32.mrf.mxu1  ;;  %v5241_v38 = vpop.f32.mrf.mxu0  ;;  %5534 = vmatprep.subr.bf16.mxu0 %v8110_v25  ;;  %v630_v25 = vld [vmem:[%s9952_s8 + $0x7d0] sm:$0xff] }
 0x1fc   : > { %5574 = vmatpush1.bf16.msra.mxu1 %v8245_v53  ;;  %v506_v53 = vld [vmem:[%s9952_s8 + $0x3f0] sm:$0xff] }
 0x1fd   : > { %v5282_v45 = vpop.f32.mrf.mxu1  ;;  %5575 = vmatprep.subr.bf16.mxu1 %v8238_v43  ;;  %v634_v27 = vld [vmem:[%s9952_s8 + $0x7f0] sm:$0xff]  ;;  %v8197_v43 = vcombine.low %v510_v39, %v514_v15  ;;  %v8190_v30 = vcombine.high %v502_v24, %v506_v53 }
 0x1fe   : > { %5535 = vmatpush1.bf16.msra.mxu0 %v8109_v51  ;;  %v8318_v31 = vcombine.high %v630_v25, %v634_v27  ;;  %v494_v32 = vld [vmem:[%s9952_s8 + $0x390] sm:$0xff]  ;;  %v8189_v51 = vcombine.low %v502_v24, %v506_v53  ;;  %v8317_v38 = vcombine.low %v630_v25, %v634_v27 }
 0x1ff   : > { %5536 = vmatprep.subr.bf16.mxu0 %v8102_v44  ;;  %v626_v36 = vld [vmem:[%s9952_s8 + $0x7b0] sm:$0xff]  ;;  %v8181_v48 = vcombine.low %v494_v32, %v498_v33 }
 0x200   : > { %5576 = vmatpush1.bf16.msra.mxu1 %v8237_v42  ;;  %v8182_v42 = vcombine.high %v494_v32, %v498_v33  ;;  %v8310_v44 = vcombine.high %v622_v34, %v626_v36  ;;  %v486_v45 = vld [vmem:[%s9952_s8 + $0x350] sm:$0xff]  ;;  %v8309_v19 = vcombine.low %v622_v34, %v626_v36 }
 0x201   : > { %5577 = vmatprep.subr.bf16.mxu1 %v8230_v57  ;;  %v490_v57 = vld [vmem:[%s9952_s8 + $0x370] sm:$0xff] }
 0x202   : > { %5537 = vmatpush1.bf16.msra.mxu0 %v8101_v50  ;;  %v8174_v50 = vcombine.high %v486_v45, %v490_v57  ;;  %v606_v56 = vld [vmem:[%s9952_s8 + $0x710] sm:$0xff]  ;;  %v8173_v61 = vcombine.low %v486_v45, %v490_v57 }
 0x203   : > { %5538 = vmatprep.subr.bf16.mxu0 %v8094_v4  ;;  %v478_v4 = vld [vmem:[%s9952_s8 + $0x310] sm:$0xff] }
 0x204   : > { %5578 = vmatpush1.bf16.msra.mxu1 %v8229_v52  ;;  %v8302_v52 = vcombine.high %v614_v46, %v618_v47  ;;  %v610_v60 = vld [vmem:[%s9952_s8 + $0x730] sm:$0xff] }
 0x205   : > { %5579 = vmatprep.subr.bf16.mxu1 %v8222_v55  ;;  %v482_v55 = vld [vmem:[%s9952_s8 + $0x330] sm:$0xff]  ;;  %v8293_v9 = vcombine.low %v606_v56, %v610_v60 }
 0x206   : > { %5539 = vmatpush1.bf16.msra.mxu0 %v8093_v63  ;;  %v8166_v63 = vcombine.high %v478_v4, %v482_v55  ;;  %v598_v3 = vld [vmem:[%s9952_s8 + $0x6d0] sm:$0xff]  ;;  %v8165_v8 = vcombine.low %v478_v4, %v482_v55 }
 0x207   : > { %5540 = vmatprep.subr.bf16.mxu0 %v8086_v1  ;;  %v470_v1 = vld [vmem:[%s9952_s8 + $0x2d0] sm:$0xff] }
 0x208   : > { %5580 = vmatpush1.bf16.msra.mxu1 %v8221_v0  ;;  %v8294_v0 = vcombine.high %v606_v56, %v610_v60  ;;  %v602_v5 = vld [vmem:[%s9952_s8 + $0x6f0] sm:$0xff] }
 0x209   : > { %5581 = vmatprep.subr.bf16.mxu1 %v8214_v2  ;;  %v474_v2 = vld [vmem:[%s9952_s8 + $0x2f0] sm:$0xff]  ;;  %v8285_v15 = vcombine.low %v598_v3, %v602_v5 }
 0x20a   : > { %5541 = vmatpush1.bf16.msra.mxu0 %v8085_v10  ;;  %v8158_v10 = vcombine.high %v470_v1, %v474_v2  ;;  %v590_v14 = vld [vmem:[%s9952_s8 + $0x690] sm:$0xff]  ;;  %v8157_v39 = vcombine.low %v470_v1, %v474_v2 }
 0x20b   : > { %5542 = vmatprep.subr.bf16.mxu0 %v8078_v12  ;;  %v462_v12 = vld [vmem:[%s9952_s8 + $0x290] sm:$0xff] }
 0x20c   : > { %5582 = vmatpush1.bf16.msra.mxu1 %v8213_v11  ;;  %v8286_v11 = vcombine.high %v598_v3, %v602_v5  ;;  %v594_v37 = vld [vmem:[%s9952_s8 + $0x6b0] sm:$0xff]  ;;  %v1151_v3 = vld [vmem:[%s9946_s16 + $0x18] sm:$0xff] }
 0x20d   : > { %5583 = vmatprep.subr.bf16.mxu1 %v8206_v13  ;;  %v466_v13 = vld [vmem:[%s9952_s8 + $0x2b0] sm:$0xff]  ;;  %v8277_v27 = vcombine.low %v590_v14, %v594_v37 }
 0x20e   : > { %5543 = vmatpush1.bf16.msra.mxu0 %v8077_v17  ;;  %v8150_v17 = vcombine.high %v462_v12, %v466_v13  ;;  %v582_v24 = vld [vmem:[%s9952_s8 + $0x650] sm:$0xff]  ;;  %v8149_v25 = vcombine.low %v462_v12, %v466_v13 }
 0x20f   : > { %5544 = vmatprep.subr.bf16.mxu0 %v8070_v21  ;;  %v454_v21 = vld [vmem:[%s9952_s8 + $0x250] sm:$0xff] }
 0x210   : > { %5584 = vmatpush1.bf16.msra.mxu1 %v8205_v18  ;;  %v8278_v18 = vcombine.high %v590_v14, %v594_v37  ;;  %v586_v53 = vld [vmem:[%s9952_s8 + $0x670] sm:$0xff] }
 0x211   : > { %5585 = vmatprep.subr.bf16.mxu1 %v8198_v23  ;;  %v458_v23 = vld [vmem:[%s9952_s8 + $0x270] sm:$0xff]  ;;  %v8269_v36 = vcombine.low %v582_v24, %v586_v53 }
 0x212   : > { %5545 = vmatpush1.bf16.msra.mxu0 %v8069_v54  ;;  %v8142_v54 = vcombine.high %v454_v21, %v458_v23  ;;  %v574_v32 = vld [vmem:[%s9952_s8 + $0x610] sm:$0xff]  ;;  %v8141_v34 = vcombine.low %v454_v21, %v458_v23 }
 0x213   : > { %5546 = vmatprep.subr.bf16.mxu0 %v8190_v30  ;;  %v446_v30 = vld [vmem:[%s9952_s8 + $0x210] sm:$0xff] }
 0x214   : > { %5586 = vmatpush1.bf16.msra.mxu1 %v8197_v43  ;;  %v8270_v43 = vcombine.high %v582_v24, %v586_v53  ;;  %v578_v33 = vld [vmem:[%s9952_s8 + $0x630] sm:$0xff] }
 0x215   : > { %5587 = vmatprep.subr.bf16.mxu1 %v8318_v31  ;;  %v450_v31 = vld [vmem:[%s9952_s8 + $0x230] sm:$0xff]  ;;  %v8261_v47 = vcombine.low %v574_v32, %v578_v33 }
 0x216   : > { %5547 = vmatpush2.bf16.msra.mxu0 %v8189_v51  ;;  %v8134_v51 = vcombine.high %v446_v30, %v450_v31  ;;  %v822_v45 = vld [vmem:[%s9952_s8 + $0xdd0] sm:$0xff]  ;;  %v8133_v46 = vcombine.low %v446_v30, %v450_v31 }
 0x217   : > { %5548 = vmatprep.subr.bf16.mxu0 %v8182_v42  ;;  %v694_v42 = vld [vmem:[%s9952_s8 + $0x9d0] sm:$0xff] }
 0x218   : > { %5588 = vmatpush2.bf16.msra.mxu1 %v8317_v38  ;;  %v8262_v38 = vcombine.high %v574_v32, %v578_v33  ;;  %v826_v57 = vld [vmem:[%s9952_s8 + $0xdf0] sm:$0xff] }
 0x219   : > { %5589 = vmatprep.subr.bf16.mxu1 %v8310_v44  ;;  %v698_v44 = vld [vmem:[%s9952_s8 + $0x9f0] sm:$0xff] }
 0x21a   : > { %5549 = vmatpush2.bf16.msra.mxu0 %v8181_v48  ;;  %v8382_v48 = vcombine.high %v694_v42, %v698_v44  ;;  %v814_v4 = vld [vmem:[%s9952_s8 + $0xd90] sm:$0xff]  ;;  %v8381_v56 = vcombine.low %v694_v42, %v698_v44 }
 0x21b   : > { %5550 = vmatprep.subr.bf16.mxu0 %v8174_v50  ;;  %v686_v50 = vld [vmem:[%s9952_s8 + $0x990] sm:$0xff] }
 0x21c   : > { %5590 = vmatpush2.bf16.msra.mxu1 %v8309_v19  ;;  %v8510_v19 = vcombine.high %v822_v45, %v826_v57  ;;  %v818_v55 = vld [vmem:[%s9952_s8 + $0xdb0] sm:$0xff] }
 0x21d   : > { %5591 = vmatprep.subr.bf16.mxu1 %v8302_v52  ;;  %v690_v52 = vld [vmem:[%s9952_s8 + $0x9b0] sm:$0xff]  ;;  %v8501_v13 = vcombine.low %v814_v4, %v818_v55 }
 0x21e   : > { %5551 = vmatpush2.bf16.msra.mxu0 %v8173_v61  ;;  %v1150_v60 = vld [vmem:[%s9946_s16 + $0x10] sm:$0xff]  ;;  %v8509_v61 = vcombine.low %v822_v45, %v826_v57 }
 0x21f   : > { %5552 = vmatprep.subr.bf16.mxu0 %v8166_v63  ;;  %v8502_v63 = vcombine.high %v814_v4, %v818_v55  ;;  %v682_v1 = vld [vmem:[%s9952_s8 + $0x970] sm:$0xff] }
 0x220   : > { %5592 = vmatpush2.bf16.msra.mxu1 %v8301_v62  ;;  %v8374_v62 = vcombine.high %v686_v50, %v690_v52  ;;  %v806_v5 = vld [vmem:[%s9952_s8 + $0xd50] sm:$0xff] }
 0x221   : > { %5593 = vmatprep.subr.bf16.mxu1 %v8294_v0  ;;  %v678_v0 = vld [vmem:[%s9952_s8 + $0x950] sm:$0xff] }
 0x222   : > { %5553 = vmatpush2.bf16.msra.mxu0 %v8165_v8  ;;  %v810_v8 = vld [vmem:[%s9952_s8 + $0xd70] sm:$0xff]  ;;  %v8366_v14 = vcombine.high %v678_v0, %v682_v1 }
 0x223   : > { %5554 = vmatprep.subr.bf16.mxu0 %v8158_v10  ;;  %v674_v21 = vld [vmem:[%s9952_s8 + $0x930] sm:$0xff]  ;;  %v8493_v30 = vcombine.low %v806_v5, %v810_v8 }
 0x224   : > { %5594 = vmatpush2.bf16.msra.mxu1 %v8293_v9  ;;  %v798_v24 = vld [vmem:[%s9952_s8 + $0xd10] sm:$0xff] }
 0x225   : > { %5595 = vmatprep.subr.bf16.mxu1 %v8286_v11  ;;  %v8373_v11 = vcombine.low %v686_v50, %v690_v52  ;;  %v802_v53 = vld [vmem:[%s9952_s8 + $0xd30] sm:$0xff] }
 0x226   : > { %5555 = vmatpush2.bf16.msra.mxu0 %v8157_v39  ;;  %v8486_v33 = vcombine.high %v798_v24, %v802_v53  ;;  %v8485_v44 = vcombine.low %v798_v24, %v802_v53  ;;  %v750_v53 = vld [vmem:[%s9952_s8 + $0xb90] sm:$0xff] }
 0x227   : > { %5556 = vmatprep.subr.bf16.mxu0 %v8150_v17  ;;  %v8494_v17 = vcombine.high %v806_v5, %v810_v8  ;;  %v642_v5 = vld [vmem:[%s9952_s8 + $0x830] sm:$0xff] }
 0x228   : > { %5596 = vmatpush2.bf16.msra.mxu1 %v8285_v15  ;;  %v766_v8 = vld [vmem:[%s9952_s8 + $0xc10] sm:$0xff] }
 0x229   : > { %5597 = vmatprep.subr.bf16.mxu1 %v8278_v18  ;;  %v670_v18 = vld [vmem:[%s9952_s8 + $0x910] sm:$0xff] }
 0x22a   : > { %5557 = vmatpush2.bf16.msra.mxu0 %v8149_v25  ;;  %v8358_v31 = vcombine.high %v670_v18, %v674_v21  ;;  %v8357_v42 = vcombine.low %v670_v18, %v674_v21 }
 0x22b   : > { %5558 = vmatprep.subr.bf16.mxu0 %v8142_v54  ;;  %v8365_v54 = vcombine.low %v678_v0, %v682_v1 }
 0x22c   : > { %5598 = vmatpush2.bf16.msra.mxu1 %v8277_v27 }
 0x22d   : > { %5599 = vmatprep.subr.bf16.mxu1 %v8270_v43 }
 0x22e   : > { %5559 = vmatpush2.bf16.msra.mxu0 %v8141_v34  ;;  %v662_v34 = vld [vmem:[%s9952_s8 + $0x8d0] sm:$0xff] }
 0x22f   : > { %5560 = vmatprep.subr.bf16.mxu0 %v8134_v51  ;;  %v790_v51 = vld [vmem:[%s9952_s8 + $0xcd0] sm:$0xff] }
 0x230   : > { %5600 = vmatpush2.bf16.msra.mxu1 %v8269_v36  ;;  %v666_v36 = vld [vmem:[%s9952_s8 + $0x8f0] sm:$0xff] }
 0x231   : > { %5601 = vmatprep.subr.bf16.mxu1 %v8262_v38  ;;  %v794_v38 = vld [vmem:[%s9952_s8 + $0xcf0] sm:$0xff]  ;;  %v8350_v45 = vcombine.high %v662_v34, %v666_v36  ;;  %v8349_v50 = vcombine.low %v662_v34, %v666_v36 }
 0x232   : > { %5561 = vmatpush2.bf16.msra.mxu0 %v8133_v46  ;;  %v8478_v57 = vcombine.high %v790_v51, %v794_v38  ;;  %v654_v46 = vld [vmem:[%s9952_s8 + $0x890] sm:$0xff]  ;;  %v8477_v52 = vcombine.low %v790_v51, %v794_v38 }
 0x233   : > { %5612 = vmatprep.subr.bf16.mxu0 %v8382_v48  ;;  %v782_v48 = vld [vmem:[%s9952_s8 + $0xc90] sm:$0xff] }
 0x234   : > { %5602 = vmatpush2.bf16.msra.mxu1 %v8261_v47  ;;  %v658_v47 = vld [vmem:[%s9952_s8 + $0x8b0] sm:$0xff] }
 0x235   : > { %5653 = vmatprep.subr.bf16.mxu1 %v8510_v19  ;;  %v5318_v2 = vpop.f32.mrf.mxu0  ;;  %5563 = vmatmul.mubr.bf16.vlgmr.msra.gmra.mxu0 %v10050_v16  ;;  %v786_v19 = vld [vmem:[%s9952_s8 + $0xcb0] sm:$0xff]  ;;  %v8342_v4 = vcombine.high %v654_v46, %v658_v47 }
 0x236   : > { %v5319_v9 = vadd.f32 %v5318_v2, %v1150_v60  ;;  %5613 = vmatpush1.bf16.msra.mxu0 %v8381_v56  ;;  %5644 = vmatprep.mubr.bf16.mxu0 %v10067_v28  ;;  %v8470_v55 = vcombine.high %v782_v48, %v786_v19  ;;  %v646_v56 = vld [vmem:[%s9952_s8 + $0x850] sm:$0xff]  ;;  %v8469_v0 = vcombine.low %v782_v48, %v786_v19 }
 0x237   : > { %v5359_v10 = vpop.f32.mrf.mxu1  ;;  %5604 = vmatmul.mubr.bf16.vlgmr.msra.gmra.mxu1 %v10058_v20  ;;  %v5320_v12 = vpop.f32.mrf.mxu0  ;;  %5614 = vmatprep.subr.bf16.mxu0 %v8374_v62  ;;  %v650_v60 = vld [vmem:[%s9952_s8 + $0x870] sm:$0xff] }
 0x238   : > { %5654 = vmatpush1.bf16.msra.mxu1 %v8509_v61  ;;  %v10532_v37 = vadd.f32 %v5359_v10, %v5319_v9  ;;  %v5321_v39 = vadd.f32 %v5320_v12, %v1151_v3  ;;  %5685 = vmatprep.mubr.bf16.mxu1 %v10073_v29  ;;  %v774_v61 = vld [vmem:[%s9952_s8 + $0xc50] sm:$0xff]  ;;  %v8334_v1 = vcombine.high %v646_v56, %v650_v60 }
 0x239   : > { %v5361_v15 = vpop.f32.mrf.mxu1  ;;  %5655 = vmatprep.subr.bf16.mxu1 %v8502_v63  ;;  %v5322_v23 = vpop.f32.mrf.mxu0  ;;  %v778_v62 = vld [vmem:[%s9952_s8 + $0xc70] sm:$0xff]  ;;  %v8341_v63 = vcombine.low %v654_v46, %v658_v47  ;;  %v8333_v10 = vcombine.low %v646_v56, %v650_v60 }
 0x23a   : > { %v10540_v25 = vadd.f32 %v5361_v15, %v5321_v39  ;;  %5615 = vmatpush1.bf16.msra.mxu0 %v8373_v11  ;;  %v8462_v2 = vcombine.high %v774_v61, %v778_v62  ;;  %v638_v3 = vld [vmem:[%s9952_s8 + $0x810] sm:$0xff]  ;;  %v8461_v11 = vcombine.low %v774_v61, %v778_v62 }
 0x23b   : > { %v5363_v27 = vpop.f32.mrf.mxu1  ;;  %v5323_v43 = vpop.f32.mrf.mxu0  ;;  %5616 = vmatprep.subr.bf16.mxu0 %v8366_v14  ;;  %v770_v9 = vld [vmem:[%s9952_s8 + $0xc30] sm:$0xff]  ;;  %v8326_v12 = vcombine.high %v638_v3, %v642_v5  ;;  %v8325_v18 = vcombine.low %v638_v3, %v642_v5 }
 0x23c   : > { %5656 = vmatpush1.bf16.msra.mxu1 %v8501_v13  ;;  %v8454_v13 = vcombine.high %v766_v8, %v770_v9  ;;  %v758_v14 = vld [vmem:[%s9952_s8 + $0xbd0] sm:$0xff]  ;;  %v8453_v21 = vcombine.low %v766_v8, %v770_v9 }
 0x23d   : > { %v5364_v32 = vpop.f32.mrf.mxu1  ;;  %5657 = vmatprep.subr.bf16.mxu1 %v8494_v17  ;;  %v762_v39 = vld [vmem:[%s9952_s8 + $0xbf0] sm:$0xff] }
 0x23e   : > { %5617 = vmatpush1.bf16.msra.mxu0 %v8365_v54  ;;  %v886_v15 = vld [vmem:[%s9952_s8 + $0xfd0] sm:$0xff]  ;;  %v8446_v23 = vcombine.high %v758_v14, %v762_v39 }
 0x23f   : > { %5618 = vmatprep.subr.bf16.mxu0 %v8358_v31  ;;  %v890_v17 = vld [vmem:[%s9952_s8 + $0xff0] sm:$0xff] }
 0x240   : > { %5658 = vmatpush1.bf16.msra.mxu1 %v8493_v30  ;;  %v8574_v24 = vcombine.high %v886_v15, %v890_v17  ;;  %v754_v27 = vld [vmem:[%s9952_s8 + $0xbb0] sm:$0xff]  ;;  %v8445_v30 = vcombine.low %v758_v14, %v762_v39  ;;  %v8573_v31 = vcombine.low %v886_v15, %v890_v17 }
 0x241   : > { %5659 = vmatprep.subr.bf16.mxu1 %v8486_v33  ;;  %v878_v54 = vld [vmem:[%s9952_s8 + $0xf90] sm:$0xff]  ;;  %v8438_v32 = vcombine.high %v750_v53, %v754_v27 }
 0x242   : > { %5619 = vmatpush1.bf16.msra.mxu0 %v8357_v42  ;;  %v882_v43 = vld [vmem:[%s9952_s8 + $0xfb0] sm:$0xff]  ;;  %v8437_v42 = vcombine.low %v750_v53, %v754_v27 }
 0x243   : > { %5620 = vmatprep.subr.bf16.mxu0 %v8350_v45  ;;  %v8566_v33 = vcombine.high %v878_v54, %v882_v43  ;;  %v742_v34 = vld [vmem:[%s9952_s8 + $0xb50] sm:$0xff] }
 0x244   : > { %5660 = vmatpush1.bf16.msra.mxu1 %v8485_v44  ;;  %v746_v36 = vld [vmem:[%s9952_s8 + $0xb70] sm:$0xff]  ;;  %v8565_v44 = vcombine.low %v878_v54, %v882_v43 }
 0x245   : > { %5661 = vmatprep.subr.bf16.mxu1 %v8478_v57  ;;  %v870_v51 = vld [vmem:[%s9952_s8 + $0xf50] sm:$0xff]  ;;  %v8430_v45 = vcombine.high %v742_v34, %v746_v36 }
 0x246   : > { %5621 = vmatpush1.bf16.msra.mxu0 %v8349_v50  ;;  %v874_v38 = vld [vmem:[%s9952_s8 + $0xf70] sm:$0xff]  ;;  %v8429_v50 = vcombine.low %v742_v34, %v746_v36 }
 0x247   : > { %5622 = vmatprep.subr.bf16.mxu0 %v8342_v4  ;;  %v8558_v57 = vcombine.high %v870_v51, %v874_v38  ;;  %v734_v46 = vld [vmem:[%s9952_s8 + $0xb10] sm:$0xff] }
 0x248   : > { %5662 = vmatpush1.bf16.msra.mxu1 %v8477_v52  ;;  %v738_v47 = vld [vmem:[%s9952_s8 + $0xb30] sm:$0xff]  ;;  %v8557_v52 = vcombine.low %v870_v51, %v874_v38 }
 0x249   : > { %5663 = vmatprep.subr.bf16.mxu1 %v8470_v55  ;;  %v862_v48 = vld [vmem:[%s9952_s8 + $0xf10] sm:$0xff]  ;;  %v8422_v4 = vcombine.high %v734_v46, %v738_v47 }
 0x24a   : > { %5623 = vmatpush1.bf16.msra.mxu0 %v8341_v63  ;;  %v866_v19 = vld [vmem:[%s9952_s8 + $0xf30] sm:$0xff]  ;;  %v8421_v63 = vcombine.low %v734_v46, %v738_v47 }
 0x24b   : > { %5624 = vmatprep.subr.bf16.mxu0 %v8334_v1  ;;  %v8550_v55 = vcombine.high %v862_v48, %v866_v19  ;;  %v726_v56 = vld [vmem:[%s9952_s8 + $0xad0] sm:$0xff] }
 0x24c   : > { %5664 = vmatpush1.bf16.msra.mxu1 %v8469_v0  ;;  %v730_v60 = vld [vmem:[%s9952_s8 + $0xaf0] sm:$0xff]  ;;  %v8549_v0 = vcombine.low %v862_v48, %v866_v19 }
 0x24d   : > { %5665 = vmatprep.subr.bf16.mxu1 %v8462_v2  ;;  %v854_v61 = vld [vmem:[%s9952_s8 + $0xed0] sm:$0xff]  ;;  %v8414_v1 = vcombine.high %v726_v56, %v730_v60 }
 0x24e   : > { %5625 = vmatpush1.bf16.msra.mxu0 %v8333_v10  ;;  %v858_v62 = vld [vmem:[%s9952_s8 + $0xef0] sm:$0xff]  ;;  %v8413_v10 = vcombine.low %v726_v56, %v730_v60 }
 0x24f   : > { %5626 = vmatprep.subr.bf16.mxu0 %v8326_v12  ;;  %v8542_v2 = vcombine.high %v854_v61, %v858_v62  ;;  %v718_v3 = vld [vmem:[%s9952_s8 + $0xa90] sm:$0xff] }
 0x250   : > { %5666 = vmatpush1.bf16.msra.mxu1 %v8461_v11  ;;  %v722_v5 = vld [vmem:[%s9952_s8 + $0xab0] sm:$0xff]  ;;  %v8541_v11 = vcombine.low %v854_v61, %v858_v62 }
 0x251   : > { %5667 = vmatprep.subr.bf16.mxu1 %v8454_v13  ;;  %v846_v8 = vld [vmem:[%s9952_s8 + $0xe90] sm:$0xff]  ;;  %v8406_v12 = vcombine.high %v718_v3, %v722_v5 }
 0x252   : > { %5627 = vmatpush1.bf16.msra.mxu0 %v8325_v18  ;;  %v850_v9 = vld [vmem:[%s9952_s8 + $0xeb0] sm:$0xff]  ;;  %v8405_v18 = vcombine.low %v718_v3, %v722_v5 }
 0x253   : > { %5628 = vmatprep.subr.bf16.mxu0 %v8446_v23  ;;  %v8534_v13 = vcombine.high %v846_v8, %v850_v9  ;;  %v710_v14 = vld [vmem:[%s9952_s8 + $0xa50] sm:$0xff] }
 0x254   : > { %5668 = vmatpush1.bf16.msra.mxu1 %v8453_v21  ;;  %v714_v39 = vld [vmem:[%s9952_s8 + $0xa70] sm:$0xff]  ;;  %v8533_v21 = vcombine.low %v846_v8, %v850_v9 }
 0x255   : > { %5669 = vmatprep.subr.bf16.mxu1 %v8574_v24  ;;  %v838_v15 = vld [vmem:[%s9952_s8 + $0xe50] sm:$0xff]  ;;  %v8398_v23 = vcombine.high %v710_v14, %v714_v39 }
 0x256   : > { %5629 = vmatpush2.bf16.msra.mxu0 %v8445_v30  ;;  %v842_v17 = vld [vmem:[%s9952_s8 + $0xe70] sm:$0xff]  ;;  %v8397_v30 = vcombine.low %v710_v14, %v714_v39 }
 0x257   : > { %5630 = vmatprep.subr.bf16.mxu0 %v8438_v32  ;;  %v8526_v24 = vcombine.high %v838_v15, %v842_v17  ;;  %v702_v53 = vld [vmem:[%s9952_s8 + $0xa10] sm:$0xff] }
 0x258   : > { %5670 = vmatpush2.bf16.msra.mxu1 %v8573_v31  ;;  %v706_v27 = vld [vmem:[%s9952_s8 + $0xa30] sm:$0xff]  ;;  %v8525_v31 = vcombine.low %v838_v15, %v842_v17 }
 0x259   : > { %5671 = vmatprep.subr.bf16.mxu1 %v8566_v33  ;;  %v830_v54 = vld [vmem:[%s9952_s8 + $0xe10] sm:$0xff]  ;;  %v8390_v32 = vcombine.high %v702_v53, %v706_v27 }
 0x25a   : > { %5631 = vmatpush2.bf16.msra.mxu0 %v8437_v42  ;;  %v834_v43 = vld [vmem:[%s9952_s8 + $0xe30] sm:$0xff]  ;;  %v8389_v42 = vcombine.low %v702_v53, %v706_v27 }
 0x25b   : > { %5632 = vmatprep.subr.bf16.mxu0 %v8430_v45  ;;  %v8518_v33 = vcombine.high %v830_v54, %v834_v43  ;;  %v950_v34 = vld [vmem:[%s9952_s8 + $0x11d0] sm:$0xff] }
 0x25c   : > { %5672 = vmatpush2.bf16.msra.mxu1 %v8565_v44  ;;  %v954_v36 = vld [vmem:[%s9952_s8 + $0x11f0] sm:$0xff]  ;;  %v8517_v44 = vcombine.low %v830_v54, %v834_v43 }
 0x25d   : > { %5673 = vmatprep.subr.bf16.mxu1 %v8558_v57  ;;  %v1078_v51 = vld [vmem:[%s9952_s8 + $0x15d0] sm:$0xff]  ;;  %v8638_v45 = vcombine.high %v950_v34, %v954_v36 }
 0x25e   : > { %5633 = vmatpush2.bf16.msra.mxu0 %v8429_v50  ;;  %v1082_v38 = vld [vmem:[%s9952_s8 + $0x15f0] sm:$0xff]  ;;  %v8637_v50 = vcombine.low %v950_v34, %v954_v36 }
 0x25f   : > { %5634 = vmatprep.subr.bf16.mxu0 %v8422_v4  ;;  %v8766_v57 = vcombine.high %v1078_v51, %v1082_v38  ;;  %v942_v46 = vld [vmem:[%s9952_s8 + $0x1190] sm:$0xff] }
 0x260   : > { %5674 = vmatpush2.bf16.msra.mxu1 %v8557_v52  ;;  %v946_v47 = vld [vmem:[%s9952_s8 + $0x11b0] sm:$0xff]  ;;  %v8765_v52 = vcombine.low %v1078_v51, %v1082_v38 }
 0x261   : > { %5675 = vmatprep.subr.bf16.mxu1 %v8550_v55  ;;  %v1070_v48 = vld [vmem:[%s9952_s8 + $0x1590] sm:$0xff]  ;;  %v8630_v4 = vcombine.high %v942_v46, %v946_v47 }
 0x262   : > { %5635 = vmatpush2.bf16.msra.mxu0 %v8421_v63  ;;  %v1074_v19 = vld [vmem:[%s9952_s8 + $0x15b0] sm:$0xff] }
 0x263   : > { %5636 = vmatprep.subr.bf16.mxu0 %v8414_v1  ;;  %v8758_v55 = vcombine.high %v1070_v48, %v1074_v19  ;;  %v934_v56 = vld [vmem:[%s9952_s8 + $0x1150] sm:$0xff]  ;;  %v8757_v5 = vcombine.low %v1070_v48, %v1074_v19 }
 0x264   : > { %5676 = vmatpush2.bf16.msra.mxu1 %v8549_v0  ;;  %v938_v60 = vld [vmem:[%s9952_s8 + $0x1170] sm:$0xff] }
 0x265   : > { %5677 = vmatprep.subr.bf16.mxu1 %v8542_v2  ;;  %v1062_v62 = vld [vmem:[%s9952_s8 + $0x1550] sm:$0xff]  ;;  %v8629_v2 = vcombine.low %v942_v46, %v946_v47  ;;  %v8622_v8 = vcombine.high %v934_v56, %v938_v60 }
 0x266   : > { %5637 = vmatpush2.bf16.msra.mxu0 %v8413_v10  ;;  %v1066_v63 = vld [vmem:[%s9952_s8 + $0x1570] sm:$0xff] }
 0x267   : > { %5638 = vmatprep.subr.bf16.mxu0 %v8406_v12  ;;  %v926_v12 = vld [vmem:[%s9952_s8 + $0x1110] sm:$0xff] }
 0x268   : > { %5678 = vmatpush2.bf16.msra.mxu1 %v8541_v11  ;;  %v1054_v39 = vld [vmem:[%s9952_s8 + $0x1510] sm:$0xff] }
 0x269   : > { %5679 = vmatprep.subr.bf16.mxu1 %v8534_v13  ;;  %v930_v13 = vld [vmem:[%s9952_s8 + $0x1130] sm:$0xff] }
 0x26a   : > { %5639 = vmatpush2.bf16.msra.mxu0 %v8405_v18  ;;  %v1058_v15 = vld [vmem:[%s9952_s8 + $0x1530] sm:$0xff] }
 0x26b   : > { %5640 = vmatprep.subr.bf16.mxu0 %v8398_v23  ;;  %v8749_v23 = vcombine.low %v1062_v62, %v1066_v63  ;;  %v8742_v27 = vcombine.high %v1054_v39, %v1058_v15  ;;  %v918_v54 = vld [vmem:[%s9952_s8 + $0x10d0] sm:$0xff] }
 0x26c   : > { %5680 = vmatpush2.bf16.msra.mxu1 %v8533_v21  ;;  %v922_v43 = vld [vmem:[%s9952_s8 + $0x10f0] sm:$0xff] }
 0x26d   : > { %5681 = vmatprep.subr.bf16.mxu1 %v8526_v24  ;;  %v8614_v24 = vcombine.high %v926_v12, %v930_v13  ;;  %v8606_v34 = vcombine.high %v918_v54, %v922_v43  ;;  %v910_v51 = vld [vmem:[%s9952_s8 + $0x1090] sm:$0xff] }
 0x26e   : > { %5641 = vmatpush2.bf16.msra.mxu0 %v8397_v30  ;;  %v1046_v30 = vld [vmem:[%s9952_s8 + $0x14d0] sm:$0xff] }
 0x26f   : > { %5642 = vmatprep.subr.bf16.mxu0 %v8390_v32  ;;  %v8613_v32 = vcombine.low %v926_v12, %v930_v13  ;;  %v914_v38 = vld [vmem:[%s9952_s8 + $0x10b0] sm:$0xff] }
 0x270   : > { %5682 = vmatpush2.bf16.msra.mxu1 %v8525_v31  ;;  %v1050_v31 = vld [vmem:[%s9952_s8 + $0x14f0] sm:$0xff]  ;;  %v8598_v46 = vcombine.high %v910_v51, %v914_v38 }
 0x271   : > { %5683 = vmatprep.subr.bf16.mxu1 %v8518_v33  ;;  %v8741_v33 = vcombine.low %v1054_v39, %v1058_v15  ;;  %v8734_v36 = vcombine.high %v1046_v30, %v1050_v31  ;;  %v902_v48 = vld [vmem:[%s9952_s8 + $0x1050] sm:$0xff] }
 0x272   : > { %5643 = vmatpush2.bf16.msra.mxu0 %v8389_v42  ;;  %v1038_v42 = vld [vmem:[%s9952_s8 + $0x1490] sm:$0xff] }
 0x273   : > { %5694 = vmatprep.subr.bf16.mxu0 %v8638_v45  ;;  %v8605_v45 = vcombine.low %v918_v54, %v922_v43  ;;  %v906_v19 = vld [vmem:[%s9952_s8 + $0x1070] sm:$0xff] }
 0x274   : > { %5684 = vmatpush2.bf16.msra.mxu1 %v8517_v44  ;;  %v1042_v44 = vld [vmem:[%s9952_s8 + $0x14b0] sm:$0xff] }
 0x275   : > { %5735 = vmatprep.subr.bf16.mxu1 %v8766_v57  ;;  %v5400_v61 = vpop.f32.mrf.mxu0  ;;  %5645 = vmatmul.mubr.bf16.vlgmr.msra.gmra.mxu0 %v10144_v40  ;;  %v8733_v57 = vcombine.low %v1046_v30, %v1050_v31  ;;  %v8726_v47 = vcombine.high %v1038_v42, %v1042_v44  ;;  %v1006_v15 = vld [vmem:[%s9952_s8 + $0x1390] sm:$0xff] }
 0x276   : > { %v5401_v0 = vadd.f32 %v5400_v61, %v10532_v37  ;;  %5695 = vmatpush1.bf16.msra.mxu0 %v8637_v50  ;;  %v8750_v37 = vcombine.high %v1062_v62, %v1066_v63  ;;  %5726 = vmatprep.mubr.bf16.mxu0 %v10156_v49  ;;  %v1030_v50 = vld [vmem:[%s9952_s8 + $0x1450] sm:$0xff] }
 0x277   : > { %v5441_v1 = vpop.f32.mrf.mxu1  ;;  %5686 = vmatmul.mubr.bf16.vlgmr.msra.gmra.mxu1 %v10148_v41  ;;  %v5402_v3 = vpop.f32.mrf.mxu0  ;;  %5696 = vmatprep.subr.bf16.mxu0 %v8630_v4  ;;  %v8597_v4 = vcombine.low %v910_v51, %v914_v38  ;;  %v894_v61 = vld [vmem:[%s9952_s8 + $0x1010] sm:$0xff] }
 0x278   : > { %5736 = vmatpush1.bf16.msra.mxu1 %v8765_v52  ;;  %v10605_v9 = vadd.f32 %v5441_v1, %v5401_v0  ;;  %v5403_v10 = vadd.f32 %v5402_v3, %v10540_v25  ;;  %5767 = vmatprep.mubr.bf16.mxu1 %v10161_v22  ;;  %v8621_v25 = vcombine.low %v934_v56, %v938_v60  ;;  %v1034_v52 = vld [vmem:[%s9952_s8 + $0x1470] sm:$0xff] }
 0x279   : > { %v5443_v11 = vpop.f32.mrf.mxu1  ;;  %5737 = vmatprep.subr.bf16.mxu1 %v8758_v55  ;;  %v5404_v14 = vpop.f32.mrf.mxu0  ;;  %v8725_v55 = vcombine.low %v1038_v42, %v1042_v44  ;;  %v8590_v56 = vcombine.high %v902_v48, %v906_v19  ;;  %v8718_v60 = vcombine.high %v1030_v50, %v1034_v52  ;;  %v898_v62 = vld [vmem:[%s9952_s8 + $0x1030] sm:$0xff]  ;;  %v8589_v1 = vcombine.low %v902_v48, %v906_v19 }
 0x27a   : > { %v10614_v17 = vadd.f32 %v5443_v11, %v5403_v10  ;;  %5697 = vmatpush1.bf16.msra.mxu0 %v8629_v2  ;;  %v1022_v63 = vld [vmem:[%s9952_s8 + $0x1410] sm:$0xff]  ;;  %v8717_v2 = vcombine.low %v1030_v50, %v1034_v52  ;;  %v8582_v3 = vcombine.high %v894_v61, %v898_v62  ;;  %v8581_v12 = vcombine.low %v894_v61, %v898_v62 }
 0x27b   : > { %v5445_v18 = vpop.f32.mrf.mxu1  ;;  %v5405_v21 = vpop.f32.mrf.mxu0  ;;  %5698 = vmatprep.subr.bf16.mxu0 %v8622_v8  ;;  %v1026_v0 = vld [vmem:[%s9952_s8 + $0x1430] sm:$0xff] }
 0x27c   : > { %5738 = vmatpush1.bf16.msra.mxu1 %v8757_v5  ;;  %v8710_v5 = vcombine.high %v1022_v63, %v1026_v0  ;;  %v1014_v8 = vld [vmem:[%s9952_s8 + $0x13d0] sm:$0xff]  ;;  %v8709_v13 = vcombine.low %v1022_v63, %v1026_v0 }
 0x27d   : > { %v5446_v53 = vpop.f32.mrf.mxu1  ;;  %5739 = vmatprep.subr.bf16.mxu1 %v8750_v37  ;;  %v1018_v10 = vld [vmem:[%s9952_s8 + $0x13f0] sm:$0xff] }
 0x27e   : > { %5699 = vmatpush1.bf16.msra.mxu0 %v8621_v25  ;;  %v1142_v11 = vld [vmem:[%s9952_s8 + $0x17d0] sm:$0xff]  ;;  %v8702_v14 = vcombine.high %v1014_v8, %v1018_v10 }
 0x27f   : > { %5700 = vmatprep.subr.bf16.mxu0 %v8614_v24  ;;  %v1146_v37 = vld [vmem:[%s9952_s8 + $0x17f0] sm:$0xff] }
 0x280   : > { %5740 = vmatpush1.bf16.msra.mxu1 %v8749_v23  ;;  %v8830_v39 = vcombine.high %v1142_v11, %v1146_v37  ;;  %v1010_v18 = vld [vmem:[%s9952_s8 + $0x13b0] sm:$0xff]  ;;  %v8701_v23 = vcombine.low %v1014_v8, %v1018_v10  ;;  %v8829_v24 = vcombine.low %v1142_v11, %v1146_v37 }
 0x281   : > { %5741 = vmatprep.subr.bf16.mxu1 %v8742_v27  ;;  %v1134_v25 = vld [vmem:[%s9952_s8 + $0x1790] sm:$0xff]  ;;  %v8694_v53 = vcombine.high %v1006_v15, %v1010_v18 }
 0x282   : > { %5701 = vmatpush1.bf16.msra.mxu0 %v8613_v32  ;;  %v1138_v21 = vld [vmem:[%s9952_s8 + $0x17b0] sm:$0xff]  ;;  %v8693_v32 = vcombine.low %v1006_v15, %v1010_v18 }
 0x283   : > { %5702 = vmatprep.subr.bf16.mxu0 %v8606_v34  ;;  %v8822_v27 = vcombine.high %v1134_v25, %v1138_v21  ;;  %v998_v54 = vld [vmem:[%s9952_s8 + $0x1350] sm:$0xff] }
 0x284   : > { %5742 = vmatpush1.bf16.msra.mxu1 %v8741_v33  ;;  %v1002_v43 = vld [vmem:[%s9952_s8 + $0x1370] sm:$0xff]  ;;  %v8821_v33 = vcombine.low %v1134_v25, %v1138_v21 }
 0x285   : > { %5743 = vmatprep.subr.bf16.mxu1 %v8734_v36  ;;  %v1126_v30 = vld [vmem:[%s9952_s8 + $0x1750] sm:$0xff]  ;;  %v8686_v34 = vcombine.high %v998_v54, %v1002_v43 }
 0x286   : > { %5703 = vmatpush1.bf16.msra.mxu0 %v8605_v45  ;;  %v1130_v31 = vld [vmem:[%s9952_s8 + $0x1770] sm:$0xff]  ;;  %v8685_v45 = vcombine.low %v998_v54, %v1002_v43  ;;  %v439_v54 = vld [vmem:[%s9952_s8 + $0x1d8] sm:$0xff] }
 0x287   : > { %5704 = vmatprep.subr.bf16.mxu0 %v8598_v46  ;;  %v8814_v36 = vcombine.high %v1126_v30, %v1130_v31  ;;  %v990_v51 = vld [vmem:[%s9952_s8 + $0x1310] sm:$0xff]  ;;  %v443_v43 = vld [vmem:[%s9952_s8 + $0x1f8] sm:$0xff] }
 0x288   : > { %5744 = vmatpush1.bf16.msra.mxu1 %v8733_v57  ;;  %v994_v38 = vld [vmem:[%s9952_s8 + $0x1330] sm:$0xff]  ;;  %v8813_v57 = vcombine.low %v1126_v30, %v1130_v31  ;;  %v567_v30 = vld [vmem:[%s9952_s8 + $0x5d8] sm:$0xff] }
 0x289   : > { %5745 = vmatprep.subr.bf16.mxu1 %v8726_v47  ;;  %v1118_v42 = vld [vmem:[%s9952_s8 + $0x1710] sm:$0xff]  ;;  %v8678_v46 = vcombine.high %v990_v51, %v994_v38  ;;  %v571_v31 = vld [vmem:[%s9952_s8 + $0x5f8] sm:$0xff] }
 0x28a   : > { %5705 = vmatpush1.bf16.msra.mxu0 %v8597_v4  ;;  %v1122_v44 = vld [vmem:[%s9952_s8 + $0x1730] sm:$0xff]  ;;  %v8677_v4 = vcombine.low %v990_v51, %v994_v38  ;;  %v431_v51 = vld [vmem:[%s9952_s8 + $0x198] sm:$0xff] }
 0x28b   : > { %5706 = vmatprep.subr.bf16.mxu0 %v8590_v56  ;;  %v8806_v47 = vcombine.high %v1118_v42, %v1122_v44  ;;  %v982_v48 = vld [vmem:[%s9952_s8 + $0x12d0] sm:$0xff]  ;;  %v435_v38 = vld [vmem:[%s9952_s8 + $0x1b8] sm:$0xff] }
 0x28c   : > { %5746 = vmatpush1.bf16.msra.mxu1 %v8725_v55  ;;  %v986_v19 = vld [vmem:[%s9952_s8 + $0x12f0] sm:$0xff]  ;;  %v8805_v55 = vcombine.low %v1118_v42, %v1122_v44  ;;  %v559_v42 = vld [vmem:[%s9952_s8 + $0x598] sm:$0xff] }
 0x28d   : > { %5747 = vmatprep.subr.bf16.mxu1 %v8718_v60  ;;  %v1110_v50 = vld [vmem:[%s9952_s8 + $0x16d0] sm:$0xff]  ;;  %v8670_v56 = vcombine.high %v982_v48, %v986_v19  ;;  %v563_v44 = vld [vmem:[%s9952_s8 + $0x5b8] sm:$0xff] }
 0x28e   : > { %5707 = vmatpush1.bf16.msra.mxu0 %v8589_v1  ;;  %v1114_v52 = vld [vmem:[%s9952_s8 + $0x16f0] sm:$0xff]  ;;  %v8669_v1 = vcombine.low %v982_v48, %v986_v19  ;;  %v423_v48 = vld [vmem:[%s9952_s8 + $0x158] sm:$0xff] }
 0x28f   : > { %5708 = vmatprep.subr.bf16.mxu0 %v8582_v3  ;;  %v8798_v60 = vcombine.high %v1110_v50, %v1114_v52  ;;  %v974_v61 = vld [vmem:[%s9952_s8 + $0x1290] sm:$0xff]  ;;  %v427_v19 = vld [vmem:[%s9952_s8 + $0x178] sm:$0xff] }
 0x290   : > { %5748 = vmatpush1.bf16.msra.mxu1 %v8717_v2  ;;  %v978_v62 = vld [vmem:[%s9952_s8 + $0x12b0] sm:$0xff]  ;;  %v8797_v2 = vcombine.low %v1110_v50, %v1114_v52  ;;  %v551_v52 = vld [vmem:[%s9952_s8 + $0x558] sm:$0xff] }
 0x291   : > { %5749 = vmatprep.subr.bf16.mxu1 %v8710_v5  ;;  %v1102_v63 = vld [vmem:[%s9952_s8 + $0x1690] sm:$0xff]  ;;  %v8662_v3 = vcombine.high %v974_v61, %v978_v62 }
 0x292   : > { %5709 = vmatpush1.bf16.msra.mxu0 %v8581_v12  ;;  %v1106_v0 = vld [vmem:[%s9952_s8 + $0x16b0] sm:$0xff]  ;;  %v8661_v12 = vcombine.low %v974_v61, %v978_v62  ;;  %v8247_v62 = vcombine.low %v559_v42, %v563_v44 }
 0x293   : > { %5710 = vmatprep.subr.bf16.mxu0 %v8702_v14  ;;  %v8790_v5 = vcombine.high %v1102_v63, %v1106_v0  ;;  %v966_v8 = vld [vmem:[%s9952_s8 + $0x1250] sm:$0xff] }
 0x294   : > { %5750 = vmatpush1.bf16.msra.mxu1 %v8709_v13  ;;  %v970_v10 = vld [vmem:[%s9952_s8 + $0x1270] sm:$0xff]  ;;  %v8789_v13 = vcombine.low %v1102_v63, %v1106_v0  ;;  %v8112_v63 = vcombine.high %v423_v48, %v427_v19 }
 0x295   : > { %5751 = vmatprep.subr.bf16.mxu1 %v8830_v39  ;;  %v1094_v11 = vld [vmem:[%s9952_s8 + $0x1650] sm:$0xff]  ;;  %v8654_v14 = vcombine.high %v966_v8, %v970_v10 }
 0x296   : > { %5711 = vmatpush2.bf16.msra.mxu0 %v8701_v23  ;;  %v1098_v37 = vld [vmem:[%s9952_s8 + $0x1670] sm:$0xff]  ;;  %v8653_v23 = vcombine.low %v966_v8, %v970_v10  ;;  %v543_v10 = vld [vmem:[%s9952_s8 + $0x518] sm:$0xff] }
 0x297   : > { %5712 = vmatprep.subr.bf16.mxu0 %v8694_v53  ;;  %v8782_v39 = vcombine.high %v1094_v11, %v1098_v37  ;;  %v958_v15 = vld [vmem:[%s9952_s8 + $0x1210] sm:$0xff] }
 0x298   : > { %5752 = vmatpush2.bf16.msra.mxu1 %v8829_v24  ;;  %v962_v18 = vld [vmem:[%s9952_s8 + $0x1230] sm:$0xff]  ;;  %v8781_v24 = vcombine.low %v1094_v11, %v1098_v37  ;;  %v547_v11 = vld [vmem:[%s9952_s8 + $0x538] sm:$0xff] }
 0x299   : > { %5753 = vmatprep.subr.bf16.mxu1 %v8822_v27  ;;  %v1086_v25 = vld [vmem:[%s9952_s8 + $0x1610] sm:$0xff]  ;;  %v8646_v53 = vcombine.high %v958_v15, %v962_v18 }
 0x29a   : > { %5713 = vmatpush2.bf16.msra.mxu0 %v8693_v32  ;;  %v1090_v21 = vld [vmem:[%s9952_s8 + $0x1630] sm:$0xff]  ;;  %v8645_v32 = vcombine.low %v958_v15, %v962_v18  ;;  %v8232_v15 = vcombine.high %v543_v10, %v547_v11  ;;  %v407_v18 = vld [vmem:[%s9952_s8 + $0xd8] sm:$0xff] }
 0x29b   : > { %5714 = vmatprep.subr.bf16.mxu0 %v8686_v34  ;;  %v8774_v27 = vcombine.high %v1086_v25, %v1090_v21  ;;  %v8128_v34 = vcombine.high %v439_v54, %v443_v43 }
 0x29c   : > { %5754 = vmatpush2.bf16.msra.mxu1 %v8821_v33  ;;  %v8773_v33 = vcombine.low %v1086_v25, %v1090_v21  ;;  %v535_v25 = vld [vmem:[%s9952_s8 + $0x4d8] sm:$0xff] }
 0x29d   : > { %5755 = vmatprep.subr.bf16.mxu1 %v8814_v36  ;;  %v8256_v36 = vcombine.high %v567_v30, %v571_v31  ;;  %v539_v21 = vld [vmem:[%s9952_s8 + $0x4f8] sm:$0xff] }
 0x29e   : > { %5715 = vmatpush2.bf16.msra.mxu0 %v8685_v45  ;;  %v8127_v45 = vcombine.low %v439_v54, %v443_v43  ;;  %v399_v54 = vld [vmem:[%s9952_s8 + $0x98] sm:$0xff] }
 0x29f   : > { %5716 = vmatprep.subr.bf16.mxu0 %v8678_v46  ;;  %v8120_v46 = vcombine.high %v431_v51, %v435_v38  ;;  %v403_v43 = vld [vmem:[%s9952_s8 + $0xb8] sm:$0xff] }
 0x2a0   : > { %5756 = vmatpush2.bf16.msra.mxu1 %v8813_v57  ;;  %v8255_v57 = vcombine.low %v567_v30, %v571_v31  ;;  %v527_v30 = vld [vmem:[%s9952_s8 + $0x498] sm:$0xff] }
 0x2a1   : > { %5757 = vmatprep.subr.bf16.mxu1 %v8806_v47  ;;  %v8248_v47 = vcombine.high %v559_v42, %v563_v44  ;;  %v531_v31 = vld [vmem:[%s9952_s8 + $0x4b8] sm:$0xff] }
 0x2a2   : > { %5717 = vmatpush2.bf16.msra.mxu0 %v8677_v4  ;;  %v555_v4 = vld [vmem:[%s9952_s8 + $0x578] sm:$0xff] }
 0x2a3   : > { %5718 = vmatprep.subr.bf16.mxu0 %v8670_v56  ;;  %v519_v42 = vld [vmem:[%s9952_s8 + $0x458] sm:$0xff] }
 0x2a4   : > { %5758 = vmatpush2.bf16.msra.mxu1 %v8805_v55  ;;  %v523_v44 = vld [vmem:[%s9952_s8 + $0x478] sm:$0xff] }
 0x2a5   : > { %5759 = vmatprep.subr.bf16.mxu1 %v8798_v60  ;;  %v8119_v60 = vcombine.low %v431_v51, %v435_v38  ;;  %v391_v51 = vld [vmem:[%s9952_s8 + $0x58] sm:$0xff] }
 0x2a6   : > { %5719 = vmatpush2.bf16.msra.mxu0 %v8669_v1  ;;  %v395_v38 = vld [vmem:[%s9952_s8 + $0x78] sm:$0xff] }
 0x2a7   : > { %5720 = vmatprep.subr.bf16.mxu0 %v8662_v3  ;;  %v415_v3 = vld [vmem:[%s9952_s8 + $0x118] sm:$0xff] }
 0x2a8   : > { %5760 = vmatpush2.bf16.msra.mxu1 %v8797_v2 }
 0x2a9   : > { %5761 = vmatprep.subr.bf16.mxu1 %v8790_v5  ;;  %v419_v5 = vld [vmem:[%s9952_s8 + $0x138] sm:$0xff] }
 0x2aa   : > { %5721 = vmatpush2.bf16.msra.mxu0 %v8661_v12 }
 0x2ab   : > { %5722 = vmatprep.subr.bf16.mxu0 %v8654_v14  ;;  %v8239_v14 = vcombine.low %v551_v52, %v555_v4 }
 0x2ac   : > { %5762 = vmatpush2.bf16.msra.mxu1 %v8789_v13 }
 0x2ad   : > { %5763 = vmatprep.subr.bf16.mxu1 %v8782_v39  ;;  %v8104_v39 = vcombine.high %v415_v3, %v419_v5 }
 0x2ae   : > { %5723 = vmatpush2.bf16.msra.mxu0 %v8653_v23  ;;  %v8103_v23 = vcombine.low %v415_v3, %v419_v5 }
 0x2af   : > { %5724 = vmatprep.subr.bf16.mxu0 %v8646_v53 }
 0x2b0   : > { %5764 = vmatpush2.bf16.msra.mxu1 %v8781_v24  ;;  %v8231_v24 = vcombine.low %v543_v10, %v547_v11  ;;  %v499_v10 = vld [vmem:[%s9952_s8 + $0x3b8] sm:$0xff] }
 0x2b1   : > { %5765 = vmatprep.subr.bf16.mxu1 %v8774_v27  ;;  %v8224_v27 = vcombine.high %v535_v25, %v539_v21  ;;  %v623_v11 = vld [vmem:[%s9952_s8 + $0x798] sm:$0xff] }
 0x2b2   : > { %5725 = vmatpush2.bf16.msra.mxu0 %v8645_v32 }
 0x2b3   : > { %5776 = vmatprep.subr.bf16.mxu0 %v8128_v34  ;;  %v8088_v34 = vcombine.high %v399_v54, %v403_v43 }
 0x2b4   : > { %5766 = vmatpush2.bf16.msra.mxu1 %v8773_v33  ;;  %v8223_v33 = vcombine.low %v535_v25, %v539_v21 }
 0x2b5   : > { %5817 = vmatprep.subr.bf16.mxu1 %v8256_v36  ;;  %v5482_v50 = vpop.f32.mrf.mxu0  ;;  %5727 = vmatmul.mubr.bf16.vlgmr.msra.gmra.mxu0 %v10228_v6  ;;  %v8216_v36 = vcombine.high %v527_v30, %v531_v31 }
 0x2b6   : > { %v5483_v55 = vadd.f32 %v5482_v50, %v10605_v9  ;;  %5777 = vmatpush1.bf16.msra.mxu0 %v8127_v45  ;;  %v8240_v9 = vcombine.high %v551_v52, %v555_v4  ;;  %5808 = vmatprep.mubr.bf16.mxu0 %v10000_v58  ;;  %v8087_v45 = vcombine.low %v399_v54, %v403_v43  ;;  %v511_v50 = vld [vmem:[%s9952_s8 + $0x418] sm:$0xff] }
 0x2b7   : > { %v5523_v56 = vpop.f32.mrf.mxu1  ;;  %5768 = vmatmul.mubr.bf16.vlgmr.msra.gmra.mxu1 %v10232_v7  ;;  %v5484_v61 = vpop.f32.mrf.mxu0  ;;  %5778 = vmatprep.subr.bf16.mxu0 %v8120_v46  ;;  %v8080_v46 = vcombine.high %v391_v51, %v395_v38  ;;  %v515_v52 = vld [vmem:[%s9952_s8 + $0x438] sm:$0xff]  ;;  %v8079_v4 = vcombine.low %v391_v51, %v395_v38 }
 0x2b8   : > { %5818 = vmatpush1.bf16.msra.mxu1 %v8255_v57  ;;  %v10679_v0 = vadd.f32 %v5523_v56, %v5483_v55  ;;  %v5485_v1 = vadd.f32 %v5484_v61, %v10614_v17  ;;  %5849 = vmatprep.mubr.bf16.mxu1 %v10004_v59  ;;  %v8111_v17 = vcombine.low %v423_v48, %v427_v19  ;;  %v411_v59 = vld [vmem:[%s9952_s8 + $0xf8] sm:$0xff] }
 0x2b9   : > { %v5525_v2 = vpop.f32.mrf.mxu1  ;;  %5819 = vmatprep.subr.bf16.mxu1 %v8248_v47  ;;  %v5486_v8 = vpop.f32.mrf.mxu0  ;;  %v8096_v53 = vcombine.high %v407_v18, %v411_v59  ;;  %v8095_v32 = vcombine.low %v407_v18, %v411_v59  ;;  %v8215_v57 = vcombine.low %v527_v30, %v531_v31  ;;  %v8208_v47 = vcombine.high %v519_v42, %v523_v44  ;;  %v383_v48 = vld [vmem:[%s9952_s8 + $0x18] sm:$0xff] }
 0x2ba   : > { %v10688_v37 = vadd.f32 %v5525_v2, %v5485_v1  ;;  %5779 = vmatpush1.bf16.msra.mxu0 %v8119_v60  ;;  %v387_v19 = vld [vmem:[%s9952_s8 + $0x38] sm:$0xff]  ;;  %v8207_v55 = vcombine.low %v519_v42, %v523_v44  ;;  %v8200_v60 = vcombine.high %v511_v50, %v515_v52 }
 0x2bb   : > { %v5527_v12 = vpop.f32.mrf.mxu1  ;;  %v5487_v13 = vpop.f32.mrf.mxu0  ;;  %5780 = vmatprep.subr.bf16.mxu0 %v8112_v63  ;;  %v8072_v56 = vcombine.high %v383_v48, %v387_v19  ;;  %v503_v61 = vld [vmem:[%s9952_s8 + $0x3d8] sm:$0xff]  ;;  %v8071_v2 = vcombine.low %v383_v48, %v387_v19 }
 0x2bc   : > { %5820 = vmatpush1.bf16.msra.mxu1 %v8247_v62  ;;  %v507_v62 = vld [vmem:[%s9952_s8 + $0x3f8] sm:$0xff] }
 0x2bd   : > { %v5528_v58 = vpop.f32.mrf.mxu1  ;;  %5821 = vmatprep.subr.bf16.mxu1 %v8240_v9  ;;  %v631_v63 = vld [vmem:[%s9952_s8 + $0x7d8] sm:$0xff]  ;;  %v8199_v9 = vcombine.low %v511_v50, %v515_v52  ;;  %v8192_v3 = vcombine.high %v503_v61, %v507_v62 }
 0x2be   : > { %5781 = vmatpush1.bf16.msra.mxu0 %v8111_v17  ;;  %v635_v1 = vld [vmem:[%s9952_s8 + $0x7f8] sm:$0xff]  ;;  %v8191_v17 = vcombine.low %v503_v61, %v507_v62 }
 0x2bf   : > { %5782 = vmatprep.subr.bf16.mxu0 %v8104_v39  ;;  %v8320_v5 = vcombine.high %v631_v63, %v635_v1  ;;  %v495_v8 = vld [vmem:[%s9952_s8 + $0x398] sm:$0xff]  ;;  %v8319_v13 = vcombine.low %v631_v63, %v635_v1 }
 0x2c0   : > { %5822 = vmatpush1.bf16.msra.mxu1 %v8239_v14  ;;  %v627_v12 = vld [vmem:[%s9952_s8 + $0x7b8] sm:$0xff]  ;;  %v8184_v14 = vcombine.high %v495_v8, %v499_v10  ;;  %v8183_v25 = vcombine.low %v495_v8, %v499_v10 }
 0x2c1   : > { %5823 = vmatprep.subr.bf16.mxu1 %v8232_v15  ;;  %v8312_v39 = vcombine.high %v623_v11, %v627_v12  ;;  %v487_v58 = vld [vmem:[%s9952_s8 + $0x358] sm:$0xff]  ;;  %v8311_v21 = vcombine.low %v623_v11, %v627_v12 }
 0x2c2   : > { %5783 = vmatpush1.bf16.msra.mxu0 %v8103_v23  ;;  %v491_v15 = vld [vmem:[%s9952_s8 + $0x378] sm:$0xff] }
 0x2c3   : > { %5784 = vmatprep.subr.bf16.mxu0 %v8096_v53  ;;  %v615_v18 = vld [vmem:[%s9952_s8 + $0x758] sm:$0xff]  ;;  %v8176_v23 = vcombine.high %v487_v58, %v491_v15  ;;  %v8175_v30 = vcombine.low %v487_v58, %v491_v15 }
 0x2c4   : > { %5824 = vmatpush1.bf16.msra.mxu1 %v8231_v24  ;;  %v619_v59 = vld [vmem:[%s9952_s8 + $0x778] sm:$0xff] }
 0x2c5   : > { %5825 = vmatprep.subr.bf16.mxu1 %v8224_v27  ;;  %v8304_v24 = vcombine.high %v615_v18, %v619_v59  ;;  %v479_v53 = vld [vmem:[%s9952_s8 + $0x318] sm:$0xff]  ;;  %v8303_v31 = vcombine.low %v615_v18, %v619_v59 }
 0x2c6   : > { %5785 = vmatpush1.bf16.msra.mxu0 %v8095_v32  ;;  %v483_v27 = vld [vmem:[%s9952_s8 + $0x338] sm:$0xff] }
 0x2c7   : > { %5786 = vmatprep.subr.bf16.mxu0 %v8088_v34  ;;  %v607_v54 = vld [vmem:[%s9952_s8 + $0x718] sm:$0xff]  ;;  %v8168_v32 = vcombine.high %v479_v53, %v483_v27  ;;  %v8167_v42 = vcombine.low %v479_v53, %v483_v27 }
 0x2c8   : > { %5826 = vmatpush1.bf16.msra.mxu1 %v8223_v33  ;;  %v611_v43 = vld [vmem:[%s9952_s8 + $0x738] sm:$0xff] }
 0x2c9   : > { %5827 = vmatprep.subr.bf16.mxu1 %v8216_v36  ;;  %v8296_v33 = vcombine.high %v607_v54, %v611_v43  ;;  %v471_v34 = vld [vmem:[%s9952_s8 + $0x2d8] sm:$0xff]  ;;  %v8295_v44 = vcombine.low %v607_v54, %v611_v43  ;;  %v1152_v43 = vld [vmem:[%s9946_s16 + $0x20] sm:$0xff] }
 0x2ca   : > { %5787 = vmatpush1.bf16.msra.mxu0 %v8087_v45  ;;  %v475_v36 = vld [vmem:[%s9952_s8 + $0x2f8] sm:$0xff] }
 0x2cb   : > { %5788 = vmatprep.subr.bf16.mxu0 %v8080_v46  ;;  %v599_v51 = vld [vmem:[%s9952_s8 + $0x6d8] sm:$0xff]  ;;  %v8160_v45 = vcombine.high %v471_v34, %v475_v36  ;;  %v8159_v50 = vcombine.low %v471_v34, %v475_v36 }
 0x2cc   : > { %5828 = vmatpush1.bf16.msra.mxu1 %v8215_v57  ;;  %v603_v38 = vld [vmem:[%s9952_s8 + $0x6f8] sm:$0xff] }
 0x2cd   : > { %5829 = vmatprep.subr.bf16.mxu1 %v8208_v47  ;;  %v8288_v57 = vcombine.high %v599_v51, %v603_v38  ;;  %v463_v46 = vld [vmem:[%s9952_s8 + $0x298] sm:$0xff]  ;;  %v8287_v52 = vcombine.low %v599_v51, %v603_v38  ;;  %v1153_v51 = vld [vmem:[%s9946_s16 + $0x28] sm:$0xff] }
 0x2ce   : > { %5789 = vmatpush1.bf16.msra.mxu0 %v8079_v4  ;;  %v467_v47 = vld [vmem:[%s9952_s8 + $0x2b8] sm:$0xff] }
 0x2cf   : > { %5790 = vmatprep.subr.bf16.mxu0 %v8072_v56  ;;  %v591_v48 = vld [vmem:[%s9952_s8 + $0x698] sm:$0xff]  ;;  %v8152_v4 = vcombine.high %v463_v46, %v467_v47  ;;  %v8151_v63 = vcombine.low %v463_v46, %v467_v47 }
 0x2d0   : > { %5830 = vmatpush1.bf16.msra.mxu1 %v8207_v55  ;;  %v595_v19 = vld [vmem:[%s9952_s8 + $0x6b8] sm:$0xff] }
 0x2d1   : > { %5831 = vmatprep.subr.bf16.mxu1 %v8200_v60  ;;  %v8280_v55 = vcombine.high %v591_v48, %v595_v19  ;;  %v455_v56 = vld [vmem:[%s9952_s8 + $0x258] sm:$0xff]  ;;  %v8279_v1 = vcombine.low %v591_v48, %v595_v19 }
 0x2d2   : > { %5791 = vmatpush1.bf16.msra.mxu0 %v8071_v2  ;;  %v459_v60 = vld [vmem:[%s9952_s8 + $0x278] sm:$0xff] }
 0x2d3   : > { %5792 = vmatprep.subr.bf16.mxu0 %v8192_v3  ;;  %v583_v61 = vld [vmem:[%s9952_s8 + $0x658] sm:$0xff]  ;;  %v8144_v2 = vcombine.high %v455_v56, %v459_v60  ;;  %v8143_v11 = vcombine.low %v455_v56, %v459_v60 }
 0x2d4   : > { %5832 = vmatpush1.bf16.msra.mxu1 %v8199_v9  ;;  %v587_v62 = vld [vmem:[%s9952_s8 + $0x678] sm:$0xff] }
 0x2d5   : > { %5833 = vmatprep.subr.bf16.mxu1 %v8320_v5  ;;  %v8272_v9 = vcombine.high %v583_v61, %v587_v62  ;;  %v447_v3 = vld [vmem:[%s9952_s8 + $0x218] sm:$0xff]  ;;  %v8271_v12 = vcombine.low %v583_v61, %v587_v62 }
 0x2d6   : > { %5793 = vmatpush2.bf16.msra.mxu0 %v8191_v17  ;;  %v451_v5 = vld [vmem:[%s9952_s8 + $0x238] sm:$0xff] }
 0x2d7   : > { %5794 = vmatprep.subr.bf16.mxu0 %v8184_v14  ;;  %v575_v8 = vld [vmem:[%s9952_s8 + $0x618] sm:$0xff]  ;;  %v8136_v17 = vcombine.high %v447_v3, %v451_v5  ;;  %v8135_v18 = vcombine.low %v447_v3, %v451_v5 }
 0x2d8   : > { %5834 = vmatpush2.bf16.msra.mxu1 %v8319_v13  ;;  %v579_v10 = vld [vmem:[%s9952_s8 + $0x638] sm:$0xff] }
 0x2d9   : > { %5835 = vmatprep.subr.bf16.mxu1 %v8312_v39  ;;  %v8264_v13 = vcombine.high %v575_v8, %v579_v10  ;;  %v695_v14 = vld [vmem:[%s9952_s8 + $0x9d8] sm:$0xff]  ;;  %v8263_v59 = vcombine.low %v575_v8, %v579_v10 }
 0x2da   : > { %5795 = vmatpush2.bf16.msra.mxu0 %v8183_v25  ;;  %v699_v39 = vld [vmem:[%s9952_s8 + $0x9f8] sm:$0xff] }
 0x2db   : > { %5796 = vmatprep.subr.bf16.mxu0 %v8176_v23  ;;  %v823_v58 = vld [vmem:[%s9952_s8 + $0xdd8] sm:$0xff]  ;;  %v8384_v25 = vcombine.high %v695_v14, %v699_v39  ;;  %v8383_v54 = vcombine.low %v695_v14, %v699_v39 }
 0x2dc   : > { %5836 = vmatpush2.bf16.msra.mxu1 %v8311_v21  ;;  %v827_v15 = vld [vmem:[%s9952_s8 + $0xdf8] sm:$0xff] }
 0x2dd   : > { %5837 = vmatprep.subr.bf16.mxu1 %v8304_v24  ;;  %v8512_v21 = vcombine.high %v823_v58, %v827_v15  ;;  %v687_v23 = vld [vmem:[%s9952_s8 + $0x998] sm:$0xff] }
 0x2de   : > { %5797 = vmatpush2.bf16.msra.mxu0 %v8175_v30  ;;  %v691_v24 = vld [vmem:[%s9952_s8 + $0x9b8] sm:$0xff]  ;;  %v8511_v30 = vcombine.low %v823_v58, %v827_v15 }
 0x2df   : > { %5798 = vmatprep.subr.bf16.mxu0 %v8168_v32  ;;  %v815_v53 = vld [vmem:[%s9952_s8 + $0xd98] sm:$0xff] }
 0x2e0   : > { %5838 = vmatpush2.bf16.msra.mxu1 %v8303_v31  ;;  %v819_v27 = vld [vmem:[%s9952_s8 + $0xdb8] sm:$0xff]  ;;  %v8376_v31 = vcombine.high %v687_v23, %v691_v24 }
 0x2e1   : > { %5839 = vmatprep.subr.bf16.mxu1 %v8296_v33  ;;  %v8504_v32 = vcombine.high %v815_v53, %v819_v27  ;;  %v679_v33 = vld [vmem:[%s9952_s8 + $0x958] sm:$0xff]  ;;  %v8503_v47 = vcombine.low %v815_v53, %v819_v27 }
 0x2e2   : > { %5799 = vmatpush2.bf16.msra.mxu0 %v8167_v42  ;;  %v683_v34 = vld [vmem:[%s9952_s8 + $0x978] sm:$0xff] }
 0x2e3   : > { %5800 = vmatprep.subr.bf16.mxu0 %v8160_v45  ;;  %v807_v38 = vld [vmem:[%s9952_s8 + $0xd58] sm:$0xff]  ;;  %v8368_v48 = vcombine.high %v679_v33, %v683_v34 }
 0x2e4   : > { %5840 = vmatpush2.bf16.msra.mxu1 %v8295_v44  ;;  %v811_v42 = vld [vmem:[%s9952_s8 + $0xd78] sm:$0xff] }
 0x2e5   : > { %5841 = vmatprep.subr.bf16.mxu1 %v8288_v57  ;;  %v8375_v57 = vcombine.low %v687_v23, %v691_v24  ;;  %v799_v56 = vld [vmem:[%s9952_s8 + $0xd18] sm:$0xff] }
 0x2e6   : > { %5801 = vmatpush2.bf16.msra.mxu0 %v8159_v50  ;;  %v803_v60 = vld [vmem:[%s9952_s8 + $0xd38] sm:$0xff] }
 0x2e7   : > { %5802 = vmatprep.subr.bf16.mxu0 %v8152_v4  ;;  %v671_v4 = vld [vmem:[%s9952_s8 + $0x918] sm:$0xff]  ;;  %v8488_v3 = vcombine.high %v799_v56, %v803_v60 }
 0x2e8   : > { %5842 = vmatpush2.bf16.msra.mxu1 %v8287_v52  ;;  %v8496_v52 = vcombine.high %v807_v38, %v811_v42  ;;  %v663_v5 = vld [vmem:[%s9952_s8 + $0x8d8] sm:$0xff] }
 0x2e9   : > { %5843 = vmatprep.subr.bf16.mxu1 %v8280_v55  ;;  %v675_v55 = vld [vmem:[%s9952_s8 + $0x938] sm:$0xff] }
 0x2ea   : > { %5803 = vmatpush2.bf16.msra.mxu0 %v8151_v63  ;;  %v8367_v63 = vcombine.low %v679_v33, %v683_v34  ;;  %v791_v8 = vld [vmem:[%s9952_s8 + $0xcd8] sm:$0xff] }
 0x2eb   : > { %5804 = vmatprep.subr.bf16.mxu0 %v8144_v2  ;;  %v8495_v2 = vcombine.low %v807_v38, %v811_v42  ;;  %v795_v10 = vld [vmem:[%s9952_s8 + $0xcf8] sm:$0xff] }
 0x2ec   : > { %5844 = vmatpush2.bf16.msra.mxu1 %v8279_v1  ;;  %v655_v14 = vld [vmem:[%s9952_s8 + $0x898] sm:$0xff] }
 0x2ed   : > { %5845 = vmatprep.subr.bf16.mxu1 %v8272_v9  ;;  %v8360_v9 = vcombine.high %v671_v4, %v675_v55  ;;  %v659_v39 = vld [vmem:[%s9952_s8 + $0x8b8] sm:$0xff] }
 0x2ee   : > { %5805 = vmatpush2.bf16.msra.mxu0 %v8143_v11  ;;  %v8359_v11 = vcombine.low %v671_v4, %v675_v55  ;;  %v783_v58 = vld [vmem:[%s9952_s8 + $0xc98] sm:$0xff] }
 0x2ef   : > { %5806 = vmatprep.subr.bf16.mxu0 %v8136_v17  ;;  %v787_v15 = vld [vmem:[%s9952_s8 + $0xcb8] sm:$0xff] }
 0x2f0   : > { %5846 = vmatpush2.bf16.msra.mxu1 %v8271_v12  ;;  %v8487_v12 = vcombine.low %v799_v56, %v803_v60  ;;  %v647_v23 = vld [vmem:[%s9952_s8 + $0x858] sm:$0xff] }
 0x2f1   : > { %5847 = vmatprep.subr.bf16.mxu1 %v8264_v13  ;;  %v8480_v13 = vcombine.high %v791_v8, %v795_v10  ;;  %v651_v24 = vld [vmem:[%s9952_s8 + $0x878] sm:$0xff] }
 0x2f2   : > { %5807 = vmatpush2.bf16.msra.mxu0 %v8135_v18  ;;  %v775_v53 = vld [vmem:[%s9952_s8 + $0xc58] sm:$0xff] }
 0x2f3   : > { %5858 = vmatprep.subr.bf16.mxu0 %v8384_v25  ;;  %v8344_v25 = vcombine.high %v655_v14, %v659_v39  ;;  %v779_v27 = vld [vmem:[%s9952_s8 + $0xc78] sm:$0xff] }
 0x2f4   : > { %5848 = vmatpush2.bf16.msra.mxu1 %v8263_v59  ;;  %v8479_v59 = vcombine.low %v791_v8, %v795_v10  ;;  %v643_v33 = vld [vmem:[%s9952_s8 + $0x838] sm:$0xff]  ;;  %v8463_v38 = vcombine.low %v775_v53, %v779_v27 }
 0x2f5   : > { %5899 = vmatprep.subr.bf16.mxu1 %v8512_v21  ;;  %v5564_v36 = vpop.f32.mrf.mxu0  ;;  %5809 = vmatmul.mubr.bf16.vlgmr.msra.gmra.mxu0 %v10050_v16  ;;  %v8472_v21 = vcombine.high %v783_v58, %v787_v15  ;;  %v767_v34 = vld [vmem:[%s9952_s8 + $0xc18] sm:$0xff] }
 0x2f6   : > { %v5565_v44 = vadd.f32 %v5564_v36, %v1152_v43  ;;  %5859 = vmatpush1.bf16.msra.mxu0 %v8383_v54  ;;  %5890 = vmatprep.mubr.bf16.mxu0 %v10067_v28  ;;  %v8343_v54 = vcombine.low %v655_v14, %v659_v39  ;;  %v8471_v43 = vcombine.low %v783_v58, %v787_v15  ;;  %v771_v36 = vld [vmem:[%s9952_s8 + $0xc38] sm:$0xff]  ;;  %v10797_v14 = vmul.f32 0.70710677, %v10466_v35 }
 0x2f7   : > { %v5605_v45 = vpop.f32.mrf.mxu1  ;;  %5850 = vmatmul.mubr.bf16.vlgmr.msra.gmra.mxu1 %v10058_v20  ;;  %v5566_v46 = vpop.f32.mrf.mxu0  ;;  %5860 = vmatprep.subr.bf16.mxu0 %v8376_v31  ;;  %v8464_v31 = vcombine.high %v775_v53, %v779_v27  ;;  %v751_v4 = vld [vmem:[%s9952_s8 + $0xb98] sm:$0xff]  ;;  %v10800_v58 = vmul.f32 0.70710677, %v10688_v37 }
 0x2f8   : > { %5900 = vmatpush1.bf16.msra.mxu1 %v8511_v30  ;;  %v10754_v19 = vadd.f32 %v5605_v45, %v5565_v44  ;;  %v5567_v16 = vadd.f32 %v5566_v46, %v1153_v51  ;;  %5931 = vmatprep.mubr.bf16.mxu1 %v10073_v29  ;;  %v667_v29 = vld [vmem:[%s9952_s8 + $0x8f8] sm:$0xff]  ;;  %v8336_v30 = vcombine.high %v647_v23, %v651_v24  ;;  %v10807_v53 = vand.u32 2147483647, %v10797_v14 }
 0x2f9   : > { %v5607_v50 = vpop.f32.mrf.mxu1  ;;  %5901 = vmatprep.subr.bf16.mxu1 %v8504_v32  ;;  %v5568_v20 = vpop.f32.mrf.mxu0  ;;  %v8352_v17 = vcombine.high %v663_v5, %v667_v29  ;;  %v8351_v18 = vcombine.low %v663_v5, %v667_v29  ;;  %v639_v32 = vld [vmem:[%s9952_s8 + $0x818] sm:$0xff]  ;;  %v8335_v51 = vcombine.low %v647_v23, %v651_v24  ;;  %v8456_v44 = vcombine.high %v767_v34, %v771_v36 }
 0x2fa   : > { %v10762_v61 = vadd.f32 %v5607_v50, %v5567_v16  ;;  %5861 = vmatpush1.bf16.msra.mxu0 %v8375_v57  ;;  %v8328_v42 = vcombine.high %v639_v32, %v643_v33  ;;  %v759_v45 = vld [vmem:[%s9952_s8 + $0xbd8] sm:$0xff]  ;;  %v8455_v16 = vcombine.low %v767_v34, %v771_v36  ;;  %vm6199_vm0 = vcmp.ge.f32.partialorder %v10797_v14, 0.0 }
 0x2fb   : > { %v5609_v62 = vpop.f32.mrf.mxu1  ;;  %v5569_v1 = vpop.f32.mrf.mxu0  ;;  %5862 = vmatprep.subr.bf16.mxu0 %v8368_v48  ;;  %v763_v57 = vld [vmem:[%s9952_s8 + $0xbf8] sm:$0xff]  ;;  %v8327_v48 = vcombine.low %v639_v32, %v643_v33  ;;  %vm6201_vm1 = vcmp.ge.f32.partialorder %v10800_v58, 0.0 }
 0x2fc   : > { %5902 = vmatpush1.bf16.msra.mxu1 %v8503_v47  ;;  %v887_v46 = vld [vmem:[%s9952_s8 + $0xfd8] sm:$0xff]  ;;  %v8448_v50 = vcombine.high %v759_v45, %v763_v57  ;;  %v8447_v60 = vcombine.low %v759_v45, %v763_v57 }
 0x2fd   : > { %v5610_v28 = vpop.f32.mrf.mxu1  ;;  %5903 = vmatprep.subr.bf16.mxu1 %v8496_v52  ;;  %v891_v47 = vld [vmem:[%s9952_s8 + $0xff8] sm:$0xff] }
 0x2fe   : > { %5863 = vmatpush1.bf16.msra.mxu0 %v8367_v63  ;;  %v8576_v52 = vcombine.high %v887_v46, %v891_v47  ;;  %v755_v55 = vld [vmem:[%s9952_s8 + $0xbb8] sm:$0xff]  ;;  %v8575_v62 = vcombine.low %v887_v46, %v891_v47 }
 0x2ff   : > { %5864 = vmatprep.subr.bf16.mxu0 %v8360_v9  ;;  %v879_v20 = vld [vmem:[%s9952_s8 + $0xf98] sm:$0xff]  ;;  %v8440_v63 = vcombine.high %v751_v4, %v755_v55  ;;  %v8439_v5 = vcombine.low %v751_v4, %v755_v55 }
 0x300   : > { %5904 = vmatpush1.bf16.msra.mxu1 %v8495_v2  ;;  %v883_v56 = vld [vmem:[%s9952_s8 + $0xfb8] sm:$0xff] }
 0x301   : > { %5905 = vmatprep.subr.bf16.mxu1 %v8488_v3  ;;  %v8568_v1 = vcombine.high %v879_v20, %v883_v56  ;;  %v743_v2 = vld [vmem:[%s9952_s8 + $0xb58] sm:$0xff]  ;;  %v8567_v29 = vcombine.low %v879_v20, %v883_v56 }
 0x302   : > { %5865 = vmatpush1.bf16.msra.mxu0 %v8359_v11  ;;  %v747_v9 = vld [vmem:[%s9952_s8 + $0xb78] sm:$0xff] }
 0x303   : > { %5866 = vmatprep.subr.bf16.mxu0 %v8352_v17  ;;  %v871_v28 = vld [vmem:[%s9952_s8 + $0xf58] sm:$0xff]  ;;  %v8432_v8 = vcombine.high %v743_v2, %v747_v9  ;;  %v8431_v39 = vcombine.low %v743_v2, %v747_v9 }
 0x304   : > { %5906 = vmatpush1.bf16.msra.mxu1 %v8487_v12  ;;  %v875_v3 = vld [vmem:[%s9952_s8 + $0xf78] sm:$0xff] }
 0x305   : > { %5907 = vmatprep.subr.bf16.mxu1 %v8480_v13  ;;  %v8560_v10 = vcombine.high %v871_v28, %v875_v3  ;;  %v735_v11 = vld [vmem:[%s9952_s8 + $0xb18] sm:$0xff]  ;;  %v8559_v15 = vcombine.low %v871_v28, %v875_v3 }
 0x306   : > { %5867 = vmatpush1.bf16.msra.mxu0 %v8351_v18  ;;  %v739_v12 = vld [vmem:[%s9952_s8 + $0xb38] sm:$0xff] }
 0x307   : > { %5868 = vmatprep.subr.bf16.mxu0 %v8344_v25  ;;  %v863_v17 = vld [vmem:[%s9952_s8 + $0xf18] sm:$0xff]  ;;  %v8424_v18 = vcombine.high %v735_v11, %v739_v12  ;;  %v8423_v27 = vcombine.low %v735_v11, %v739_v12 }
 0x308   : > { %5908 = vmatpush1.bf16.msra.mxu1 %v8479_v59  ;;  %v867_v13 = vld [vmem:[%s9952_s8 + $0xf38] sm:$0xff] }
 0x309   : > { %5909 = vmatprep.subr.bf16.mxu1 %v8472_v21  ;;  %v8552_v59 = vcombine.high %v863_v17, %v867_v13  ;;  %v727_v25 = vld [vmem:[%s9952_s8 + $0xad8] sm:$0xff] }
 0x30a   : > { %5869 = vmatpush1.bf16.msra.mxu0 %v8343_v54  ;;  %v731_v21 = vld [vmem:[%s9952_s8 + $0xaf8] sm:$0xff]  ;;  %v10810_v54 = vand.u32 2147483647, %v10800_v58  ;;  %v6023_v58 = vmul.f32 0.5, %v10466_v35  ;;  %v9245_v35 = vld [vmem:[%s9954_s7 + $0x94] ss:$12 sps:$4 sm:$0xff]  }
 0x30b   : > { %5870 = vmatprep.subr.bf16.mxu0 %v8336_v30  ;;  %v855_v23 = vld [vmem:[%s9952_s8 + $0xed8] sm:$0xff]  ;;  %v8416_v30 = vcombine.high %v727_v25, %v731_v21 }
 0x30c   : > { %5910 = vmatpush1.bf16.msra.mxu1 %v8471_v43  ;;  %v859_v24 = vld [vmem:[%s9952_s8 + $0xef8] sm:$0xff]  ;;  %v8551_v43 = vcombine.low %v863_v17, %v867_v13 }
 0x30d   : > { %5911 = vmatprep.subr.bf16.mxu1 %v8464_v31  ;;  %v8544_v31 = vcombine.high %v855_v23, %v859_v24  ;;  %v719_v32 = vld [vmem:[%s9952_s8 + $0xa98] sm:$0xff] }
 0x30e   : > { %5871 = vmatpush1.bf16.msra.mxu0 %v8335_v51  ;;  %v723_v33 = vld [vmem:[%s9952_s8 + $0xab8] sm:$0xff]  ;;  %v6047_v51 = vmul.f32 0.3275911, %v10807_v53 }
 0x30f   : > { %5872 = vmatprep.subr.bf16.mxu0 %v8328_v42  ;;  %v847_v34 = vld [vmem:[%s9952_s8 + $0xe98] sm:$0xff]  ;;  %v6049_v42 = vmul.f32 0.3275911, %v10810_v54  ;;  %v8408_v45 = vcombine.high %v719_v32, %v723_v33 }
 0x310   : > { %5912 = vmatpush1.bf16.msra.mxu1 %v8463_v38  ;;  %v851_v36 = vld [vmem:[%s9952_s8 + $0xeb8] sm:$0xff]  ;;  %v8415_v38 = vcombine.low %v727_v25, %v731_v21 }
 0x311   : > { %5913 = vmatprep.subr.bf16.mxu1 %v8456_v44  ;;  %v8543_v44 = vcombine.low %v855_v23, %v859_v24  ;;  %v8536_v57 = vcombine.high %v847_v34, %v851_v36  ;;  %v711_v46 = vld [vmem:[%s9952_s8 + $0xa58] sm:$0xff]  ;;  %v6057_v4 = vadd.f32 1.0, %v6049_v42  ;;  %v8535_v55 = vcombine.low %v847_v34, %v851_v36 }
 0x312   : > { %5873 = vmatpush1.bf16.msra.mxu0 %v8327_v48  ;;  %v715_v47 = vld [vmem:[%s9952_s8 + $0xa78] sm:$0xff] }
 0x313   : > { %5874 = vmatprep.subr.bf16.mxu0 %v8448_v50  ;;  %v839_v48 = vld [vmem:[%s9952_s8 + $0xe58] sm:$0xff]  ;;  %v6055_v50 = vadd.f32 1.0, %v6047_v51  ;;  %v8400_v20 = vcombine.high %v711_v46, %v715_v47  ;;  %v8399_v2 = vcombine.low %v711_v46, %v715_v47 }
 0x314   : > { %5914 = vmatpush1.bf16.msra.mxu1 %v8455_v16  ;;  %v843_v16 = vld [vmem:[%s9952_s8 + $0xe78] sm:$0xff] }
 0x315   : > { %5915 = vmatprep.subr.bf16.mxu1 %v8576_v52  ;;  %v8407_v52 = vcombine.low %v719_v32, %v723_v33  ;;  %v8528_v56 = vcombine.high %v839_v48, %v843_v16  ;;  %9493 = vrcp.f32 %v6055_v50  ;;  %v8527_v9 = vcombine.low %v839_v48, %v843_v16  ;;  %v1067_v32 = vld [vmem:[%s9952_s8 + $0x1578] sm:$0xff] }
 0x316   : > { %5875 = vmatpush2.bf16.msra.mxu0 %v8447_v60  ;;  %v703_v60 = vld [vmem:[%s9952_s8 + $0xa18] sm:$0xff]  ;;  %9495 = vrcp.f32 %v6057_v4 }
 0x317   : > { %5876 = vmatprep.subr.bf16.mxu0 %v8440_v63  ;;  %v831_v63 = vld [vmem:[%s9952_s8 + $0xe18] sm:$0xff] }
 0x318   : > { %5916 = vmatpush2.bf16.msra.mxu1 %v8575_v62  ;;  %v707_v62 = vld [vmem:[%s9952_s8 + $0xa38] sm:$0xff] }
 0x319   : > { %5917 = vmatprep.subr.bf16.mxu1 %v8568_v1  ;;  %v835_v1 = vld [vmem:[%s9952_s8 + $0xe38] sm:$0xff]  ;;  %v8392_v28 = vcombine.high %v703_v60, %v707_v62  ;;  %v8391_v11 = vcombine.low %v703_v60, %v707_v62 }
 0x31a   : > { %5877 = vmatpush2.bf16.msra.mxu0 %v8439_v5  ;;  %v8520_v3 = vcombine.high %v831_v63, %v835_v1  ;;  %v951_v5 = vld [vmem:[%s9952_s8 + $0x11d8] sm:$0xff]  ;;  %v8519_v12 = vcombine.low %v831_v63, %v835_v1 }
 0x31b   : > { %5878 = vmatprep.subr.bf16.mxu0 %v8432_v8  ;;  %v1079_v8 = vld [vmem:[%s9952_s8 + $0x15d8] sm:$0xff] }
 0x31c   : > { %5918 = vmatpush2.bf16.msra.mxu1 %v8567_v29  ;;  %v955_v29 = vld [vmem:[%s9952_s8 + $0x11f8] sm:$0xff] }
 0x31d   : > { %5919 = vmatprep.subr.bf16.mxu1 %v8560_v10  ;;  %v1083_v10 = vld [vmem:[%s9952_s8 + $0x15f8] sm:$0xff]  ;;  %v8640_v17 = vcombine.high %v951_v5, %v955_v29  ;;  %v8639_v25 = vcombine.low %v951_v5, %v955_v29 }
 0x31e   : > { %5879 = vmatpush2.bf16.msra.mxu0 %v8431_v39  ;;  %v8768_v13 = vcombine.high %v1079_v8, %v1083_v10  ;;  %v943_v39 = vld [vmem:[%s9952_s8 + $0x1198] sm:$0xff]  ;;  %v8767_v21 = vcombine.low %v1079_v8, %v1083_v10 }
 0x31f   : > { %5880 = vmatprep.subr.bf16.mxu0 %v8424_v18  ;;  %v1071_v18 = vld [vmem:[%s9952_s8 + $0x1598] sm:$0xff] }
 0x320   : > { %5920 = vmatpush2.bf16.msra.mxu1 %v8559_v15  ;;  %v947_v15 = vld [vmem:[%s9952_s8 + $0x11b8] sm:$0xff] }
 0x321   : > { %5921 = vmatprep.subr.bf16.mxu1 %v8552_v59  ;;  %v1075_v59 = vld [vmem:[%s9952_s8 + $0x15b8] sm:$0xff]  ;;  %v8632_v23 = vcombine.high %v943_v39, %v947_v15  ;;  %v8631_v36 = vcombine.low %v943_v39, %v947_v15 }
 0x322   : > { %5881 = vmatpush2.bf16.msra.mxu0 %v8423_v27  ;;  %v8760_v24 = vcombine.high %v1071_v18, %v1075_v59  ;;  %v935_v27 = vld [vmem:[%s9952_s8 + $0x1158] sm:$0xff]  ;;  %v10841_v51 = vpop.eup %9493  ;;  %v8759_v42 = vcombine.low %v1071_v18, %v1075_v59 }
 0x323   : > { %5882 = vmatprep.subr.bf16.mxu0 %v8416_v30  ;;  %v927_v46 = vld [vmem:[%s9952_s8 + $0x1118] sm:$0xff] }
 0x324   : > { %5922 = vmatpush2.bf16.msra.mxu1 %v8551_v43  ;;  %v939_v43 = vld [vmem:[%s9952_s8 + $0x1178] sm:$0xff] }
 0x325   : > { %5923 = vmatprep.subr.bf16.mxu1 %v8544_v31  ;;  %v1063_v31 = vld [vmem:[%s9952_s8 + $0x1558] sm:$0xff] }
 0x326   : > { %5883 = vmatpush2.bf16.msra.mxu0 %v8415_v38  ;;  %v931_v47 = vld [vmem:[%s9952_s8 + $0x1138] sm:$0xff] }
 0x327   : > { %5884 = vmatprep.subr.bf16.mxu0 %v8408_v45  ;;  %v1055_v16 = vld [vmem:[%s9952_s8 + $0x1518] sm:$0xff] }
 0x328   : > { %5924 = vmatpush2.bf16.msra.mxu1 %v8543_v44  ;;  %v10843_v44 = vpop.eup %9495  ;;  %v1059_v50 = vld [vmem:[%s9952_s8 + $0x1538] sm:$0xff] }
 0x329   : > { %5925 = vmatprep.subr.bf16.mxu1 %v8536_v57  ;;  %v6081_v60 = vmul.f32 1.0614054, %v10843_v44  ;;  %v919_v63 = vld [vmem:[%s9952_s8 + $0x10d8] sm:$0xff]  ;;  %v8743_v5 = vcombine.low %v1055_v16, %v1059_v50 }
 0x32a   : > { %5885 = vmatpush2.bf16.msra.mxu0 %v8407_v52  ;;  %v923_v1 = vld [vmem:[%s9952_s8 + $0x10f8] sm:$0xff] }
 0x32b   : > { %5886 = vmatprep.subr.bf16.mxu0 %v8400_v20  ;;  %v8608_v29 = vcombine.high %v919_v63, %v923_v1  ;;  %v6089_v8 = vadd.f32 -1.4531521, %v6081_v60  ;;  %v8607_v39 = vcombine.low %v919_v63, %v923_v1  ;;  %v1147_v60 = vld [vmem:[%s9952_s8 + $0x17f8] sm:$0xff] }
 0x32c   : > { %5926 = vmatpush2.bf16.msra.mxu1 %v8535_v55  ;;  %v6079_v55 = vmul.f32 1.0614054, %v10841_v51 }
 0x32d   : > { %5927 = vmatprep.subr.bf16.mxu1 %v8528_v56  ;;  %v8616_v56 = vcombine.high %v927_v46, %v931_v47 }
 0x32e   : > { %5887 = vmatpush2.bf16.msra.mxu0 %v8399_v2  ;;  %v1047_v2 = vld [vmem:[%s9952_s8 + $0x14d8] sm:$0xff] }
 0x32f   : > { %5888 = vmatprep.subr.bf16.mxu0 %v8392_v28  ;;  %v8615_v28 = vcombine.low %v927_v46, %v931_v47  ;;  %v1023_v46 = vld [vmem:[%s9952_s8 + $0x1418] sm:$0xff] }
 0x330   : > { %5928 = vmatpush2.bf16.msra.mxu1 %v8527_v9  ;;  %v1051_v9 = vld [vmem:[%s9952_s8 + $0x14f8] sm:$0xff] }
 0x331   : > { %5929 = vmatprep.subr.bf16.mxu1 %v8520_v3  ;;  %v6087_v3 = vadd.f32 -1.4531521, %v6079_v55  ;;  %v8736_v10 = vcombine.high %v1047_v2, %v1051_v9  ;;  %v8735_v18 = vcombine.low %v1047_v2, %v1051_v9  ;;  %v1027_v47 = vld [vmem:[%s9952_s8 + $0x1438] sm:$0xff] }
 0x332   : > { %5889 = vmatpush2.bf16.msra.mxu0 %v8391_v11  ;;  %v911_v11 = vld [vmem:[%s9952_s8 + $0x1098] sm:$0xff]  ;;  %v8712_v55 = vcombine.high %v1023_v46, %v1027_v47  ;;  %v8711_v63 = vcombine.low %v1023_v46, %v1027_v47 }
 0x333   : > { %5940 = vmatprep.subr.bf16.mxu0 %v8640_v17  ;;  %v1039_v17 = vld [vmem:[%s9952_s8 + $0x1498] sm:$0xff]  ;;  %v6095_v15 = vmul.f32 %v10841_v51, %v6087_v3 }
 0x334   : > { %5930 = vmatpush2.bf16.msra.mxu1 %v8519_v12  ;;  %v915_v12 = vld [vmem:[%s9952_s8 + $0x10b8] sm:$0xff] }
 0x335   : > { %5981 = vmatprep.subr.bf16.mxu1 %v8768_v13  ;;  %v5646_v30 = vpop.f32.mrf.mxu0  ;;  %5891 = vmatmul.mubr.bf16.vlgmr.msra.gmra.mxu0 %v10144_v40  ;;  %v8624_v40 = vcombine.high %v935_v27, %v939_v43  ;;  %v1043_v13 = vld [vmem:[%s9952_s8 + $0x14b8] sm:$0xff]  ;;  %v8600_v59 = vcombine.high %v911_v11, %v915_v12 }
 0x336   : > { %v5647_v33 = vadd.f32 %v5646_v30, %v10754_v19  ;;  %5941 = vmatpush1.bf16.msra.mxu0 %v8639_v25  ;;  %5972 = vmatprep.mubr.bf16.mxu0 %v10156_v49  ;;  %v8751_v49 = vcombine.low %v1063_v31, %v1067_v32  ;;  %v6097_v25 = vmul.f32 %v10843_v44, %v6089_v8  ;;  %v1031_v30 = vld [vmem:[%s9952_s8 + $0x1458] sm:$0xff] }
 0x337   : > { %v5687_v34 = vpop.f32.mrf.mxu1  ;;  %5932 = vmatmul.mubr.bf16.vlgmr.msra.gmra.mxu1 %v10148_v41  ;;  %v5648_v38 = vpop.f32.mrf.mxu0  ;;  %5942 = vmatprep.subr.bf16.mxu0 %v8632_v23  ;;  %v8752_v41 = vcombine.high %v1063_v31, %v1067_v32  ;;  %v8728_v23 = vcombine.high %v1039_v17, %v1043_v13  ;;  %v1035_v31 = vld [vmem:[%s9952_s8 + $0x1478] sm:$0xff]  ;;  %v8599_v32 = vcombine.low %v911_v11, %v915_v12 }
 0x338   : > { %5982 = vmatpush1.bf16.msra.mxu1 %v8767_v21  ;;  %v10845_v45 = vadd.f32 %v5687_v34, %v5647_v33  ;;  %v5649_v19 = vadd.f32 %v5648_v38, %v10762_v61  ;;  %6013 = vmatprep.mubr.bf16.mxu1 %v10161_v22  ;;  %v8623_v61 = vcombine.low %v935_v27, %v939_v43  ;;  %v6151_v21 = vsub.f32 0.0, %v10807_v53  ;;  %v907_v27 = vld [vmem:[%s9952_s8 + $0x1078] sm:$0xff] }
 0x339   : > { %v5689_v57 = vpop.f32.mrf.mxu1  ;;  %5983 = vmatprep.subr.bf16.mxu1 %v8760_v24  ;;  %v5650_v48 = vpop.f32.mrf.mxu0  ;;  %v8744_v22 = vcombine.high %v1055_v16, %v1059_v50  ;;  %v903_v24 = vld [vmem:[%s9952_s8 + $0x1058] sm:$0xff]  ;;  %v6153_v43 = vsub.f32 0.0, %v10810_v54  ;;  %v6103_v33 = vadd.f32 1.4214138, %v6095_v15  ;;  %v8727_v34 = vcombine.low %v1039_v17, %v1043_v13 }
 0x33a   : > { %v10854_v52 = vadd.f32 %v5689_v57, %v5649_v19  ;;  %5943 = vmatpush1.bf16.msra.mxu0 %v8631_v36  ;;  %v8592_v36 = vcombine.high %v903_v24, %v907_v27  ;;  %v6105_v38 = vadd.f32 1.4214138, %v6097_v25  ;;  %v895_v19 = vld [vmem:[%s9952_s8 + $0x1018] sm:$0xff]  ;;  %v8591_v48 = vcombine.low %v903_v24, %v907_v27 }
 0x33b   : > { %v5691_v4 = vpop.f32.mrf.mxu1  ;;  %v5651_v20 = vpop.f32.mrf.mxu0  ;;  %5944 = vmatprep.subr.bf16.mxu0 %v8624_v40  ;;  %v8720_v40 = vcombine.high %v1031_v30, %v1035_v31  ;;  %v899_v57 = vld [vmem:[%s9952_s8 + $0x1038] sm:$0xff]  ;;  %v6111_v16 = vmul.f32 %v10841_v51, %v6103_v33  ;;  %v8719_v50 = vcombine.low %v1031_v30, %v1035_v31  ;;  %v10902_v33 = vmul.f32 0.70710677, %v10679_v0 }
 0x33c   : > { %5984 = vmatpush1.bf16.msra.mxu1 %v8759_v42  ;;  %v6159_v42 = vmul.f32 %v6151_v21, %v10807_v53  ;;  %v8584_v53 = vcombine.high %v895_v19, %v899_v57  ;;  %v6113_v4 = vmul.f32 %v10843_v44, %v6105_v38  ;;  %v1015_v20 = vld [vmem:[%s9952_s8 + $0x13d8] sm:$0xff] }
 0x33d   : > { %v5692_v62 = vpop.f32.mrf.mxu1  ;;  %5985 = vmatprep.subr.bf16.mxu1 %v8752_v41  ;;  %v6161_v41 = vmul.f32 %v6153_v43, %v10810_v54  ;;  %v1019_v54 = vld [vmem:[%s9952_s8 + $0x13f8] sm:$0xff]  ;;  %v10897_v43 = vmul.f32 0.70710677, %v10457_v26  ;;  %vm6200_vm3 = vcmp.ge.f32.partialorder %v10902_v33, 0.0 }
 0x33e   : > { %5945 = vmatpush1.bf16.msra.mxu0 %v8623_v61  ;;  %v6168_v61 = vmul.f32 1.442695, %v6159_v42  ;;  %v8583_v62 = vcombine.low %v895_v19, %v899_v57  ;;  %v8704_v1 = vcombine.high %v1015_v20, %v1019_v54  ;;  %v6121_v2 = vadd.f32 -0.28449672, %v6113_v4  ;;  %v1011_v3 = vld [vmem:[%s9952_s8 + $0x13b8] sm:$0xff] }
 0x33f   : > { %5946 = vmatprep.subr.bf16.mxu0 %v8616_v56  ;;  %v1143_v56 = vld [vmem:[%s9952_s8 + $0x17d8] sm:$0xff]  ;;  %v8703_v8 = vcombine.low %v1015_v20, %v1019_v54  ;;  %vm6198_vm2 = vcmp.ge.f32.partialorder %v10897_v43, 0.0 }
 0x340   : > { %5986 = vmatpush1.bf16.msra.mxu1 %v8751_v49  ;;  %v6172_v49 = vmul.f32 1.442695, %v6161_v41  ;;  %9497 = vpow2.f32 %v6168_v61  ;;  %v8832_v9 = vcombine.high %v1143_v56, %v1147_v60  ;;  %v8831_v11 = vcombine.low %v1143_v56, %v1147_v60  ;;  %v1003_v15 = vld [vmem:[%s9952_s8 + $0x1378] sm:$0xff] }
 0x341   : > { %5987 = vmatprep.subr.bf16.mxu1 %v8744_v22  ;;  %v6119_v22 = vadd.f32 -0.28449672, %v6111_v16  ;;  %v6129_v17 = vmul.f32 %v10843_v44, %v6121_v2  ;;  %v991_v31 = vld [vmem:[%s9952_s8 + $0x1318] sm:$0xff]  ;;  %v10909_v41 = vand.u32 2147483647, %v10897_v43 }
 0x342   : > { %5947 = vmatpush1.bf16.msra.mxu0 %v8615_v28  ;;  %v1007_v28 = vld [vmem:[%s9952_s8 + $0x1398] sm:$0xff]  ;;  %9499 = vpow2.f32 %v6172_v49 }
 0x343   : > { %5948 = vmatprep.subr.bf16.mxu0 %v8608_v29  ;;  %v1139_v29 = vld [vmem:[%s9952_s8 + $0x17b8] sm:$0xff]  ;;  %v8696_v12 = vcombine.high %v1007_v28, %v1011_v3  ;;  %v8695_v25 = vcombine.low %v1007_v28, %v1011_v3  ;;  %v6137_v27 = vadd.f32 0.2548296, %v6129_v17  ;;  %v6046_v49 = vmul.f32 0.3275911, %v10909_v41 }
 0x344   : > { %5988 = vmatpush1.bf16.msra.mxu1 %v8743_v5  ;;  %v1135_v5 = vld [vmem:[%s9952_s8 + $0x1798] sm:$0xff] }
 0x345   : > { %5989 = vmatprep.subr.bf16.mxu1 %v8736_v10  ;;  %v6127_v10 = vmul.f32 %v10841_v51, %v6119_v22  ;;  %v8824_v13 = vcombine.high %v1135_v5, %v1139_v29  ;;  %v6145_v57 = vmul.f32 %v10843_v44, %v6137_v27  ;;  %v983_v47 = vld [vmem:[%s9952_s8 + $0x12d8] sm:$0xff] }
 0x346   : > { %5949 = vmatpush1.bf16.msra.mxu0 %v8607_v39  ;;  %v999_v39 = vld [vmem:[%s9952_s8 + $0x1358] sm:$0xff] }
 0x347   : > { %5950 = vmatprep.subr.bf16.mxu0 %v8600_v59  ;;  %v1131_v59 = vld [vmem:[%s9952_s8 + $0x1778] sm:$0xff]  ;;  %v6135_v21 = vadd.f32 0.2548296, %v6127_v10  ;;  %v8688_v24 = vcombine.high %v999_v39, %v1003_v15  ;;  %v8687_v38 = vcombine.low %v999_v39, %v1003_v15 }
 0x348   : > { %5990 = vmatpush1.bf16.msra.mxu1 %v8735_v18  ;;  %v1127_v18 = vld [vmem:[%s9952_s8 + $0x1758] sm:$0xff] }
 0x349   : > { %5991 = vmatprep.subr.bf16.mxu1 %v8728_v23  ;;  %v8823_v23 = vcombine.low %v1135_v5, %v1139_v29  ;;  %v8816_v30 = vcombine.high %v1127_v18, %v1131_v59  ;;  %v6143_v42 = vmul.f32 %v10841_v51, %v6135_v21  ;;  %v1111_v51 = vld [vmem:[%s9952_s8 + $0x16d8] sm:$0xff]  ;;  %v6054_v29 = vadd.f32 1.0, %v6046_v49 }
 0x34a   : > { %5951 = vmatpush1.bf16.msra.mxu0 %v8599_v32  ;;  %v995_v32 = vld [vmem:[%s9952_s8 + $0x1338] sm:$0xff] }
 0x34b   : > { %5952 = vmatprep.subr.bf16.mxu0 %v8592_v36  ;;  %v1123_v36 = vld [vmem:[%s9952_s8 + $0x1738] sm:$0xff]  ;;  %v8680_v19 = vcombine.high %v991_v31, %v995_v32  ;;  %v8679_v44 = vcombine.low %v991_v31, %v995_v32  ;;  %9501 = vrcp.f32 %v6054_v29 }
 0x34c   : > { %5992 = vmatpush1.bf16.msra.mxu1 %v8727_v34  ;;  %v1119_v34 = vld [vmem:[%s9952_s8 + $0x1718] sm:$0xff] }
 0x34d   : > { %5993 = vmatprep.subr.bf16.mxu1 %v8720_v40  ;;  %v8815_v40 = vcombine.low %v1127_v18, %v1131_v59  ;;  %v8808_v46 = vcombine.high %v1119_v34, %v1123_v36  ;;  %v9498_v16 = vpop.eup %9497  ;;  %v975_v60 = vld [vmem:[%s9952_s8 + $0x1298] sm:$0xff] }
 0x34e   : > { %5953 = vmatpush1.bf16.msra.mxu0 %v8591_v48  ;;  %v987_v48 = vld [vmem:[%s9952_s8 + $0x12f8] sm:$0xff]  ;;  %v6183_v61 = vmul.f32 %v9498_v16, %v6143_v42 }
 0x34f   : > { %5954 = vmatprep.subr.bf16.mxu0 %v8584_v53  ;;  %v1115_v53 = vld [vmem:[%s9952_s8 + $0x16f8] sm:$0xff]  ;;  %v9500_v4 = vpop.eup %9499  ;;  %v8672_v20 = vcombine.high %v983_v47, %v987_v48  ;;  %v8671_v2 = vcombine.low %v983_v47, %v987_v48  ;;  %v6025_v47 = vmul.f32 0.5, %v10688_v37 }
 0x350   : > { %5994 = vmatpush1.bf16.msra.mxu1 %v8719_v50  ;;  %v10914_v50 = vand.u32 2147483647, %v10902_v33  ;;  %v6185_v54 = vmul.f32 %v9500_v4, %v6145_v57  ;;  %v8800_v56 = vcombine.high %v1111_v51, %v1115_v53  ;;  %v8799_v28 = vcombine.low %v1111_v51, %v1115_v53  ;;  %v967_v10 = vld [vmem:[%s9952_s8 + $0x1258] sm:$0xff]  ;;  %v9237_v51 = vld [vmem:[%s9954_s7 + $0xa8] ss:$12 sps:$4 sm:$0xff]  }
 0x351   : > { %5995 = vmatprep.subr.bf16.mxu1 %v8712_v55  ;;  %v8807_v55 = vcombine.low %v1119_v34, %v1123_v36  ;;  %v1095_v17 = vld [vmem:[%s9952_s8 + $0x1658] sm:$0xff]  ;;  %v9240_v4 = vld [vmem:[%s9954_s7 + $0x228] ss:$12 sps:$4 sm:$0xff]  }
 0x352   : > { %5955 = vmatpush1.bf16.msra.mxu0 %v8583_v62  ;;  %v979_v62 = vld [vmem:[%s9952_s8 + $0x12b8] sm:$0xff]  ;;  %v6048_v22 = vmul.f32 0.3275911, %v10914_v50  ;;  %v6193_v5 = vsub.f32 1.0, %v6185_v54 }
 0x353   : > { %5956 = vmatprep.subr.bf16.mxu0 %v8704_v1  ;;  %v1107_v1 = vld [vmem:[%s9952_s8 + $0x16b8] sm:$0xff]  ;;  %v8664_v3 = vcombine.high %v975_v60, %v979_v62  ;;  %v8663_v39 = vcombine.low %v975_v60, %v979_v62 }
 0x354   : > { %5996 = vmatpush1.bf16.msra.mxu1 %v8711_v63  ;;  %v1103_v63 = vld [vmem:[%s9952_s8 + $0x1698] sm:$0xff] }
 0x355   : > { %5997 = vmatprep.subr.bf16.mxu1 %v8832_v9  ;;  %v6191_v9 = vsub.f32 1.0, %v6183_v61  ;;  %v8791_v18 = vcombine.low %v1103_v63, %v1107_v1  ;;  %v1087_v27 = vld [vmem:[%s9952_s8 + $0x1618] sm:$0xff] }
 0x356   : > { %5957 = vmatpush2.bf16.msra.mxu0 %v8703_v8  ;;  %v8792_v8 = vcombine.high %v1103_v63, %v1107_v1  ;;  %v9242_v48 = vld [vmem:[%s9954_s7 + $0x22c] ss:$12 sps:$4 sm:$0xff]   ;;  %v9243_v60 = vld [vmem:[%s9954_s7 + $0x90] ss:$12 sps:$4 sm:$0xff]  }
 0x357   : > { %5958 = vmatprep.subr.bf16.mxu0 %v8696_v12  ;;  %v6056_v12 = vadd.f32 1.0, %v6048_v22  ;;  %v6207_v15 = vsub.f32 0.0, %v6191_v9  ;;  %v9251_v22 = vld [vmem:[%s9954_s7 + $0x7c] ss:$12 sps:$4 sm:$0xff]   ;;  %v9249_v29 = vld [vmem:[%s9954_s7 + $0x78] ss:$12 sps:$4 sm:$0xff]  }
 0x358   : > { %5998 = vmatpush2.bf16.msra.mxu1 %v8831_v11  ;;  %v971_v11 = vld [vmem:[%s9952_s8 + $0x1278] sm:$0xff] }
 0x359   : > { %5999 = vmatprep.subr.bf16.mxu1 %v8824_v13  ;;  %v1099_v13 = vld [vmem:[%s9952_s8 + $0x1678] sm:$0xff]  ;;  %v8656_v59 = vcombine.high %v967_v10, %v971_v11  ;;  %9503 = vrcp.f32 %v6056_v12  ;;  %v8655_v31 = vcombine.low %v967_v10, %v971_v11  ;;  %v6215_v32 = vsel %vm6199_vm0, %v6191_v9, %v6207_v15  ;;  %v9257_v10 = vld [vmem:[%s9954_s7 + $0x64] ss:$12 sps:$4 sm:$0xff]  }
 0x35a   : > { %5959 = vmatpush2.bf16.msra.mxu0 %v8695_v25  ;;  %v6209_v25 = vsub.f32 0.0, %v6193_v5  ;;  %v8784_v21 = vcombine.high %v1095_v17, %v1099_v13  ;;  %v8783_v34 = vcombine.low %v1095_v17, %v1099_v13  ;;  %v9260_v13 = vld [vmem:[%s9954_s7 + $0x1e4] ss:$12 sps:$4 sm:$0xff]  }
 0x35b   : > { %5960 = vmatprep.subr.bf16.mxu0 %v8688_v24  ;;  %v963_v24 = vld [vmem:[%s9952_s8 + $0x1238] sm:$0xff] }
 0x35c   : > { %6000 = vmatpush2.bf16.msra.mxu1 %v8823_v23  ;;  %v959_v23 = vld [vmem:[%s9952_s8 + $0x1218] sm:$0xff] }
 0x35d   : > { %6001 = vmatprep.subr.bf16.mxu1 %v8816_v30  ;;  %v1091_v30 = vld [vmem:[%s9952_s8 + $0x1638] sm:$0xff]  ;;  %v8648_v36 = vcombine.high %v959_v23, %v963_v24  ;;  %v8647_v14 = vcombine.low %v959_v23, %v963_v24 }
 0x35e   : > { %5961 = vmatpush2.bf16.msra.mxu0 %v8687_v38  ;;  %v6217_v38 = vsel %vm6201_vm1, %v6193_v5, %v6209_v25  ;;  %v8776_v42 = vcombine.high %v1087_v27, %v1091_v30  ;;  %v8775_v57 = vcombine.low %v1087_v27, %v1091_v30  ;;  %v9263_v25 = vld [vmem:[%s9954_s7 + $0x4c] ss:$12 sps:$4 sm:$0xff]   ;;  %v6150_v30 = vsub.f32 0.0, %v10909_v41 }
 0x35f   : > { %5962 = vmatprep.subr.bf16.mxu0 %v8680_v19  ;;  %v6225_v19 = vadd.f32 1.0, %v6217_v38  ;;  %v9266_v24 = vld [vmem:[%s9954_s7 + $0x1cc] ss:$12 sps:$4 sm:$0xff]   ;;  %v9269_v38 = vld [vmem:[%s9954_s7 + $0x34] ss:$12 sps:$4 sm:$0xff]  }
 0x360   : > { %6002 = vmatpush2.bf16.msra.mxu1 %v8815_v40  ;;  %v6223_v40 = vadd.f32 1.0, %v6215_v32  ;;  %v9321_v43 = vld [vmem:[%s9954_s7 + $0xd8] ss:$12 sps:$4 sm:$0xff]  }
 0x361   : > { %6003 = vmatprep.subr.bf16.mxu1 %v8808_v46  ;;  %v9239_v46 = vld [vmem:[%s9954_s7 + $0xac] ss:$12 sps:$4 sm:$0xff]   ;;  %v6233_v53 = vmul.f32 %v6225_v19, %v6025_v47  ;;  %v6158_v19 = vmul.f32 %v6150_v30, %v10909_v41  ;;  %v9275_v47 = vld [vmem:[%s9954_s7 + $0x1c] ss:$12 sps:$4 sm:$0xff]  }
 0x362   : > { %5963 = vmatpush2.bf16.msra.mxu0 %v8679_v44  ;;  %v6231_v16 = vmul.f32 %v6223_v40, %v6023_v58  ;;  %v10941_v44 = vpop.eup %9501  ;;  %v9272_v40 = vld [vmem:[%s9954_s7 + $0x1b4] ss:$12 sps:$4 sm:$0xff]  }
 0x363   : > { %5964 = vmatprep.subr.bf16.mxu0 %v8672_v20  ;;  %v6078_v63 = vmul.f32 1.0614054, %v10941_v44 }
 0x364   : > { %6004 = vmatpush2.bf16.msra.mxu1 %v8807_v55  ;;  %v10944_v37 = vpack.c.bf16 %v6231_v16, %v6231_v16  ;;  %v9248_v55 = vld [vmem:[%s9954_s7 + $0x214] ss:$12 sps:$4 sm:$0xff]   ;;  %v9278_v16 = vld [vmem:[%s9954_s7 + $0x19c] ss:$12 sps:$4 sm:$0xff]  }
 0x365   : > { %6005 = vmatprep.subr.bf16.mxu1 %v8800_v56  ;;  %v10951_v56 = vpack.c.bf16 %v6233_v53, %v6233_v53  ;;  %v6086_v11 = vadd.f32 -1.4531521, %v6078_v63  ;;  %v6166_v53 = vmul.f32 1.442695, %v6158_v19  ;;  %v9306_v19 = vld [vmem:[%s9954_s7 + $0x2a0] ss:$12 sps:$4 sm:$0xff]  }
 0x366   : > { %5965 = vmatpush2.bf16.msra.mxu0 %v8671_v2  ;;  %v10947_v20 = vpop.eup %9503  ;;  %v9254_v2 = vld [vmem:[%s9954_s7 + $0x1fc] ss:$12 sps:$4 sm:$0xff]  }
 0x367   : > { %5966 = vmatprep.subr.bf16.mxu0 %v8664_v3  ;;  %v6080_v9 = vmul.f32 1.0614054, %v10947_v20 }
 0x368   : > { %6006 = vmatpush2.bf16.msra.mxu1 %v8799_v28 }
 0x369   : > { %6007 = vmatprep.subr.bf16.mxu1 %v8792_v8 }
 0x36a   : > { %5967 = vmatpush2.bf16.msra.mxu0 %v8663_v39  ;;  %v6088_v39 = vadd.f32 -1.4531521, %v6080_v9  ;;  %v9285_v9 = vld [vmem:[%s9954_s7 + $0x168] ss:$12 sps:$4 sm:$0xff]  }
 0x36b   : > { %5968 = vmatprep.subr.bf16.mxu0 %v8656_v59  ;;  %v9258_v59 = vld [vmem:[%s9954_s7 + $0x1e0] ss:$12 sps:$4 sm:$0xff]  }
 0x36c   : > { %6008 = vmatpush2.bf16.msra.mxu1 %v8791_v18  ;;  %v9255_v18 = vld [vmem:[%s9954_s7 + $0x60] ss:$12 sps:$4 sm:$0xff]   ;;  %v6096_v27 = vmul.f32 %v10947_v20, %v6088_v39  ;;  %v9294_v39 = vld [vmem:[%s9954_s7 + $0x2d0] ss:$12 sps:$4 sm:$0xff]  }
 0x36d   : > { %6009 = vmatprep.subr.bf16.mxu1 %v8784_v21  ;;  %v6094_v21 = vmul.f32 %v10941_v44, %v6086_v11 }
 0x36e   : > { %5969 = vmatpush2.bf16.msra.mxu0 %v8655_v31  ;;  %v6152_v31 = vsub.f32 0.0, %v10914_v50 }
 0x36f   : > { %5970 = vmatprep.subr.bf16.mxu0 %v8648_v36  ;;  %v9264_v36 = vld [vmem:[%s9954_s7 + $0x1c8] ss:$12 sps:$4 sm:$0xff]  }
 0x370   : > { %6010 = vmatpush2.bf16.msra.mxu1 %v8783_v34  ;;  %v9261_v34 = vld [vmem:[%s9954_s7 + $0x48] ss:$12 sps:$4 sm:$0xff]   ;;  %v6160_v58 = vmul.f32 %v6152_v31, %v10914_v50  ;;  %v9273_v50 = vld [vmem:[%s9954_s7 + $0x18] ss:$12 sps:$4 sm:$0xff]  }
 0x371   : > { %6011 = vmatprep.subr.bf16.mxu1 %v8776_v42  ;;  %v6102_v42 = vadd.f32 1.4214138, %v6094_v21  ;;  %v9302_v21 = vld [vmem:[%s9954_s7 + $0x2bc] ss:$12 sps:$4 sm:$0xff]   ;;  %v9300_v31 = vld [vmem:[%s9954_s7 + $0x2b8] ss:$12 sps:$4 sm:$0xff]  }
 0x372   : > { %5971 = vmatpush2.bf16.msra.mxu0 %v8647_v14  ;;  %v6104_v14 = vadd.f32 1.4214138, %v6096_v27  ;;  %v6170_v41 = vmul.f32 1.442695, %v6160_v58  ;;  %v9297_v27 = vld [vmem:[%s9954_s7 + $0x138] ss:$12 sps:$4 sm:$0xff]  }
 0x373   : > { %7526 = vmatprep.subr.bf16.mxu0 %v9239_v46  ;;  %v9270_v46 = vld [vmem:[%s9954_s7 + $0x1b0] ss:$12 sps:$4 sm:$0xff]   ;;  %v9311_v58 = vld [vmem:[%s9954_s7 + $0x10c] ss:$12 sps:$4 sm:$0xff]  }
 0x374   : > { %6012 = vmatpush2.bf16.msra.mxu1 %v8775_v57  ;;  %v9267_v57 = vld [vmem:[%s9954_s7 + $0x30] ss:$12 sps:$4 sm:$0xff]  }
 0x375   : > { %7567 = vmatprep.subr.bf16.mxu1 %v9242_v48  ;;  %v5728_v61 = vpop.f32.mrf.mxu0  ;;  %5973 = vmatmul.mubr.bf16.vlgmr.msra.gmra.mxu0 %v10228_v6  ;;  %v9246_v6 = vld [vmem:[%s9954_s7 + $0x210] ss:$12 sps:$4 sm:$0xff]   ;;  %v6110_v48 = vmul.f32 %v10941_v44, %v6102_v42 }
 0x376   : > { %v5729_v54 = vadd.f32 %v5728_v61, %v10845_v45  ;;  %7527 = vmatpush1.bf16.msra.mxu0 %v9237_v51  ;;  %7558 = vmatprep.mubr.bf16.mxu0 %v10944_v37  ;;  %v6112_v51 = vmul.f32 %v10947_v20, %v6104_v14  ;;  %v9281_v61 = vld [vmem:[%s9954_s7 + $0x4] ss:$12 sps:$4 sm:$0xff]   ;;  %v9303_v14 = vld [vmem:[%s9954_s7 + $0x120] ss:$12 sps:$4 sm:$0xff]  }
 0x377   : > { %v5769_v49 = vpop.f32.mrf.mxu1  ;;  %6014 = vmatmul.mubr.bf16.vlgmr.msra.gmra.mxu1 %v10232_v7  ;;  %v5730_v62 = vpop.f32.mrf.mxu0  ;;  %7528 = vmatprep.subr.bf16.mxu0 %v9245_v35  ;;  %v9276_v35 = vld [vmem:[%s9954_s7 + $0x198] ss:$12 sps:$4 sm:$0xff]  }
 0x378   : > { %7568 = vmatpush1.bf16.msra.mxu1 %v9240_v4  ;;  %v10958_v1 = vadd.f32 %v5769_v49, %v5729_v54  ;;  %7599 = vmatprep.mubr.bf16.mxu1 %v10951_v56  ;;  %v5731_v7 = vadd.f32 %v5730_v62, %v10854_v52  ;;  %v9252_v52 = vld [vmem:[%s9954_s7 + $0x1f8] ss:$12 sps:$4 sm:$0xff]   ;;  %v6120_v49 = vadd.f32 -0.28449672, %v6112_v51 }
 0x379   : > { %v5771_v45 = vpop.f32.mrf.mxu1  ;;  %v5732_v28 = vpop.f32.mrf.mxu0  ;;  %7569 = vmatprep.subr.bf16.mxu1 %v9248_v55  ;;  %v6118_v55 = vadd.f32 -0.28449672, %v6110_v48  ;;  %v9284_v54 = vld [vmem:[%s9954_s7 + $0x184] ss:$12 sps:$4 sm:$0xff]   ;;  %v9314_v48 = vld [vmem:[%s9954_s7 + $0x28c] ss:$12 sps:$4 sm:$0xff]  }
 0x37a   : > { %v10964_v3 = vadd.f32 %v5771_v45, %v5731_v7  ;;  %7529 = vmatpush1.bf16.msra.mxu0 %v9243_v60  ;;  %v9279_v60 = vld [vmem:[%s9954_s7] ss:$12 sps:$4 sm:$0xff]   ;;  %v6128_v45 = vmul.f32 %v10947_v20, %v6120_v49  ;;  %v9288_v28 = vld [vmem:[%s9954_s7 + $0x2e8] ss:$12 sps:$4 sm:$0xff]  }
 0x37b   : > { %v5773_v5 = vpop.f32.mrf.mxu1  ;;  %v5733_v8 = vpop.f32.mrf.mxu0  ;;  %7530 = vmatprep.subr.bf16.mxu0 %v9251_v22  ;;  %v9287_v22 = vld [vmem:[%s9954_s7 + $0x16c] ss:$12 sps:$4 sm:$0xff]   ;;  %v6126_v63 = vmul.f32 %v10941_v44, %v6118_v55 }
 0x37c   : > { %7570 = vmatpush1.bf16.msra.mxu1 %v9246_v6  ;;  %v10970_v12 = vmul.f32 0.70710677, %v10964_v3  ;;  %v9282_v6 = vld [vmem:[%s9954_s7 + $0x180] ss:$12 sps:$4 sm:$0xff]   ;;  %v6136_v11 = vadd.f32 0.2548296, %v6128_v45 }
 0x37d   : > { %v5774_v17 = vpop.f32.mrf.mxu1  ;;  %7571 = vmatprep.subr.bf16.mxu1 %v9254_v2  ;;  %v9290_v7 = vld [vmem:[%s9954_s7 + $0x2ec] ss:$12 sps:$4 sm:$0xff]   ;;  %v9326_v45 = vld [vmem:[%s9954_s7 + $0x25c] ss:$12 sps:$4 sm:$0xff]  }
 0x37e   : > { %v6043_v15 = vand.u32 2147483647, %v10970_v12  ;;  %7531 = vmatpush1.bf16.msra.mxu0 %v9249_v29  ;;  %v9293_v29 = vld [vmem:[%s9954_s7 + $0x154] ss:$12 sps:$4 sm:$0xff]   ;;  %vm6203_vm4 = vcmp.ge.f32.partialorder %v10970_v12, 0.0  ;;  %v6024_v12 = vmul.f32 0.5, %v10679_v0 }
 0x37f   : > { %7532 = vmatprep.subr.bf16.mxu0 %v9257_v10  ;;  %v9296_v10 = vld [vmem:[%s9954_s7 + $0x2d4] ss:$12 sps:$4 sm:$0xff]  }
 0x380   : > { %7572 = vmatpush1.bf16.msra.mxu1 %v9252_v52  ;;  %v6051_v23 = vmul.f32 0.3275911, %v6043_v15  ;;  %v6155_v4 = vsub.f32 0.0, %v6043_v15  ;;  %v6134_v52 = vadd.f32 0.2548296, %v6126_v63 }
 0x381   : > { %7573 = vmatprep.subr.bf16.mxu1 %v9260_v13  ;;  %v9291_v13 = vld [vmem:[%s9954_s7 + $0x150] ss:$12 sps:$4 sm:$0xff]   ;;  %v9333_v0 = vld [vmem:[%s9954_s7 + $0x3a8] ss:$12 sps:$4 sm:$0xff]  }
 0x382   : > { %v6059_v32 = vadd.f32 1.0, %v6051_v23  ;;  %7533 = vmatpush1.bf16.msra.mxu0 %v9255_v18  ;;  %v6163_v62 = vmul.f32 %v6155_v4, %v6043_v15  ;;  %v9299_v15 = vld [vmem:[%s9954_s7 + $0x13c] ss:$12 sps:$4 sm:$0xff]   ;;  %v6144_v23 = vmul.f32 %v10947_v20, %v6136_v11  ;;  %v9308_v20 = vld [vmem:[%s9954_s7 + $0x2a4] ss:$12 sps:$4 sm:$0xff]  }
 0x383   : > { %7534 = vmatprep.subr.bf16.mxu0 %v9263_v25  ;;  %v11013_v25 = vmul.f32 0.70710677, %v10958_v1 }
 0x384   : > { %7574 = vmatpush1.bf16.msra.mxu1 %v9258_v59  ;;  %9505 = vrcp.f32 %v6059_v32  ;;  %v6176_v5 = vmul.f32 1.442695, %v6163_v62  ;;  %v6142_v59 = vmul.f32 %v10941_v44, %v6134_v52  ;;  %v9305_v32 = vld [vmem:[%s9954_s7 + $0x124] ss:$12 sps:$4 sm:$0xff]  }
 0x385   : > { %7575 = vmatprep.subr.bf16.mxu1 %v9266_v24  ;;  %9507 = vpow2.f32 %v6166_v53  ;;  %v9309_v53 = vld [vmem:[%s9954_s7 + $0x108] ss:$12 sps:$4 sm:$0xff]   ;;  %v9315_v62 = vld [vmem:[%s9954_s7 + $0xf0] ss:$12 sps:$4 sm:$0xff]   ;;  %vm6202_vm5 = vcmp.ge.f32.partialorder %v11013_v25, 0.0 }
 0x386   : > { %7535 = vmatpush1.bf16.msra.mxu0 %v9261_v34  ;;  %9509 = vpow2.f32 %v6170_v41  ;;  %v9312_v41 = vld [vmem:[%s9954_s7 + $0x288] ss:$12 sps:$4 sm:$0xff]   ;;  %v9332_v52 = vld [vmem:[%s9954_s7 + $0x244] ss:$12 sps:$4 sm:$0xff]  }
 0x387   : > { %7536 = vmatprep.subr.bf16.mxu0 %v9269_v38  ;;  %9511 = vpow2.f32 %v6176_v5  ;;  %v11021_v38 = vand.u32 2147483647, %v11013_v25  ;;  %v9324_v5 = vld [vmem:[%s9954_s7 + $0x258] ss:$12 sps:$4 sm:$0xff]  }
 0x388   : > { %7576 = vmatpush1.bf16.msra.mxu1 %v9264_v36  ;;  %v9455_v25 = vld [vmem:[%s9954_s7 + $0x558] ss:$12 sps:$4 sm:$0xff]  }
 0x389   : > { %7577 = vmatprep.subr.bf16.mxu1 %v9272_v40 }
 0x38a   : > { %7537 = vmatpush1.bf16.msra.mxu0 %v9267_v57 }
 0x38b   : > { %7538 = vmatprep.subr.bf16.mxu0 %v9275_v47  ;;  %v6050_v47 = vmul.f32 0.3275911, %v11021_v38 }
 0x38c   : > { %7578 = vmatpush1.bf16.msra.mxu1 %v9270_v46 }
 0x38d   : > { %7579 = vmatprep.subr.bf16.mxu1 %v9278_v16  ;;  %v6058_v55 = vadd.f32 1.0, %v6050_v47 }
 0x38e   : > { %7539 = vmatpush1.bf16.msra.mxu0 %v9273_v50  ;;  %v9317_v50 = vld [vmem:[%s9954_s7 + $0xf4] ss:$12 sps:$4 sm:$0xff]  }
 0x38f   : > { %7540 = vmatprep.subr.bf16.mxu0 %v9281_v61  ;;  %9513 = vrcp.f32 %v6058_v55 }
 0x390   : > { %7580 = vmatpush1.bf16.msra.mxu1 %v9276_v35 }
 0x391   : > { %7581 = vmatprep.subr.bf16.mxu1 %v9284_v54  ;;  %v9506_v2 = vpop.eup %9505  ;;  %v9320_v54 = vld [vmem:[%s9954_s7 + $0x274] ss:$12 sps:$4 sm:$0xff]  }
 0x392   : > { %7541 = vmatpush1.bf16.msra.mxu0 %v9279_v60  ;;  %v6083_v8 = vmul.f32 1.0614054, %v9506_v2  ;;  %v9508_v30 = vpop.eup %9507 }
 0x393   : > { %7542 = vmatprep.subr.bf16.mxu0 %v9287_v22  ;;  %v9510_v34 = vpop.eup %9509  ;;  %v6182_v36 = vmul.f32 %v9508_v30, %v6142_v59  ;;  %v9323_v22 = vld [vmem:[%s9954_s7 + $0xdc] ss:$12 sps:$4 sm:$0xff]  }
 0x394   : > { %7582 = vmatpush1.bf16.msra.mxu1 %v9282_v6  ;;  %v6091_v17 = vadd.f32 -1.4531521, %v6083_v8  ;;  %v6184_v42 = vmul.f32 %v9510_v34, %v6144_v23  ;;  %v9512_v35 = vpop.eup %9511  ;;  %v9318_v6 = vld [vmem:[%s9954_s7 + $0x270] ss:$12 sps:$4 sm:$0xff]   ;;  %v9411_v30 = vld [vmem:[%s9954_s7 + $0x528] ss:$12 sps:$4 sm:$0xff]  }
 0x395   : > { %7583 = vmatprep.subr.bf16.mxu1 %v9290_v7  ;;  %v6190_v46 = vsub.f32 1.0, %v6182_v36  ;;  %v1155_v34 = vld [vmem:[%s9946_s16 + $0x38] sm:$0xff]  ;;  %v9418_v36 = vld [vmem:[%s9954_s7 + $0x514] ss:$12 sps:$4 sm:$0xff]  }
 0x396   : > { %7543 = vmatpush2.bf16.msra.mxu0 %v9285_v9  ;;  %v6099_v18 = vmul.f32 %v9506_v2, %v6091_v17  ;;  %v6192_v16 = vsub.f32 1.0, %v6184_v42  ;;  %v9327_v17 = vld [vmem:[%s9954_s7 + $0xc0] ss:$12 sps:$4 sm:$0xff]  }
 0x397   : > { %7544 = vmatprep.subr.bf16.mxu0 %v9293_v29  ;;  %v6206_v61 = vsub.f32 0.0, %v6190_v46  ;;  %v9329_v29 = vld [vmem:[%s9954_s7 + $0xc4] ss:$12 sps:$4 sm:$0xff]  }
 0x398   : > { %7584 = vmatpush2.bf16.msra.mxu1 %v9288_v28  ;;  %v6107_v24 = vadd.f32 1.4214138, %v6099_v18  ;;  %v6208_v49 = vsub.f32 0.0, %v6192_v16  ;;  %v9335_v18 = vld [vmem:[%s9954_s7 + $0x3ac] ss:$12 sps:$4 sm:$0xff]  }
 0x399   : > { %7585 = vmatprep.subr.bf16.mxu1 %v9296_v10  ;;  %v6214_v7 = vsel %vm6198_vm2, %v6190_v46, %v6206_v61  ;;  %v6022_v10 = vmul.f32 0.5, %v10457_v26 }
 0x39a   : > { %7545 = vmatpush2.bf16.msra.mxu0 %v9291_v13  ;;  %v6115_v44 = vmul.f32 %v9506_v2, %v6107_v24  ;;  %v6222_v28 = vadd.f32 1.0, %v6214_v7  ;;  %v1154_v24 = vld [vmem:[%s9946_s16 + $0x30] sm:$0xff]  ;;  %v6154_v7 = vsub.f32 0.0, %v11021_v38 }
 0x39b   : > { %7546 = vmatprep.subr.bf16.mxu0 %v9299_v15  ;;  %v9330_v15 = vld [vmem:[%s9954_s7 + $0x240] ss:$12 sps:$4 sm:$0xff]  }
 0x39c   : > { %7586 = vmatpush2.bf16.msra.mxu1 %v9294_v39  ;;  %v6123_v40 = vadd.f32 -0.28449672, %v6115_v44  ;;  %v6230_v13 = vmul.f32 %v6222_v28, %v6022_v10  ;;  %v6027_v39 = vmul.f32 0.5, %v10964_v3  ;;  %v9338_v3 = vld [vmem:[%s9954_s7 + $0x394] ss:$12 sps:$4 sm:$0xff]  }
 0x39d   : > { %7587 = vmatprep.subr.bf16.mxu1 %v9302_v21  ;;  %v9413_v21 = vld [vmem:[%s9954_s7 + $0x52c] ss:$12 sps:$4 sm:$0xff]   ;;  %v9430_v28 = vld [vmem:[%s9954_s7 + $0x4b4] ss:$12 sps:$4 sm:$0xff]   ;;  %v9433_v10 = vld [vmem:[%s9954_s7 + $0x49c] ss:$12 sps:$4 sm:$0xff]  }
 0x39e   : > { %7547 = vmatpush2.bf16.msra.mxu0 %v9297_v27  ;;  %v6131_v57 = vmul.f32 %v9506_v2, %v6123_v40  ;;  %v11052_v23 = vpack.c.bf16 %v6230_v13, %v6230_v13  ;;  %v9336_v40 = vld [vmem:[%s9954_s7 + $0x390] ss:$12 sps:$4 sm:$0xff]   ;;  %v9431_v13 = vld [vmem:[%s9954_s7 + $0x498] ss:$12 sps:$4 sm:$0xff]  }
 0x39f   : > { %7548 = vmatprep.subr.bf16.mxu0 %v9305_v32 }
 0x3a0   : > { %7588 = vmatpush2.bf16.msra.mxu1 %v9300_v31  ;;  %v6139_v51 = vadd.f32 0.2548296, %v6131_v57  ;;  %v11059_v31 = vpop.eup %9513 }
 0x3a1   : > { %7589 = vmatprep.subr.bf16.mxu1 %v9308_v20 }
 0x3a2   : > { %7549 = vmatpush2.bf16.msra.mxu0 %v9303_v14  ;;  %v6147_v4 = vmul.f32 %v9506_v2, %v6139_v51  ;;  %v6216_v2 = vsel %vm6200_vm3, %v6192_v16, %v6208_v49  ;;  %v9421_v51 = vld [vmem:[%s9954_s7 + $0x4fc] ss:$12 sps:$4 sm:$0xff]   ;;  %v9424_v49 = vld [vmem:[%s9954_s7 + $0x4e4] ss:$12 sps:$4 sm:$0xff]  }
 0x3a3   : > { %7550 = vmatprep.subr.bf16.mxu0 %v9311_v58  ;;  %v6224_v33 = vadd.f32 1.0, %v6216_v2  ;;  %v6082_v58 = vmul.f32 1.0614054, %v11059_v31  ;;  %v9350_v2 = vld [vmem:[%s9954_s7 + $0x334] ss:$12 sps:$4 sm:$0xff]  }
 0x3a4   : > { %7590 = vmatpush2.bf16.msra.mxu1 %v9306_v19  ;;  %v6187_v60 = vmul.f32 %v9512_v35, %v6147_v4  ;;  %v9341_v19 = vld [vmem:[%s9954_s7 + $0x37c] ss:$12 sps:$4 sm:$0xff]   ;;  %v9344_v35 = vld [vmem:[%s9954_s7 + $0x364] ss:$12 sps:$4 sm:$0xff]  }
 0x3a5   : > { %7591 = vmatprep.subr.bf16.mxu1 %v9314_v48  ;;  %v6232_v59 = vmul.f32 %v6224_v33, %v6024_v12  ;;  %v9416_v48 = vld [vmem:[%s9954_s7 + $0x510] ss:$12 sps:$4 sm:$0xff]   ;;  %v6090_v61 = vadd.f32 -1.4531521, %v6082_v58  ;;  %v9351_v12 = vld [vmem:[%s9954_s7 + $0x318] ss:$12 sps:$4 sm:$0xff]  }
 0x3a6   : > { %7551 = vmatpush2.bf16.msra.mxu0 %v9309_v53  ;;  %v6195_v63 = vsub.f32 1.0, %v6187_v60  ;;  %v9342_v60 = vld [vmem:[%s9954_s7 + $0x360] ss:$12 sps:$4 sm:$0xff]   ;;  %v9368_v58 = vld [vmem:[%s9954_s7 + $0x424] ss:$12 sps:$4 sm:$0xff]  }
 0x3a7   : > { %7552 = vmatprep.subr.bf16.mxu0 %v9317_v50  ;;  %v11056_v27 = vpack.c.bf16 %v6232_v59, %v6232_v59  ;;  %v9339_v50 = vld [vmem:[%s9954_s7 + $0x378] ss:$12 sps:$4 sm:$0xff]  }
 0x3a8   : > { %7592 = vmatpush2.bf16.msra.mxu1 %v9312_v41  ;;  %v6211_v9 = vsub.f32 0.0, %v6195_v63 }
 0x3a9   : > { %7593 = vmatprep.subr.bf16.mxu1 %v9320_v54  ;;  %v9419_v54 = vld [vmem:[%s9954_s7 + $0x4f8] ss:$12 sps:$4 sm:$0xff]  }
 0x3aa   : > { %7553 = vmatpush2.bf16.msra.mxu0 %v9315_v62  ;;  %v6219_v8 = vsel %vm6203_vm4, %v6195_v63, %v6211_v9  ;;  %v9347_v62 = vld [vmem:[%s9954_s7 + $0x34c] ss:$12 sps:$4 sm:$0xff]  }
 0x3ab   : > { %7554 = vmatprep.subr.bf16.mxu0 %v9323_v22  ;;  %v6227_v11 = vadd.f32 1.0, %v6219_v8  ;;  %v9422_v22 = vld [vmem:[%s9954_s7 + $0x4e0] ss:$12 sps:$4 sm:$0xff]   ;;  %v9353_v8 = vld [vmem:[%s9954_s7 + $0x31c] ss:$12 sps:$4 sm:$0xff]  }
 0x3ac   : > { %7594 = vmatpush2.bf16.msra.mxu1 %v9318_v6  ;;  %v6098_v6 = vmul.f32 %v11059_v31, %v6090_v61  ;;  %v9427_v63 = vld [vmem:[%s9954_s7 + $0x4cc] ss:$12 sps:$4 sm:$0xff]  }
 0x3ad   : > { %7595 = vmatprep.subr.bf16.mxu1 %v9326_v45  ;;  %v6235_v26 = vmul.f32 %v6227_v11, %v6027_v39  ;;  %v9345_v45 = vld [vmem:[%s9954_s7 + $0x348] ss:$12 sps:$4 sm:$0xff]   ;;  %v9436_v39 = vld [vmem:[%s9954_s7 + $0x484] ss:$12 sps:$4 sm:$0xff]  }
 0x3ae   : > { %7555 = vmatpush2.bf16.msra.mxu0 %v9321_v43  ;;  %v6106_v9 = vadd.f32 1.4214138, %v6098_v6  ;;  %v9425_v43 = vld [vmem:[%s9954_s7 + $0x4c8] ss:$12 sps:$4 sm:$0xff]   ;;  %v9452_v6 = vld [vmem:[%s9954_s7 + $0x570] ss:$12 sps:$4 sm:$0xff]  }
 0x3af   : > { %7556 = vmatprep.subr.bf16.mxu0 %v9329_v29  ;;  %v11062_v44 = vpack.c.bf16 %v6235_v26, %v6235_v26  ;;  %v9348_v29 = vld [vmem:[%s9954_s7 + $0x330] ss:$12 sps:$4 sm:$0xff]   ;;  %v9439_v26 = vld [vmem:[%s9954_s7 + $0x5ec] ss:$12 sps:$4 sm:$0xff]  }
 0x3b0   : > { %7596 = vmatpush2.bf16.msra.mxu1 %v9324_v5  ;;  %v6162_v5 = vmul.f32 %v6154_v7, %v11021_v38  ;;  %v6114_v33 = vmul.f32 %v11059_v31, %v6106_v9  ;;  %v9356_v38 = vld [vmem:[%s9954_s7 + $0x304] ss:$12 sps:$4 sm:$0xff]  }
 0x3b1   : > { %7597 = vmatprep.subr.bf16.mxu1 %v9332_v52  ;;  %v9428_v52 = vld [vmem:[%s9954_s7 + $0x4b0] ss:$12 sps:$4 sm:$0xff]  }
 0x3b2   : > { %7557 = vmatpush2.bf16.msra.mxu0 %v9327_v17  ;;  %v6174_v11 = vmul.f32 1.442695, %v6162_v5  ;;  %v6122_v17 = vadd.f32 -0.28449672, %v6114_v33  ;;  %v9460_v9 = vld [vmem:[%s9954_s7 + $0x544] ss:$12 sps:$4 sm:$0xff]  }
 0x3b3   : > { %7608 = vmatprep.subr.bf16.mxu0 %v9335_v18  ;;  %v9359_v18 = vld [vmem:[%s9954_s7 + $0x46c] ss:$12 sps:$4 sm:$0xff]   ;;  %v9381_v5 = vld [vmem:[%s9954_s7 + $0x170] ss:$12 sps:$4 sm:$0xff]  }
 0x3b4   : > { %7598 = vmatpush2.bf16.msra.mxu1 %v9330_v15  ;;  %9515 = vpow2.f32 %v6174_v11  ;;  %v9354_v15 = vld [vmem:[%s9954_s7 + $0x300] ss:$12 sps:$4 sm:$0xff]   ;;  %v6130_v59 = vmul.f32 %v11059_v31, %v6122_v17  ;;  %v9382_v33 = vld [vmem:[%s9954_s7 + $0xb0] ss:$12 sps:$4 sm:$0xff]  }
 0x3b5   : > { %7649 = vmatprep.subr.bf16.mxu1 %v9413_v21  ;;  %v5810_v32 = vpop.f32.mrf.mxu0  ;;  %7559 = vmatmul.mubr.bf16.vlgmr.msra.gmra.mxu0 %v11052_v23  ;;  %v9434_v21 = vld [vmem:[%s9954_s7 + $0x480] ss:$12 sps:$4 sm:$0xff]  }
 0x3b6   : > { %v5811_v20 = vadd.f32 %v5810_v32, %v1154_v24  ;;  %7609 = vmatpush1.bf16.msra.mxu0 %v9333_v0  ;;  %7640 = vmatprep.mubr.bf16.mxu0 %v11062_v44  ;;  %v9357_v0 = vld [vmem:[%s9954_s7 + $0x468] ss:$12 sps:$4 sm:$0xff]  }
 0x3b7   : > { %v5851_v42 = vpop.f32.mrf.mxu1  ;;  %7600 = vmatmul.mubr.bf16.vlgmr.msra.gmra.mxu1 %v11056_v27  ;;  %v5812_v14 = vpop.f32.mrf.mxu0  ;;  %7610 = vmatprep.subr.bf16.mxu0 %v9338_v3  ;;  %v9362_v24 = vld [vmem:[%s9954_s7 + $0x454] ss:$12 sps:$4 sm:$0xff]   ;;  %v6138_v3 = vadd.f32 0.2548296, %v6130_v59 }
 0x3b8   : > { %v11071_v57 = vadd.f32 %v5851_v42, %v5811_v20  ;;  %v5813_v46 = vadd.f32 %v5812_v14, %v1155_v34  ;;  %7650 = vmatpush1.bf16.msra.mxu1 %v9411_v30  ;;  %v9437_v30 = vld [vmem:[%s9954_s7 + $0x5e8] ss:$12 sps:$4 sm:$0xff]   ;;  %v9360_v34 = vld [vmem:[%s9954_s7 + $0x450] ss:$12 sps:$4 sm:$0xff]   ;;  %v9363_v14 = vld [vmem:[%s9954_s7 + $0x438] ss:$12 sps:$4 sm:$0xff]  }
 0x3b9   : > { %v5853_v47 = vpop.f32.mrf.mxu1  ;;  %v5814_v16 = vpop.f32.mrf.mxu0  ;;  %7651 = vmatprep.subr.bf16.mxu1 %v9418_v36  ;;  %v9442_v32 = vld [vmem:[%s9954_s7 + $0x5d4] ss:$12 sps:$4 sm:$0xff]   ;;  %v9365_v36 = vld [vmem:[%s9954_s7 + $0x43c] ss:$12 sps:$4 sm:$0xff]   ;;  %v6146_v20 = vmul.f32 %v11059_v31, %v6138_v3  ;;  %v9448_v31 = vld [vmem:[%s9954_s7 + $0x5a4] ss:$12 sps:$4 sm:$0xff]  }
 0x3ba   : > { %v11075_v53 = vadd.f32 %v5853_v47, %v5813_v46  ;;  %7611 = vmatpush1.bf16.msra.mxu0 %v9336_v40  ;;  %v9440_v42 = vld [vmem:[%s9954_s7 + $0x5d0] ss:$12 sps:$4 sm:$0xff]   ;;  %v9443_v47 = vld [vmem:[%s9954_s7 + $0x5b8] ss:$12 sps:$4 sm:$0xff]   ;;  %v9386_v59 = vld [vmem:[%s9954_s7 + $0x80] ss:$12 sps:$4 sm:$0xff]  }
 0x3bb   : > { %v5855_v41 = vpop.f32.mrf.mxu1  ;;  %v5815_v4 = vpop.f32.mrf.mxu0  ;;  %7612 = vmatprep.subr.bf16.mxu0 %v9341_v19  ;;  %v9445_v40 = vld [vmem:[%s9954_s7 + $0x5bc] ss:$12 sps:$4 sm:$0xff]   ;;  %v9371_v16 = vld [vmem:[%s9954_s7 + $0x40c] ss:$12 sps:$4 sm:$0xff]  }
 0x3bc   : > { %7652 = vmatpush1.bf16.msra.mxu1 %v9416_v48  ;;  %v9366_v48 = vld [vmem:[%s9954_s7 + $0x420] ss:$12 sps:$4 sm:$0xff]   ;;  %v9369_v4 = vld [vmem:[%s9954_s7 + $0x408] ss:$12 sps:$4 sm:$0xff]   ;;  %v9390_v3 = vld [vmem:[%s9954_s7 + $0x50] ss:$12 sps:$4 sm:$0xff]  }
 0x3bd   : > { %v5856_v55 = vpop.f32.mrf.mxu1  ;;  %7653 = vmatprep.subr.bf16.mxu1 %v9421_v51  ;;  %v9446_v41 = vld [vmem:[%s9954_s7 + $0x5a0] ss:$12 sps:$4 sm:$0xff]  }
 0x3be   : > { %7613 = vmatpush1.bf16.msra.mxu0 %v9339_v50  ;;  %v9451_v50 = vld [vmem:[%s9954_s7 + $0x58c] ss:$12 sps:$4 sm:$0xff]   ;;  %v9449_v55 = vld [vmem:[%s9954_s7 + $0x588] ss:$12 sps:$4 sm:$0xff]  }
 0x3bf   : > { %7614 = vmatprep.subr.bf16.mxu0 %v9344_v35  ;;  %v9374_v35 = vld [vmem:[%s9954_s7 + $0x3f4] ss:$12 sps:$4 sm:$0xff]  }
 0x3c0   : > { %7654 = vmatpush1.bf16.msra.mxu1 %v9419_v54  ;;  %v9454_v54 = vld [vmem:[%s9954_s7 + $0x574] ss:$12 sps:$4 sm:$0xff]  }
 0x3c1   : > { %7655 = vmatprep.subr.bf16.mxu1 %v9424_v49  ;;  %v9516_v19 = vpop.eup %9515  ;;  %v9372_v49 = vld [vmem:[%s9954_s7 + $0x3f0] ss:$12 sps:$4 sm:$0xff]  }
 0x3c2   : > { %7615 = vmatpush1.bf16.msra.mxu0 %v9342_v60  ;;  %v6186_v46 = vmul.f32 %v9516_v19, %v6146_v20  ;;  %v9377_v60 = vld [vmem:[%s9954_s7 + $0x3dc] ss:$12 sps:$4 sm:$0xff]   ;;  %v9399_v19 = vld [vmem:[%s9954_s7 + $0x458] ss:$12 sps:$4 sm:$0xff]  }
 0x3c3   : > { %7616 = vmatprep.subr.bf16.mxu0 %v9347_v62  ;;  %v9395_v20 = vld [vmem:[%s9954_s7 + $0xc8] ss:$12 sps:$4 sm:$0xff]  }
 0x3c4   : > { %7656 = vmatpush1.bf16.msra.mxu1 %v9422_v22  ;;  %v6194_v51 = vsub.f32 1.0, %v6186_v46  ;;  %v9457_v22 = vld [vmem:[%s9954_s7 + $0x55c] ss:$12 sps:$4 sm:$0xff]   ;;  %v9401_v46 = vld [vmem:[%s9954_s7 + $0x440] ss:$12 sps:$4 sm:$0xff]  }
 0x3c5   : > { %7657 = vmatprep.subr.bf16.mxu1 %v9427_v63  ;;  %v9375_v63 = vld [vmem:[%s9954_s7 + $0x3d8] ss:$12 sps:$4 sm:$0xff]  }
 0x3c6   : > { %7617 = vmatpush1.bf16.msra.mxu0 %v9345_v45  ;;  %v6210_v61 = vsub.f32 0.0, %v6194_v51  ;;  %v9380_v45 = vld [vmem:[%s9954_s7 + $0x3c4] ss:$12 sps:$4 sm:$0xff]  }
 0x3c7   : > { %7618 = vmatprep.subr.bf16.mxu0 %v9350_v2  ;;  %v6026_v2 = vmul.f32 0.5, %v10958_v1  ;;  %v9383_v1 = vld [vmem:[%s9954_s7 + $0x158] ss:$12 sps:$4 sm:$0xff]  }
 0x3c8   : > { %7658 = vmatpush1.bf16.msra.mxu1 %v9425_v43  ;;  %v6218_v62 = vsel %vm6202_vm5, %v6194_v51, %v6210_v61  ;;  %v9378_v43 = vld [vmem:[%s9954_s7 + $0x3c0] ss:$12 sps:$4 sm:$0xff]   ;;  %v9408_v51 = vld [vmem:[%s9954_s7 + $0x338] ss:$12 sps:$4 sm:$0xff]  }
 0x3c9   : > { %7659 = vmatprep.subr.bf16.mxu1 %v9430_v28  ;;  %v6226_v7 = vadd.f32 1.0, %v6218_v62 }
 0x3ca   : > { %7619 = vmatpush1.bf16.msra.mxu0 %v9348_v29  ;;  %v9458_v29 = vld [vmem:[%s9954_s7 + $0x540] ss:$12 sps:$4 sm:$0xff]  }
 0x3cb   : > { %7620 = vmatprep.subr.bf16.mxu0 %v9353_v8  ;;  %v6234_v28 = vmul.f32 %v6226_v7, %v6026_v2  ;;  %v9461_v8 = vld [vmem:[%s9954_s7 + $0x2f0] ss:$12 sps:$4 sm:$0xff]  }
 0x3cc   : > { %7660 = vmatpush1.bf16.msra.mxu1 %v9428_v52 }
 0x3cd   : > { %7661 = vmatprep.subr.bf16.mxu1 %v9433_v10  ;;  %v11142_v52 = vpack.c.bf16 %v6234_v28, %v6234_v28 }
 0x3ce   : > { %7621 = vmatpush1.bf16.msra.mxu0 %v9351_v12 }
 0x3cf   : > { %7622 = vmatprep.subr.bf16.mxu0 %v9356_v38  ;;  %v9384_v38 = vld [vmem:[%s9954_s7 + $0x98] ss:$12 sps:$4 sm:$0xff]  }
 0x3d0   : > { %7662 = vmatpush1.bf16.msra.mxu1 %v9431_v13  ;;  %v9385_v13 = vld [vmem:[%s9954_s7 + $0x140] ss:$12 sps:$4 sm:$0xff]  }
 0x3d1   : > { %7663 = vmatprep.subr.bf16.mxu1 %v9436_v39 }
 0x3d2   : > { %7623 = vmatpush1.bf16.msra.mxu0 %v9354_v15 }
 0x3d3   : > { %7624 = vmatprep.subr.bf16.mxu0 %v9359_v18 }
 0x3d4   : > { %7664 = vmatpush1.bf16.msra.mxu1 %v9434_v21  ;;  %v9387_v21 = vld [vmem:[%s9954_s7 + $0x128] ss:$12 sps:$4 sm:$0xff]  }
 0x3d5   : > { %7665 = vmatprep.subr.bf16.mxu1 %v9439_v26 }
 0x3d6   : > { %7625 = vmatpush2.bf16.msra.mxu0 %v9357_v0  ;;  %v9388_v0 = vld [vmem:[%s9954_s7 + $0x68] ss:$12 sps:$4 sm:$0xff]  }
 0x3d7   : > { %7626 = vmatprep.subr.bf16.mxu0 %v9362_v24  ;;  %v9389_v24 = vld [vmem:[%s9954_s7 + $0x110] ss:$12 sps:$4 sm:$0xff]  }
 0x3d8   : > { %7666 = vmatpush2.bf16.msra.mxu1 %v9437_v30  ;;  %v9391_v30 = vld [vmem:[%s9954_s7 + $0xf8] ss:$12 sps:$4 sm:$0xff]  }
 0x3d9   : > { %7667 = vmatprep.subr.bf16.mxu1 %v9442_v32  ;;  %v9392_v32 = vld [vmem:[%s9954_s7 + $0x38] ss:$12 sps:$4 sm:$0xff]  }
 0x3da   : > { %7627 = vmatpush2.bf16.msra.mxu0 %v9360_v34  ;;  %v9393_v34 = vld [vmem:[%s9954_s7 + $0xe0] ss:$12 sps:$4 sm:$0xff]  }
 0x3db   : > { %7628 = vmatprep.subr.bf16.mxu0 %v9365_v36  ;;  %v9394_v36 = vld [vmem:[%s9954_s7 + $0x20] ss:$12 sps:$4 sm:$0xff]  }
 0x3dc   : > { %7668 = vmatpush2.bf16.msra.mxu1 %v9440_v42  ;;  %v9396_v42 = vld [vmem:[%s9954_s7 + $0x8] ss:$12 sps:$4 sm:$0xff]  }
 0x3dd   : > { %7669 = vmatprep.subr.bf16.mxu1 %v9445_v40  ;;  %v9397_v40 = vld [vmem:[%s9954_s7 + $0x470] ss:$12 sps:$4 sm:$0xff]  }
 0x3de   : > { %7629 = vmatpush2.bf16.msra.mxu0 %v9363_v14  ;;  %v9398_v14 = vld [vmem:[%s9954_s7 + $0x3b0] ss:$12 sps:$4 sm:$0xff]  }
 0x3df   : > { %7630 = vmatprep.subr.bf16.mxu0 %v9368_v58  ;;  %v9400_v58 = vld [vmem:[%s9954_s7 + $0x398] ss:$12 sps:$4 sm:$0xff]  }
 0x3e0   : > { %7670 = vmatpush2.bf16.msra.mxu1 %v9443_v47  ;;  %v9402_v47 = vld [vmem:[%s9954_s7 + $0x380] ss:$12 sps:$4 sm:$0xff]  }
 0x3e1   : > { %7671 = vmatprep.subr.bf16.mxu1 %v9448_v31  ;;  %v9403_v31 = vld [vmem:[%s9954_s7 + $0x428] ss:$12 sps:$4 sm:$0xff]  }
 0x3e2   : > { %7631 = vmatpush2.bf16.msra.mxu0 %v9366_v48  ;;  %v9404_v48 = vld [vmem:[%s9954_s7 + $0x368] ss:$12 sps:$4 sm:$0xff]  }
 0x3e3   : > { %7632 = vmatprep.subr.bf16.mxu0 %v9371_v16  ;;  %v9406_v16 = vld [vmem:[%s9954_s7 + $0x350] ss:$12 sps:$4 sm:$0xff]  }
 0x3e4   : > { %7672 = vmatpush2.bf16.msra.mxu1 %v9446_v41  ;;  %v9409_v41 = vld [vmem:[%s9954_s7 + $0x3e0] ss:$12 sps:$4 sm:$0xff]  }
 0x3e5   : > { %7673 = vmatprep.subr.bf16.mxu1 %v9451_v50  ;;  %v9410_v50 = vld [vmem:[%s9954_s7 + $0x320] ss:$12 sps:$4 sm:$0xff]  }
 0x3e6   : > { %7633 = vmatpush2.bf16.msra.mxu0 %v9369_v4  ;;  %v9414_v4 = vld [vmem:[%s9954_s7 + $0x3c8] ss:$12 sps:$4 sm:$0xff]  }
 0x3e7   : > { %7634 = vmatprep.subr.bf16.mxu0 %v9374_v35  ;;  %v9415_v35 = vld [vmem:[%s9954_s7 + $0x308] ss:$12 sps:$4 sm:$0xff]  }
 0x3e8   : > { %7674 = vmatpush2.bf16.msra.mxu1 %v9449_v55 }
 0x3e9   : > { %7675 = vmatprep.subr.bf16.mxu1 %v9454_v54 }
 0x3ea   : > { %7635 = vmatpush2.bf16.msra.mxu0 %v9372_v49 }
 0x3eb   : > { %7636 = vmatprep.subr.bf16.mxu0 %v9377_v60 }
 0x3ec   : > { %7676 = vmatpush2.bf16.msra.mxu1 %v9452_v6 }
 0x3ed   : > { %7677 = vmatprep.subr.bf16.mxu1 %v9457_v22 }
 0x3ee   : > { %7637 = vmatpush2.bf16.msra.mxu0 %v9375_v63 }
 0x3ef   : > { %7638 = vmatprep.subr.bf16.mxu0 %v9380_v45 }
 0x3f0   : > { %7678 = vmatpush2.bf16.msra.mxu1 %v9455_v25 }
 0x3f1   : > { %7679 = vmatprep.subr.bf16.mxu1 %v9460_v9 }
 0x3f2   : > { %7639 = vmatpush2.bf16.msra.mxu0 %v9378_v43 }
 0x3f3   : > { %9033 = vmatprep.subr.bf16.mxu0 %v9381_v5 }
 0x3f4   : > { %7680 = vmatpush2.bf16.msra.mxu1 %v9458_v29 }
 0x3f5   : > { %v5892_v10 = vpop.f32.mrf.mxu0  ;;  %7641 = vmatmul.mubr.bf16.vlgmr.msra.gmra.mxu0 %v11142_v52  ;;  %9055 = vmatprep.subr.bf16.mxu1 %v9461_v8 }
 0x3f6   : > { %v5893_v11 = vadd.f32 %v5892_v10, %v11071_v57  ;;  %9034 = vmatpush3.bf16.msra.mxu0 %v9382_v33  ;;  %7722 = vmatprep.mubr.bf16.mxu0 %v10944_v37 }
 0x3f7   : > { %v5933_v12 = vpop.f32.mrf.mxu1  ;;  %v11149_v17 = vpop.f32.mrf.mxu0  ;;  %9035 = vmatprep.subr.bf16.mxu0 %v9383_v1 }
 0x3f8   : > { %v11152_v39 = vadd.f32 %v5933_v12, %v5893_v11  ;;  %v5895_v61 = vadd.f32 %v11149_v17, %v11075_v53 }
 0x3f9   : > { %v11154_v15 = vpop.f32.mrf.mxu1  ;;  %v5896_v18 = vpop.f32.mrf.mxu0 }
 0x3fa   : > { %9036 = vmatpush3.bf16.msra.mxu0 %v9384_v38  ;;  %v5936_v54 = vadd.f32 %v11154_v15, %v5895_v61 }
 0x3fb   : > { %v5937_v57 = vpop.f32.mrf.mxu1  ;;  %v5897_v37 = vpop.f32.mrf.mxu0  ;;  %9037 = vmatprep.subr.bf16.mxu0 %v9385_v13 }
 0x3fd   : > { %v5938_v26 = vpop.f32.mrf.mxu1 }
 0x3fe   : > { %9038 = vmatpush3.bf16.msra.mxu0 %v9386_v59 }
 0x3ff   : > { %9039 = vmatprep.subr.bf16.mxu0 %v9387_v21 }
 0x402   : > { %9040 = vmatpush3.bf16.msra.mxu0 %v9388_v0 }
 0x403   : > { %9041 = vmatprep.subr.bf16.mxu0 %v9389_v24 }
 0x406   : > { %9042 = vmatpush3.bf16.msra.mxu0 %v9390_v3 }
 0x407   : > { %9043 = vmatprep.subr.bf16.mxu0 %v9391_v30 }
 0x40a   : > { %9044 = vmatpush3.bf16.msra.mxu0 %v9392_v32 }
 0x40b   : > { %9045 = vmatprep.subr.bf16.mxu0 %v9393_v34 }
 0x40e   : > { %9046 = vmatpush3.bf16.msra.mxu0 %v9394_v36 }
 0x40f   : > { %9047 = vmatprep.subr.bf16.mxu0 %v9395_v20 }
 0x412   : > { %9048 = vmatpush3.bf16.msra.mxu0 %v9396_v42 }
 0x413   : > { %9077 = vmatprep.subr.bf16.mxu0 %v9397_v40 }
 0x415   : > { %7723 = vmatmul.mubr.bf16.vlgmr.msra.gmra.mxu0 %v11052_v23  ;;  %v9405_v23 = vld [vmem:[%s9954_s7 + $0x410] ss:$12 sps:$4 sm:$0xff]  }
 0x416   : > { %9078 = vmatpush3.bf16.msra.mxu0 %v9398_v14  ;;  %7802 = vmatprep.mubr.bf16.mxu0 %v11062_v44  ;;  %v9407_v44 = vld [vmem:[%s9954_s7 + $0x3f8] ss:$12 sps:$4 sm:$0xff]  }
 0x417   : > { %9079 = vmatprep.subr.bf16.mxu0 %v9399_v19 }
 0x41a   : > { %9080 = vmatpush3.bf16.msra.mxu0 %v9400_v58 }
 0x41b   : > { %9081 = vmatprep.subr.bf16.mxu0 %v9401_v46 }
 0x41e   : > { %9082 = vmatpush3.bf16.msra.mxu0 %v9402_v47 }
 0x41f   : > { %9083 = vmatprep.subr.bf16.mxu0 %v9403_v31 }
 0x422   : > { %9084 = vmatpush3.bf16.msra.mxu0 %v9404_v48 }
 0x423   : > { %9085 = vmatprep.subr.bf16.mxu0 %v9405_v23 }
 0x426   : > { %9086 = vmatpush3.bf16.msra.mxu0 %v9406_v16 }
 0x427   : > { %9087 = vmatprep.subr.bf16.mxu0 %v9407_v44 }
 0x42a   : > { %9088 = vmatpush3.bf16.msra.mxu0 %v9408_v51 }
 0x42b   : > { %9089 = vmatprep.subr.bf16.mxu0 %v9409_v41 }
 0x42e   : > { %9090 = vmatpush3.bf16.msra.mxu0 %v9410_v50 }
 0x42f   : > { %9091 = vmatprep.subr.bf16.mxu0 %v9414_v4 }
 0x432   : > { %9092 = vmatpush3.bf16.msra.mxu0 %v9415_v35 }
 0x435   : > { %v5974_v55 = vpop.f32.mrf.mxu0  ;;  %7803 = vmatmul.mubr.bf16.vlgmr.msra.gmra.mxu0 %v11142_v52 }
 0x436   : > { %v5975_v49 = vadd.f32 %v5974_v55, %v11152_v39 }
 0x437   : > { %v6015_v60 = vpop.f32.mrf.mxu1  ;;  %v5976_v62 = vpop.f32.mrf.mxu0 }
 0x438   : > { %v6016_v6 = vadd.f32 %v6015_v60, %v5975_v49  ;;  %v5977_v22 = vadd.f32 %v5976_v62, %v5936_v54  ;;  %v9462_v49 = vld [vmem:[%s9954_s7 + $0x230] ss:$12 sps:$4 sm:$0xff]   ;;  %v9463_v62 = vld [vmem:[%s9954_s7 + $0x2d8] ss:$12 sps:$4 sm:$0xff]  }
 0x439   : > { %v6017_v63 = vpop.f32.mrf.mxu1  ;;  %v5978_v7 = vpop.f32.mrf.mxu0 }
 0x43a   : > { %v6036_v45 = vmul.f32 0.70710677, %v6016_v6  ;;  %v6018_v25 = vadd.f32 %v6017_v63, %v5977_v22  ;;  %v6028_v41 = vmul.f32 0.5, %v6016_v6  ;;  %v9464_v6 = vld [vmem:[%s9954_s7 + $0x218] ss:$12 sps:$4 sm:$0xff]  }
 0x43b   : > { %v6019_v2 = vpop.f32.mrf.mxu1  ;;  %v5979_v9 = vpop.f32.mrf.mxu0  ;;  %v9465_v63 = vld [vmem:[%s9954_s7 + $0x2c0] ss:$12 sps:$4 sm:$0xff]  }
 0x43c   : > { %v6044_v43 = vand.u32 2147483647, %v6036_v45  ;;  %v6037_v53 = vmul.f32 0.70710677, %v6018_v25  ;;  %vm6204_vm6 = vcmp.ge.f32.partialorder %v6036_v45, 0.0  ;;  %v6029_v4 = vmul.f32 0.5, %v6018_v25 }
 0x43d   : > { %v6020_v28 = vpop.f32.mrf.mxu1  ;;  %v9466_v9 = vld [vmem:[%s9954_s7 + $0x200] ss:$12 sps:$4 sm:$0xff]  }
 0x43e   : > { %v6052_v5 = vmul.f32 0.3275911, %v6044_v43  ;;  %v6045_v29 = vand.u32 2147483647, %v6037_v53  ;;  %v6156_v1 = vsub.f32 0.0, %v6044_v43  ;;  %vm6205_vm7 = vcmp.ge.f32.partialorder %v6037_v53, 0.0 }
 0x440   : > { %v6060_v8 = vadd.f32 1.0, %v6052_v5  ;;  %v6053_v33 = vmul.f32 0.3275911, %v6045_v29  ;;  %v6157_v10 = vsub.f32 0.0, %v6045_v29  ;;  %v6164_v11 = vmul.f32 %v6156_v1, %v6044_v43  ;;  %v9471_v1 = vld [vmem:[%s9954_s7 + $0x278] ss:$12 sps:$4 sm:$0xff]  }
 0x442   : > { %9517 = vrcp.f32 %v6060_v8  ;;  %v6061_v52 = vadd.f32 1.0, %v6053_v33  ;;  %v6165_v38 = vmul.f32 %v6157_v10, %v6045_v29  ;;  %v6178_v13 = vmul.f32 1.442695, %v6164_v11  ;;  %v9468_v8 = vld [vmem:[%s9954_s7 + $0x1e8] ss:$12 sps:$4 sm:$0xff]  }
 0x443   : > { %v9469_v33 = vld [vmem:[%s9954_s7 + $0x290] ss:$12 sps:$4 sm:$0xff]   ;;  %v9472_v10 = vld [vmem:[%s9954_s7 + $0x1b8] ss:$12 sps:$4 sm:$0xff]   ;;  %v9473_v11 = vld [vmem:[%s9954_s7 + $0x260] ss:$12 sps:$4 sm:$0xff]  }
 0x444   : > { %9519 = vrcp.f32 %v6061_v52  ;;  %v6180_v18 = vmul.f32 1.442695, %v6165_v38  ;;  %v9470_v52 = vld [vmem:[%s9954_s7 + $0x1d0] ss:$12 sps:$4 sm:$0xff]   ;;  %v9475_v38 = vld [vmem:[%s9954_s7 + $0x248] ss:$12 sps:$4 sm:$0xff]  }
 0x445   : > { %9521 = vpow2.f32 %v6178_v13  ;;  %v9477_v13 = vld [vmem:[%s9954_s7 + $0x5f0] ss:$12 sps:$4 sm:$0xff]  }
 0x446   : > { %9523 = vpow2.f32 %v6180_v18  ;;  %v9480_v18 = vld [vmem:[%s9954_s7 + $0x518] ss:$12 sps:$4 sm:$0xff]  }
 0x44f   : > { %v9518_v12 = vpop.eup %9517 }
 0x450   : > { %v6084_v17 = vmul.f32 1.0614054, %v9518_v12 }
 0x451   : > { %v9520_v39 = vpop.eup %9519 }
 0x452   : > { %v6092_v15 = vadd.f32 -1.4531521, %v6084_v17  ;;  %v6085_v57 = vmul.f32 1.0614054, %v9520_v39  ;;  %v9522_v40 = vpop.eup %9521  ;;  %v9476_v17 = vld [vmem:[%s9954_s7 + $0x188] ss:$12 sps:$4 sm:$0xff]  }
 0x453   : > { %v9524_v46 = vpop.eup %9523 }
 0x454   : > { %v6100_v59 = vmul.f32 %v9518_v12, %v6092_v15  ;;  %v6093_v37 = vadd.f32 -1.4531521, %v6085_v57  ;;  %v9479_v15 = vld [vmem:[%s9954_s7 + $0x5d8] ss:$12 sps:$4 sm:$0xff]   ;;  %v9481_v57 = vld [vmem:[%s9954_s7 + $0x5c0] ss:$12 sps:$4 sm:$0xff]  }
 0x456   : > { %v6108_v21 = vadd.f32 1.4214138, %v6100_v59  ;;  %v6101_v26 = vmul.f32 %v9520_v39, %v6093_v37  ;;  %v9482_v59 = vld [vmem:[%s9954_s7 + $0x500] ss:$12 sps:$4 sm:$0xff]   ;;  %v9483_v37 = vld [vmem:[%s9954_s7 + $0x5a8] ss:$12 sps:$4 sm:$0xff]  }
 0x458   : > { %v6116_v0 = vmul.f32 %v9518_v12, %v6108_v21  ;;  %v6109_v24 = vadd.f32 1.4214138, %v6101_v26  ;;  %v9484_v21 = vld [vmem:[%s9954_s7 + $0x4e8] ss:$12 sps:$4 sm:$0xff]   ;;  %v9485_v26 = vld [vmem:[%s9954_s7 + $0x590] ss:$12 sps:$4 sm:$0xff]  }
 0x45a   : > { %v6124_v3 = vadd.f32 -0.28449672, %v6116_v0  ;;  %v6117_v30 = vmul.f32 %v9520_v39, %v6109_v24  ;;  %v9487_v0 = vld [vmem:[%s9954_s7 + $0x578] ss:$12 sps:$4 sm:$0xff]  }
 0x45b   : > { %v9488_v24 = vld [vmem:[%s9954_s7 + $0x4b8] ss:$12 sps:$4 sm:$0xff]  }
 0x45c   : > { %v6132_v32 = vmul.f32 %v9518_v12, %v6124_v3  ;;  %v6125_v34 = vadd.f32 -0.28449672, %v6117_v30  ;;  %v9489_v3 = vld [vmem:[%s9954_s7 + $0x560] ss:$12 sps:$4 sm:$0xff]  }
 0x45d   : > { %v9490_v30 = vld [vmem:[%s9954_s7 + $0x4a0] ss:$12 sps:$4 sm:$0xff]  }
 0x45e   : > { %v6140_v36 = vadd.f32 0.2548296, %v6132_v32  ;;  %v6133_v20 = vmul.f32 %v9520_v39, %v6125_v34  ;;  %v9491_v32 = vld [vmem:[%s9954_s7 + $0x548] ss:$12 sps:$4 sm:$0xff]  }
 0x45f   : > { %v9492_v34 = vld [vmem:[%s9954_s7 + $0x488] ss:$12 sps:$4 sm:$0xff]  }
 0x460   : > { %v6148_v42 = vmul.f32 %v9518_v12, %v6140_v36  ;;  %v6141_v14 = vadd.f32 0.2548296, %v6133_v20  ;;  %v9474_v12 = vld [vmem:[%s9954_s7 + $0x1a0] ss:$12 sps:$4 sm:$0xff]  }
 0x462   : > { %v6188_v19 = vmul.f32 %v9522_v40, %v6148_v42  ;;  %v6149_v58 = vmul.f32 %v9520_v39, %v6141_v14  ;;  %v9478_v39 = vld [vmem:[%s9954_s7 + $0x530] ss:$12 sps:$4 sm:$0xff]  }
 0x464   : > { %v6196_v47 = vsub.f32 1.0, %v6188_v19  ;;  %v6189_v31 = vmul.f32 %v9524_v46, %v6149_v58 }
 0x466   : > { %v6212_v48 = vsub.f32 0.0, %v6196_v47  ;;  %v6197_v23 = vsub.f32 1.0, %v6189_v31 }
 0x468   : > { %v6220_v16 = vsel %vm6204_vm6, %v6196_v47, %v6212_v48  ;;  %v6213_v51 = vsub.f32 0.0, %v6197_v23 }
 0x469   : > { %v6228_v44 = vadd.f32 1.0, %v6220_v16 }
 0x46a   : > { %v6221_v50 = vsel %vm6205_vm7, %v6197_v23, %v6213_v51 }
 0x46b   : > { %v6229_v35 = vadd.f32 1.0, %v6221_v50  ;;  %v6236_v61 = vmul.f32 %v6228_v44, %v6028_v41 }
 0x46d   : > { %v6237_v55 = vmul.f32 %v6229_v35, %v6029_v4  ;;  %v11191_v60 = vpack.c.bf16 %v6236_v61, %v6236_v61 }
 0x46f   : > { %v6245_v54 = vpack.c.bf16 %v6237_v55, %v6237_v55 }
 0x471   : > { %7681 = vmatprep.mubr.bf16.mxu1 %v6245_v54 }
 0x472   : > { %7682 = vmatmul.mubr.bf16.vlgmr.msra.gmra.mxu1 %v11191_v60 }
 0x473   : > { %9056 = vmatpush3.bf16.msra.mxu1 %v9462_v49  ;;  %7762 = vmatprep.mubr.bf16.mxu1 %v10951_v56  ;;  %v9467_v56 = vld [vmem:[%s9954_s7 + $0x2a8] ss:$12 sps:$4 sm:$0xff]  }
 0x474   : > { %9057 = vmatprep.subr.bf16.mxu1 %v9463_v62 }
 0x475   : > { %v7560_v22 = vpop.f32.mrf.mxu0 }
 0x477   : > { %v7601_v7 = vpop.f32.mrf.mxu1  ;;  %v7562_v25 = vpop.f32.mrf.mxu0  ;;  %9058 = vmatpush3.bf16.msra.mxu1 %v9464_v6 }
 0x478   : > { %v11198_v45 = vadd.f32 %v7601_v7, %v7560_v22  ;;  %9059 = vmatprep.subr.bf16.mxu1 %v9465_v63 }
 0x479   : > { %v7603_v2 = vpop.f32.mrf.mxu1  ;;  %v7564_v53 = vpop.f32.mrf.mxu0 }
 0x47a   : > { %v11201_v43 = vadd.f32 %v7603_v2, %v7562_v25 }
 0x47b   : > { %v7605_v28 = vpop.f32.mrf.mxu1  ;;  %v7565_v5 = vpop.f32.mrf.mxu0  ;;  %9060 = vmatpush3.bf16.msra.mxu1 %v9466_v9 }
 0x47c   : > { %9061 = vmatprep.subr.bf16.mxu1 %v9467_v56 }
 0x47d   : > { %v7606_v29 = vpop.f32.mrf.mxu1 }
 0x47f   : > { %9062 = vmatpush3.bf16.msra.mxu1 %v9468_v8 }
 0x480   : > { %9063 = vmatprep.subr.bf16.mxu1 %v9469_v33 }
 0x483   : > { %9064 = vmatpush3.bf16.msra.mxu1 %v9470_v52 }
 0x484   : > { %9065 = vmatprep.subr.bf16.mxu1 %v9471_v1 }
 0x487   : > { %9066 = vmatpush3.bf16.msra.mxu1 %v9472_v10 }
 0x488   : > { %9067 = vmatprep.subr.bf16.mxu1 %v9473_v11 }
 0x48b   : > { %9068 = vmatpush3.bf16.msra.mxu1 %v9474_v12 }
 0x48c   : > { %9069 = vmatprep.subr.bf16.mxu1 %v9475_v38 }
 0x48f   : > { %9070 = vmatpush3.bf16.msra.mxu1 %v9476_v17 }
 0x490   : > { %9099 = vmatprep.subr.bf16.mxu1 %v9477_v13 }
 0x492   : > { %7763 = vmatmul.mubr.bf16.vlgmr.msra.gmra.mxu1 %v11056_v27  ;;  %v9486_v27 = vld [vmem:[%s9954_s7 + $0x4d0] ss:$12 sps:$4 sm:$0xff]  }
 0x493   : > { %9100 = vmatpush3.bf16.msra.mxu1 %v9478_v39  ;;  %7842 = vmatprep.mubr.bf16.mxu1 %v6245_v54 }
 0x494   : > { %9101 = vmatprep.subr.bf16.mxu1 %v9479_v15 }
 0x497   : > { %9102 = vmatpush3.bf16.msra.mxu1 %v9480_v18 }
 0x498   : > { %9103 = vmatprep.subr.bf16.mxu1 %v9481_v57 }
 0x49b   : > { %9104 = vmatpush3.bf16.msra.mxu1 %v9482_v59 }
 0x49c   : > { %9105 = vmatprep.subr.bf16.mxu1 %v9483_v37 }
 0x49f   : > { %9106 = vmatpush3.bf16.msra.mxu1 %v9484_v21 }
 0x4a0   : > { %9107 = vmatprep.subr.bf16.mxu1 %v9485_v26 }
 0x4a3   : > { %9108 = vmatpush3.bf16.msra.mxu1 %v9486_v27 }
 0x4a4   : > { %9109 = vmatprep.subr.bf16.mxu1 %v9487_v0 }
 0x4a7   : > { %9110 = vmatpush3.bf16.msra.mxu1 %v9488_v24 }
 0x4a8   : > { %9111 = vmatprep.subr.bf16.mxu1 %v9489_v3 }
 0x4ab   : > { %9112 = vmatpush3.bf16.msra.mxu1 %v9490_v30 }
 0x4ac   : > { %9113 = vmatprep.subr.bf16.mxu1 %v9491_v32 }
 0x4af   : > { %9114 = vmatpush3.bf16.msra.mxu1 %v9492_v34 }
 0x4b2   : > { %7843 = vmatmul.mubr.bf16.vlgmr.msra.gmra.mxu1 %v11191_v60 }
 0x4b5   : > { %v7642_v36 = vpop.f32.mrf.mxu0 }
 0x4b6   : > { %v7643_v20 = vadd.f32 %v7642_v36, %v11198_v45 }
 0x4b7   : > { %v7644_v42 = vpop.f32.mrf.mxu0 }
 0x4b8   : > { %v7645_v40 = vadd.f32 %v7644_v42, %v11201_v43 }
 0x4b9   : > { %v7646_v14 = vpop.f32.mrf.mxu0 }
 0x4bb   : > { %v7647_v19 = vpop.f32.mrf.mxu0 }
 0x4d5   : > { %v9049_v58 = vpop.f32.mrf.mxu0 }
 0x4d7   : > { %v9050_v46 = vpop.f32.mrf.mxu0 }
 0x4d8   : > { %v9051_v47 = vadd.f32 %v9050_v46, %v9049_v58 }
 0x4d9   : > { %v9052_v31 = vpop.f32.mrf.mxu0 }
 0x4db   : > { %v9053_v48 = vpop.f32.mrf.mxu0 }
 0x4f5   : > { %v9093_v23 = vpop.f32.mrf.mxu0 }
 0x4f7   : > { %v9094_v16 = vpop.f32.mrf.mxu0 }
 0x4f8   : > { %v9095_v44 = vadd.f32 %v9094_v16, %v9093_v23 }
 0x4f9   : > { %v9096_v51 = vpop.f32.mrf.mxu0 }
 0x4fb   : > { %v9097_v41 = vpop.f32.mrf.mxu0 }
 0x532   : > { %v7683_v50 = vpop.f32.mrf.mxu1 }
 0x533   : > { %v7684_v4 = vadd.f32 %v7683_v50, %v7643_v20 }
 0x534   : > { %v7685_v35 = vpop.f32.mrf.mxu1 }
 0x535   : > { %v7686_v61 = vadd.f32 %v7685_v35, %v7645_v40 }
 0x536   : > { %v7687_v55 = vpop.f32.mrf.mxu1 }
 0x538   : > { %v7688_v54 = vpop.f32.mrf.mxu1 }
 0x552   : > { %v9071_v49 = vpop.f32.mrf.mxu1 }
 0x554   : > { %v9072_v60 = vpop.f32.mrf.mxu1 }
 0x555   : > { %v9073_v62 = vadd.f32 %v9072_v60, %v9071_v49 }
 0x556   : > { %v9074_v6 = vpop.f32.mrf.mxu1 }
 0x557   : > { %v7765_v22 = vadd.f32 %v9073_v62, %v9051_v47 }
 0x558   : > { %v9075_v63 = vpop.f32.mrf.mxu1 }
 0x559   : > { %v7805_v7 = vadd.f32 %v9095_v44, %v7765_v22 }
 0x572   : > { %v9115_v45 = vpop.f32.mrf.mxu1 }
 0x574   : > { %v9116_v25 = vpop.f32.mrf.mxu1  ;;  %7853 = sbr.rel (%p9025_p1) target bundleno = 1404 (0x57c), region = 64 }
 0x575   : > { %v9117_v2 = vadd.f32 %v9116_v25, %v9115_v45 }
 0x576   : > { %v9118_v9 = vpop.f32.mrf.mxu1 }
 0x577   : > { %v7845_v43 = vadd.f32 %v9117_v2, %v7805_v7 }
 0x578   : > { %v9119_v53 = vpop.f32.mrf.mxu1 }
 0x579   : > { %v9762_v56 = vmov 0.0  }
 0x57a   : > { %7854 = vst [vmem:[#allocation11] sm:$0xff] %v9762_v56  ;;  %7855 = vst [vmem:[#allocation11 + $0x8] sm:$0xff] %v9762_v56 }
 0x57b   : > { %7856 = vst [vmem:[#allocation11 + $0x10] sm:$0xff] %v9762_v56 }
 0x57c PF: > { %p7866_p4 = scmp.eq.s32.totalorder %s9743_s21, 1 }
 0x57d   : > { %v7877_v1 = vlaneseq (%p7866_p4)  ;;  %v7875_v11 = vld [vmem:[#allocation10] sm:$0x7] (%p7866_p4) }
 0x57f   : > { %v7878_v10 = vshrl.u32 (%p7866_p4), %v7877_v1, 7 }
 0x581   : > { %v7857_v28 = vld [vmem:[#allocation11] sm:$0xff]  ;;  %v7858_v5 = vld [vmem:[#allocation11 + $0x8] sm:$0xff]  ;;  %7871 = sbr.rel (!%p7866_p4) target bundleno = 1424 (0x590), region = 68  ;;  %v7879_v12 = vsub.s32 (%p7866_p4), 0, %v7878_v10  ;;  %v7883_v38 = vsub.s32 (%p7866_p4), 1, %v7878_v10  ;;  %v7887_v17 = vsub.s32 (%p7866_p4), 2, %v7878_v10 }
 0x582   : > { %v7859_v29 = vld [vmem:[#allocation11 + $0x10] sm:$0xff]  ;;  %v7860_v8 = vadd.f32 %v7857_v28, %v7684_v4  ;;  %v7861_v33 = vadd.f32 %v7858_v5, %v7686_v61 }
 0x583   : > { %v7862_v52 = vadd.f32 %v7859_v29, %v7845_v43  ;;  %v7880_v18 = vrot.slane (%p7866_p4), %v7875_v11, %v7879_v12  ;;  %v7884_v57 = vrot.slane (%p7866_p4), %v7875_v11, %v7883_v38  ;;  %v7888_v59 = vrot.slane (%p7866_p4), %v7875_v11, %v7887_v17 }
 0x584   : > { %7863 = vst [vmem:[#allocation11] sm:$0xff] %v7860_v8  ;;  %7864 = vst [vmem:[#allocation11 + $0x8] sm:$0xff] %v7861_v33 }
 0x585   : > { %7865 = vst [vmem:[#allocation11 + $0x10] sm:$0xff] %v7862_v52 }
 0x58b   : > { %v7872_v13 = vld [vmem:[#allocation11] sm:$0xff]  ;;  %v7873_v39 = vld [vmem:[#allocation11 + $0x8] sm:$0xff] }
 0x58c   : > { %v7874_v15 = vld [vmem:[#allocation11 + $0x10] sm:$0xff]  ;;  %v7892_v37 = vadd.f32 %v7880_v18, %v7872_v13  ;;  %v7893_v21 = vadd.f32 %v7884_v57, %v7873_v39 }
 0x58d   : > { %v7894_v26 = vadd.f32 %v7888_v59, %v7874_v15 }
 0x58e   : > { %7895 = vst [vmem:[#allocation11] sm:$0xff] %v7892_v37  ;;  %7896 = vst [vmem:[#allocation11 + $0x8] sm:$0xff] %v7893_v21 }
 0x58f   : > { %7897 = vst [vmem:[#allocation11 + $0x10] sm:$0xff] %v7894_v26 }
 0x590 PF: > { %p9167_p5 = scmp.eq.s32.totalorder %s9823_s24, 1  ;;  %s9763_s21 = smov [#allocation11]  }
 0x591   : > { %s7908_s25 = sshll.u32 %s9763_s21, 4  ;;  %s7909_s25 = int_to_ptr.vmem [resolvable:$true] %s7908_s25 }
 0x592   : > { %s9661_s9 = scalar_lea.vmem %s7909_s25, 384  ;;  %p9668_p12 = scmp.lt.s32.totalorder %s7909_s25, %s7909_s25 }
 0x593   : > { %p9662_p8 = scmp.ne.s32.totalorder %s7909_s25, %s9661_s9  ;;  %p9669_p7 = scmp.lt.s32.totalorder %s9661_s9, %s9661_s9 }
 0x595   : > { %p9663_p0 = pnand %p9662_p8, %p9167_p5  ;;  %p9670_p13 = por %p9669_p7, %p9668_p12 }
 0x597   : > { %p9664_p11 = pneg %p9663_p0 }
 0x599   : > { %p9671_p9 = pnand %p9670_p13, %p9664_p11 }
 0x59b   : > { %9674 = shalt.err (!%p9671_p9)
}
 0x59c   : > { %9142 = dma.vmem_to_hbm [thread:$0]  (%p9167_p5), %s7909_s25, 384, %s11270_s5, [#allocation4]  }
 0x59d   : > { %9726 = dma.done.wait (%p9167_p5), [#allocation4], 384  }
 0x59e   : > { %9728 = vsyncadd (%p9167_p5), [#allocation4], 4294966912 }
 0x59f PF: > { %s23_s23 = sadd.s32 1, %s9751_s23   ;;  %s11281_s18 = smov %s9735_s19 }
 0x5a0   : > { %p20_p2 = scmp.ge.s32.totalorder %s23_s23, 4   ;;  %s11282_s19 = smov %s9739_s20 }
 0x5a1   : > { %s11283_s20 = smov %s9872_s14  ;;  %s11284_s21 = smov %s9747_s22 }
 0x5a2   : > { %s11285_s22 = smov %s11287_s30  ;;  %22 = sbr.rel (!%p20_p2) target bundleno = 11 (0xb), region = 119 }
 0x5a7   :  { %7921 = vsyncpa [#allocation3], 1 }
 0x5a8   :  { %7923 = vsyncpa [#allocation3 + $0x1], 1 }
 0x5a9   :  { %7924 = vsyncpa [#allocation6], 1 }
 0x5aa   :  { %7926 = vsyncpa [#allocation6 + $0x1], 1 }
 0x5ab   :  { %7927 = vsyncpa [#allocation9], 1 }
 0x5ac   :  { %7929 = vsyncpa [#allocation9 + $0x1], 1 }
 0x5ad   :  { %7930 = vsyncpa [#allocation4], 1 }
 0x5ae   :  { %7932 = vsyncpa [#allocation4 + $0x1], 1 }

</bundles_post_ra>
